<compile_context>
chip_gen: v7x
topology: tpu7x:2x2x1
jax: 0.10.0
libtpu: 0.0.40
codegen_flags: <defaults>
</compile_context>

<pallas_src>
import functools

import jax
import jax.numpy as jnp
from jax import lax
from jax.experimental import pallas as pl
from jax.experimental.pallas import tpu as pltpu


# --------------------------------------------------------------------------
# Fused forward kernel
# --------------------------------------------------------------------------
def _fused_forward_kernel(
    # ---- inputs -----------------------------------------------------------
    x_ref, lnw_ref, lnb_ref,                       # (S*Bp, Din) each, row = t*Bp+b
    wih0F_ref, wih0B_ref, b0_ref, whh0_ref,        # (Din,8H) (Din,8H) (1,8H) (2H,8H)
    wih1Ft_ref, wih1Fb_ref, wih1Bt_ref, wih1Bb_ref, b1_ref, whh1_ref,
    win_ref, woutm_ref, woutq_ref,                 # (H,H) each
    whead_ref, bhead_ref,                          # (H,2) (1,2)
    # ---- outputs ----------------------------------------------------------
    out_ref,                                       # (S*Bp, 2) sigmoid heads
    # ---- VMEM scratch -----------------------------------------------------
    ginF_ref, ginB_ref,                            # (S*Bp, 8H) gate-input slabs (reused per layer)
    h0f_ref, h0b_ref, h1f_ref, h1b_ref,            # (S*Bp, H) time-aligned LSTM outputs
    *, Bp, S, Din, H, eps,
):
    f32 = jnp.float32
    SBp = S * Bp
    H2 = 2 * H

    # ---- LayerNorm over (S, Din) per batch element --------------------------
    x = x_ref[...].astype(f32)                               # (S*Bp, Din)
    n = float(S * Din)
    bid = lax.broadcasted_iota(jnp.int32, (SBp, 1), 0) % Bp  # batch id of each row
    xsum = jnp.sum(x, axis=1, keepdims=True)                 # (S*Bp, 1)

    mean_rows = jnp.zeros((SBp, 1), f32)
    for b in range(Bp):                                      # static, tiny (Bp <= ~16)
        msk = bid == b
        mean_rows = jnp.where(msk, jnp.sum(jnp.where(msk, xsum, 0.0)) / n, mean_rows)
    d = x - mean_rows
    dsq = jnp.sum(d * d, axis=1, keepdims=True)
    inv_rows = jnp.zeros((SBp, 1), f32)
    for b in range(Bp):
        msk = bid == b
        var = jnp.sum(jnp.where(msk, dsq, 0.0)) / n
        inv_rows = jnp.where(msk, lax.rsqrt(var + eps), inv_rows)
    xn = d * inv_rows * lnw_ref[...] + lnb_ref[...]          # (S*Bp, Din)

    # ---- one bidirectional LSTM layer ---------------------------------------
    # Gate slabs use a gate-major / direction-minor column layout:
    #   [ i_f i_b | f_f f_b | g_f g_b | o_f o_b ]  (each block H wide)
    # so the carry [h_f | h_b] (Bp, 2H) needs exactly one block-diagonal matmul
    # per step and the cell nonlinearity runs once on both directions.
    def bilstm(whh_cat, hf_out_ref, hb_out_ref):
        h_cat = jnp.zeros((Bp, H2), f32)
        c_cat = jnp.zeros((Bp, H2), f32)
        # Static unroll (S is small here).  For realistic S, switch to
        # lax.fori_loop(0, S, step, carry, unroll=4..8).
        for t in range(S):
            rf = t * Bp                 # fwd consumes input t at step t
            rb = (S - 1 - t) * Bp       # bwd consumes input S-1-t at step t
            g = (ginF_ref[rf:rf + Bp, :]
                 + ginB_ref[rb:rb + Bp, :]
                 + jnp.dot(h_cat, whh_cat, preferred_element_type=f32))  # (Bp, 8H)
            ig = jax.nn.sigmoid(g[:, 0 * H2:1 * H2])
            fg = jax.nn.sigmoid(g[:, 1 * H2:2 * H2])
            gg = jnp.tanh(g[:, 2 * H2:3 * H2])
            og = jax.nn.sigmoid(g[:, 3 * H2:4 * H2])
            c_cat = fg * c_cat + ig * gg
            h_cat = og * jnp.tanh(c_cat)
            hf_out_ref[rf:rf + Bp, :] = h_cat[:, :H]   # fwd output, time t
            hb_out_ref[rb:rb + Bp, :] = h_cat[:, H:]   # bwd output, time S-1-t
        return h_cat                                    # final [h_f | h_b]

    # ---- layer 0: input-gate slabs, then the recurrence ---------------------
    ginF_ref[...] = jnp.dot(xn, wih0F_ref[...], preferred_element_type=f32) + b0_ref[...]
    ginB_ref[...] = jnp.dot(xn, wih0B_ref[...], preferred_element_type=f32)
    h0_last = bilstm(whh0_ref[...], h0f_ref, h0b_ref)

    # ---- layer 1: input is [h0_fwd | h0_bwd]; weights split per input half ---
    h0f = h0f_ref[...]
    h0b = h0b_ref[...]
    ginF_ref[...] = (jnp.dot(h0f, wih1Ft_ref[...], preferred_element_type=f32)
                     + jnp.dot(h0b, wih1Fb_ref[...], preferred_element_type=f32)
                     + b1_ref[...])
    ginB_ref[...] = (jnp.dot(h0f, wih1Bt_ref[...], preferred_element_type=f32)
                     + jnp.dot(h0b, wih1Bb_ref[...], preferred_element_type=f32))
    h1_last = bilstm(whh1_ref[...], h1f_ref, h1b_ref)

    # ---- attention query (slab matmul over the whole sequence) --------------
    x1 = h1f_ref[...] + h1b_ref[...]                               # (S*Bp, H)
    q = jnp.dot(x1, win_ref[...], preferred_element_type=f32)      # (S*Bp, H)

    # One-hot (row -> batch) matrix: replicates each per-batch context to all
    # of its sequence rows with a single small matmul (no flips / tiles).
    onehot = (lax.broadcasted_iota(jnp.int32, (SBp, Bp), 0) % Bp
              == lax.broadcasted_iota(jnp.int32, (SBp, Bp), 1)).astype(f32)

    # hn.permute(1,0,2) order: [l0_fwd, l0_bwd, l1_fwd, l1_bwd]
    ctxs = (h0_last[:, :H], h0_last[:, H:], h1_last[:, :H], h1_last[:, H:])
    ctx_rows = [jnp.dot(onehot, c, preferred_element_type=f32) for c in ctxs]  # (S*Bp, H)

    scores = [jnp.sum(q * cr, axis=1, keepdims=True) for cr in ctx_rows]       # (S*Bp, 1)
    mmax = jnp.maximum(jnp.maximum(scores[0], scores[1]),
                       jnp.maximum(scores[2], scores[3]))
    es = [jnp.exp(s - mmax) for s in scores]
    inv_denom = pl.reciprocal(es[0] + es[1] + es[2] + es[3], approx=True)

    mix = (es[0] * ctx_rows[0] + es[1] * ctx_rows[1]
           + es[2] * ctx_rows[2] + es[3] * ctx_rows[3]) * inv_denom            # (S*Bp, H)

    # linear_out([mix | q]) split into its two (H, H) halves.
    attn = jnp.tanh(jnp.dot(mix, woutm_ref[...], preferred_element_type=f32)
                    + jnp.dot(q, woutq_ref[...], preferred_element_type=f32))

    # ---- both heads as one matmul -------------------------------------------
    heads = jnp.dot(attn, whead_ref[...], preferred_element_type=f32) + bhead_ref[...]
    out_ref[...] = jax.nn.sigmoid(heads)                                        # (S*Bp, 2)


# --------------------------------------------------------------------------
# Wrapper: tiny weight-only re-layout + one fused pallas_call
# --------------------------------------------------------------------------
def _interleave_dirs(w_f, w_b, H):
    """(din, 4H) x 2 (gate blocks [i|f|g|o]) -> (din, 8H) x 2 in the gate-major
    / direction-minor layout [i_f i_b | f_f f_b | g_f g_b | o_f o_b], with the
    other direction's column slots zeroed."""
    zf = jnp.zeros((w_f.shape[0], H), w_f.dtype)
    zb = jnp.zeros((w_b.shape[0], H), w_b.dtype)
    cols_f, cols_b = [], []
    for g in range(4):
        cols_f += [w_f[:, g * H:(g + 1) * H], zf]
        cols_b += [zb, w_b[:, g * H:(g + 1) * H]]
    return jnp.concatenate(cols_f, axis=1), jnp.concatenate(cols_b, axis=1)


def _prep_kernel_inputs(p, raw, S, Din, H, Bp):
    B = raw.shape[0]
    # Time-major rows (row = t*Bp + b), batch zero-padded to a sublane tile.
    x_tm = jnp.transpose(raw, (1, 0, 2))                      # (S, B, Din)
    x_tm = jnp.pad(x_tm, ((0, 0), (0, Bp - B), (0, 0)))
    x2d = x_tm.reshape(S * Bp, Din)

    lnw = jnp.repeat(p["ln_w"], Bp, axis=0)                   # (S*Bp, Din)
    lnb = jnp.repeat(p["ln_b"], Bp, axis=0)

    # layer 0
    wih0F, wih0B = _interleave_dirs(p["wih0f_T"], p["wih0b_T"], H)   # (Din, 8H)
    b0F, b0B = _interleave_dirs(p["b0f"], p["b0b"], H)               # (1, 8H)
    b0 = b0F + b0B
    whh0F, whh0B = _interleave_dirs(p["whh0f_T"], p["whh0b_T"], H)   # (H, 8H)
    whh0 = jnp.concatenate([whh0F, whh0B], axis=0)                   # (2H, 8H) block-diag

    # layer 1 (input dim 2H: rows [0:H] act on h0_fwd, rows [H:2H] on h0_bwd)
    wih1F, wih1B = _interleave_dirs(p["wih1f_T"], p["wih1b_T"], H)   # (2H, 8H)
    b1F, b1B = _interleave_dirs(p["b1f"], p["b1b"], H)
    b1 = b1F + b1B
    whh1F, whh1B = _interleave_dirs(p["whh1f_T"], p["whh1b_T"], H)
    whh1 = jnp.concatenate([whh1F, whh1B], axis=0)

    return (
        x2d, lnw, lnb,
        wih0F, wih0B, b0, whh0,
        wih1F[:H, :], wih1F[H:, :], wih1B[:H, :], wih1B[H:, :], b1, whh1,
        p["winT"], p["woutT"][:H, :], p["woutT"][H:, :],
        p["whead"], p["bhead"],
    )


def model_forward(p, raw, hidden):
    B, S, Din = raw.shape
    H = hidden
    Bp = ((B + 7) // 8) * 8          # pad batch to a sublane tile -> dense accesses
    args = _prep_kernel_inputs(p, raw, S, Din, H, Bp)
    kernel = functools.partial(_fused_forward_kernel,
                               Bp=Bp, S=S, Din=Din, H=H, eps=1e-5)
    out = pl.pallas_call(
        kernel,
        out_shape=jax.ShapeDtypeStruct((S * Bp, 2), jnp.float32),
        scratch_shapes=[
            pltpu.VMEM((S * Bp, 8 * H), jnp.float32),   # gate-input slab, fwd dir
            pltpu.VMEM((S * Bp, 8 * H), jnp.float32),   # gate-input slab, bwd dir
            pltpu.VMEM((S * Bp, H), jnp.float32),       # layer-0 fwd outputs
            pltpu.VMEM((S * Bp, H), jnp.float32),       # layer-0 bwd outputs
            pltpu.VMEM((S * Bp, H), jnp.float32),       # layer-1 fwd outputs
            pltpu.VMEM((S * Bp, H), jnp.float32),       # layer-1 bwd outputs
        ],
    )(*args)
    out3 = out.reshape(S, Bp, 2)[:, :B, :]               # drop batch padding
    return out3[:, :, 0].T, out3[:, :, 1].T              # (B, S) each


# --------------------------------------------------------------------------
# Pure-JAX reference (for correctness check)
# --------------------------------------------------------------------------
def reference_forward(p, raw, H):
    mean = jnp.mean(raw, axis=(1, 2), keepdims=True)
    var = jnp.mean((raw - mean) ** 2, axis=(1, 2), keepdims=True)
    x = (raw - mean) / jnp.sqrt(var + 1e-5) * p["ln_w"] + p["ln_b"]

    def run_dir(xin, wihT, whhT, bias):
        B = xin.shape[0]

        def cell(carry, xt):
            h, c = carry
            g = xt @ wihT + h @ whhT + bias
            i = jax.nn.sigmoid(g[:, :H])
            f = jax.nn.sigmoid(g[:, H:2 * H])
            gg = jnp.tanh(g[:, 2 * H:3 * H])
            o = jax.nn.sigmoid(g[:, 3 * H:])
            c = f * c + i * gg
            h = o * jnp.tanh(c)
            return (h, c), h

        h0 = jnp.zeros((B, H), jnp.float32)
        (hl, _), hs = lax.scan(cell, (h0, h0), jnp.swapaxes(xin, 0, 1))
        return jnp.swapaxes(hs, 0, 1), hl

    f0, f0h = run_dir(x, p["wih0f_T"], p["whh0f_T"], p["b0f"][0])
    b0r, b0h = run_dir(jnp.flip(x, 1), p["wih0b_T"], p["whh0b_T"], p["b0b"][0])
    b0 = jnp.flip(b0r, 1)
    x1 = jnp.concatenate([f0, b0], -1)
    f1, f1h = run_dir(x1, p["wih1f_T"], p["whh1f_T"], p["b1f"][0])
    b1r, b1h = run_dir(jnp.flip(x1, 1), p["wih1b_T"], p["whh1b_T"], p["b1b"][0])
    b1 = jnp.flip(b1r, 1)

    ctx = jnp.stack([f0h, b0h, f1h, b1h], axis=1)
    q = (f1 + b1) @ p["winT"]
    scores = jnp.einsum("bsh,bqh->bsq", q, ctx)
    w = jax.nn.softmax(scores, axis=-1)
    mix = jnp.einsum("bsq,bqh->bsh", w, ctx)
    comb = jnp.concatenate([mix, q], -1)
    attn_out = jnp.tanh(comb @ p["woutT"])
    heads = jax.nn.sigmoid(attn_out @ p["whead"] + p["bhead"][0])
    return heads[..., 0], heads[..., 1]


# --------------------------------------------------------------------------
# Deterministic parameter init (shapes from Model.__init__)
# --------------------------------------------------------------------------
def init_params(key, S, Din, H):
    ks = iter(jax.random.split(key, 32))

    def u(shape, lo=-0.1, hi=0.1):
        return jax.random.uniform(next(ks), shape, jnp.float32, lo, hi)

    p = {}
    p["ln_w"] = jnp.ones((S, Din), jnp.float32)
    p["ln_b"] = jnp.zeros((S, Din), jnp.float32)

    def lstm_dir(din):
        wih = u((4 * H, din))
        whh = u((4 * H, H))
        bih = u((4 * H,))
        bhh = u((4 * H,))
        return wih.T, whh.T, (bih + bhh)[None, :]

    p["wih0f_T"], p["whh0f_T"], p["b0f"] = lstm_dir(Din)
    p["wih0b_T"], p["whh0b_T"], p["b0b"] = lstm_dir(Din)
    p["wih1f_T"], p["whh1f_T"], p["b1f"] = lstm_dir(2 * H)
    p["wih1b_T"], p["whh1b_T"], p["b1b"] = lstm_dir(2 * H)

    p["winT"] = u((H, H)).T                       # Attention.linear_in  (no bias)
    p["woutT"] = u((H, 2 * H)).T                  # Attention.linear_out (no bias)

    wb, bb = u((1, H)), u((1,))                   # beat head
    wd, bd = u((1, H)), u((1,))                   # downbeat head
    p["whead"] = jnp.concatenate([wb.T, wd.T], axis=1)   # (H, 2)
    p["bhead"] = jnp.concatenate([bb, bd])[None, :]      # (1, 2)
    return p


if __name__ == "__main__":
    B, S, Din, H = 2, 8, 16, 32   # batch, seq_len, input_dim, hidden_dim (small)
    key = jax.random.PRNGKey(0)
    kp, kx = jax.random.split(key)
    params = init_params(kp, S, Din, H)
    raw = jax.random.normal(kx, (B, S, Din), jnp.float32)

    fwd = jax.jit(functools.partial(model_forward, hidden=H))
    beat, downbeat = fwd(params, raw)
    jax.block_until_ready((beat, downbeat))

    assert beat.shape == (B, S) and downbeat.shape == (B, S)

    ref_b, ref_d = reference_forward(params, raw, H)
    assert jnp.allclose(beat, ref_b, atol=1e-4, rtol=1e-3), (
        float(jnp.max(jnp.abs(beat - ref_b))))
    assert jnp.allclose(downbeat, ref_d, atol=1e-4, rtol=1e-3), (
        float(jnp.max(jnp.abs(downbeat - ref_d))))

    print("KERNEL_OK")
</pallas_src>

<mosaic_0001>
module attributes {stable_mosaic.version = 11 : i64} {
  func.func @_fused_forward_kernel(%arg0: memref<64x16xf32, #tpu.memory_space<vmem>>, %arg1: memref<64x16xf32, #tpu.memory_space<vmem>>, %arg2: memref<64x16xf32, #tpu.memory_space<vmem>>, %arg3: memref<16x256xf32, #tpu.memory_space<vmem>>, %arg4: memref<16x256xf32, #tpu.memory_space<vmem>>, %arg5: memref<1x256xf32, #tpu.memory_space<vmem>>, %arg6: memref<64x256xf32, #tpu.memory_space<vmem>>, %arg7: memref<32x256xf32, #tpu.memory_space<vmem>>, %arg8: memref<32x256xf32, #tpu.memory_space<vmem>>, %arg9: memref<32x256xf32, #tpu.memory_space<vmem>>, %arg10: memref<32x256xf32, #tpu.memory_space<vmem>>, %arg11: memref<1x256xf32, #tpu.memory_space<vmem>>, %arg12: memref<64x256xf32, #tpu.memory_space<vmem>>, %arg13: memref<32x32xf32, #tpu.memory_space<vmem>>, %arg14: memref<32x32xf32, #tpu.memory_space<vmem>>, %arg15: memref<32x32xf32, #tpu.memory_space<vmem>>, %arg16: memref<32x2xf32, #tpu.memory_space<vmem>>, %arg17: memref<1x2xf32, #tpu.memory_space<vmem>>, %arg18: memref<64x2xf32, #tpu.memory_space<vmem>>, %arg19: memref<64x256xf32, #tpu.memory_space<vmem>>, %arg20: memref<64x256xf32, #tpu.memory_space<vmem>>, %arg21: memref<64x32xf32, #tpu.memory_space<vmem>>, %arg22: memref<64x32xf32, #tpu.memory_space<vmem>>, %arg23: memref<64x32xf32, #tpu.memory_space<vmem>>, %arg24: memref<64x32xf32, #tpu.memory_space<vmem>>) attributes {dimension_semantics = [], scalar_prefetch = 0 : i64, scratch_operands = 6 : i64, tpu.core_type = #tpu.core_type<tc>} {
    %c0 = arith.constant 0 : index
    %c0_0 = arith.constant 0 : index
    %0 = vector.load %arg0[%c0, %c0_0] : memref<64x16xf32, #tpu.memory_space<vmem>>, vector<64x16xf32>
    %1 = tpu.iota {dimensions = array<i32: 0>} : vector<64x1xi32>
    %c8_i32 = arith.constant 8 : i32
    %c0_i32 = arith.constant 0 : i32
    %2 = arith.cmpi eq, %c8_i32, %c0_i32 : i32
    %c1_i32 = arith.constant 1 : i32
    %3 = arith.select %2, %c1_i32, %c8_i32 : i32
    %4 = vector.broadcast %3 : i32 to vector<64x1xi32>
    %5 = arith.remsi %1, %4 : vector<64x1xi32>
    %c0_i32_1 = arith.constant 0 : i32
    %6 = vector.broadcast %c0_i32_1 : i32 to vector<64x1xi32>
    %7 = arith.cmpi ne, %5, %6 : vector<64x1xi32>
    %c0_i32_2 = arith.constant 0 : i32
    %8 = vector.broadcast %c0_i32_2 : i32 to vector<64x1xi32>
    %9 = arith.cmpi slt, %5, %8 : vector<64x1xi32>
    %c0_i32_3 = arith.constant 0 : i32
    %10 = arith.cmpi slt, %3, %c0_i32_3 : i32
    %11 = vector.broadcast %10 : i1 to vector<64x1xi1>
    %12 = vector.broadcast %11 : vector<64x1xi1> to vector<64x1xi1>
    %13 = arith.xori %9, %12 : vector<64x1xi1>
    %14 = arith.andi %13, %7 : vector<64x1xi1>
    %15 = vector.broadcast %3 : i32 to vector<64x1xi32>
    %16 = arith.addi %5, %15 : vector<64x1xi32>
    %17 = arith.select %14, %16, %5 : vector<64x1xi1>, vector<64x1xi32>
    %cst = arith.constant dense<0.000000e+00> : vector<64xf32>
    %18 = vector.multi_reduction <add>, %0, %cst [1] : vector<64x16xf32> to vector<64xf32>
    %19 = vector.shape_cast %18 : vector<64xf32> to vector<64x1xf32>
    %cst_4 = arith.constant 0.000000e+00 : f32
    %20 = vector.broadcast %cst_4 : f32 to vector<64x1xf32>
    %c0_i32_5 = arith.constant 0 : i32
    %21 = vector.broadcast %c0_i32_5 : i32 to vector<64x1xi32>
    %22 = arith.cmpi eq, %17, %21 : vector<64x1xi32>
    %cst_6 = arith.constant 0.000000e+00 : f32
    %23 = vector.broadcast %cst_6 : f32 to vector<64x1xf32>
    %24 = arith.select %22, %19, %23 : vector<64x1xi1>, vector<64x1xf32>
    %25 = vector.shape_cast %24 : vector<64x1xf32> to vector<1x64x1xf32>
    %cst_7 = arith.constant dense<0.000000e+00> : vector<1xf32>
    %26 = vector.multi_reduction <add>, %25, %cst_7 [1, 2] : vector<1x64x1xf32> to vector<1xf32>
    %27 = vector.shape_cast %26 : vector<1xf32> to vector<1x1x1xf32>
    %28 = vector.extract %27[0, 0, 0] : f32 from vector<1x1x1xf32>
    %cst_8 = arith.constant 1.280000e+02 : f32
    %29 = arith.divf %28, %cst_8 : f32
    %30 = vector.broadcast %29 : f32 to vector<64x1xf32>
    %31 = arith.select %22, %30, %20 : vector<64x1xi1>, vector<64x1xf32>
    %c1_i32_9 = arith.constant 1 : i32
    %32 = vector.broadcast %c1_i32_9 : i32 to vector<64x1xi32>
    %33 = arith.cmpi eq, %17, %32 : vector<64x1xi32>
    %cst_10 = arith.constant 0.000000e+00 : f32
    %34 = vector.broadcast %cst_10 : f32 to vector<64x1xf32>
    %35 = arith.select %33, %19, %34 : vector<64x1xi1>, vector<64x1xf32>
    %36 = vector.shape_cast %35 : vector<64x1xf32> to vector<1x64x1xf32>
    %cst_11 = arith.constant dense<0.000000e+00> : vector<1xf32>
    %37 = vector.multi_reduction <add>, %36, %cst_11 [1, 2] : vector<1x64x1xf32> to vector<1xf32>
    %38 = vector.shape_cast %37 : vector<1xf32> to vector<1x1x1xf32>
    %39 = vector.extract %38[0, 0, 0] : f32 from vector<1x1x1xf32>
    %cst_12 = arith.constant 1.280000e+02 : f32
    %40 = arith.divf %39, %cst_12 : f32
    %41 = vector.broadcast %40 : f32 to vector<64x1xf32>
    %42 = arith.select %33, %41, %31 : vector<64x1xi1>, vector<64x1xf32>
    %c2_i32 = arith.constant 2 : i32
    %43 = vector.broadcast %c2_i32 : i32 to vector<64x1xi32>
    %44 = arith.cmpi eq, %17, %43 : vector<64x1xi32>
    %cst_13 = arith.constant 0.000000e+00 : f32
    %45 = vector.broadcast %cst_13 : f32 to vector<64x1xf32>
    %46 = arith.select %44, %19, %45 : vector<64x1xi1>, vector<64x1xf32>
    %47 = vector.shape_cast %46 : vector<64x1xf32> to vector<1x64x1xf32>
    %cst_14 = arith.constant dense<0.000000e+00> : vector<1xf32>
    %48 = vector.multi_reduction <add>, %47, %cst_14 [1, 2] : vector<1x64x1xf32> to vector<1xf32>
    %49 = vector.shape_cast %48 : vector<1xf32> to vector<1x1x1xf32>
    %50 = vector.extract %49[0, 0, 0] : f32 from vector<1x1x1xf32>
    %cst_15 = arith.constant 1.280000e+02 : f32
    %51 = arith.divf %50, %cst_15 : f32
    %52 = vector.broadcast %51 : f32 to vector<64x1xf32>
    %53 = arith.select %44, %52, %42 : vector<64x1xi1>, vector<64x1xf32>
    %c3_i32 = arith.constant 3 : i32
    %54 = vector.broadcast %c3_i32 : i32 to vector<64x1xi32>
    %55 = arith.cmpi eq, %17, %54 : vector<64x1xi32>
    %cst_16 = arith.constant 0.000000e+00 : f32
    %56 = vector.broadcast %cst_16 : f32 to vector<64x1xf32>
    %57 = arith.select %55, %19, %56 : vector<64x1xi1>, vector<64x1xf32>
    %58 = vector.shape_cast %57 : vector<64x1xf32> to vector<1x64x1xf32>
    %cst_17 = arith.constant dense<0.000000e+00> : vector<1xf32>
    %59 = vector.multi_reduction <add>, %58, %cst_17 [1, 2] : vector<1x64x1xf32> to vector<1xf32>
    %60 = vector.shape_cast %59 : vector<1xf32> to vector<1x1x1xf32>
    %61 = vector.extract %60[0, 0, 0] : f32 from vector<1x1x1xf32>
    %cst_18 = arith.constant 1.280000e+02 : f32
    %62 = arith.divf %61, %cst_18 : f32
    %63 = vector.broadcast %62 : f32 to vector<64x1xf32>
    %64 = arith.select %55, %63, %53 : vector<64x1xi1>, vector<64x1xf32>
    %c4_i32 = arith.constant 4 : i32
    %65 = vector.broadcast %c4_i32 : i32 to vector<64x1xi32>
    %66 = arith.cmpi eq, %17, %65 : vector<64x1xi32>
    %cst_19 = arith.constant 0.000000e+00 : f32
    %67 = vector.broadcast %cst_19 : f32 to vector<64x1xf32>
    %68 = arith.select %66, %19, %67 : vector<64x1xi1>, vector<64x1xf32>
    %69 = vector.shape_cast %68 : vector<64x1xf32> to vector<1x64x1xf32>
    %cst_20 = arith.constant dense<0.000000e+00> : vector<1xf32>
    %70 = vector.multi_reduction <add>, %69, %cst_20 [1, 2] : vector<1x64x1xf32> to vector<1xf32>
    %71 = vector.shape_cast %70 : vector<1xf32> to vector<1x1x1xf32>
    %72 = vector.extract %71[0, 0, 0] : f32 from vector<1x1x1xf32>
    %cst_21 = arith.constant 1.280000e+02 : f32
    %73 = arith.divf %72, %cst_21 : f32
    %74 = vector.broadcast %73 : f32 to vector<64x1xf32>
    %75 = arith.select %66, %74, %64 : vector<64x1xi1>, vector<64x1xf32>
    %c5_i32 = arith.constant 5 : i32
    %76 = vector.broadcast %c5_i32 : i32 to vector<64x1xi32>
    %77 = arith.cmpi eq, %17, %76 : vector<64x1xi32>
    %cst_22 = arith.constant 0.000000e+00 : f32
    %78 = vector.broadcast %cst_22 : f32 to vector<64x1xf32>
    %79 = arith.select %77, %19, %78 : vector<64x1xi1>, vector<64x1xf32>
    %80 = vector.shape_cast %79 : vector<64x1xf32> to vector<1x64x1xf32>
    %cst_23 = arith.constant dense<0.000000e+00> : vector<1xf32>
    %81 = vector.multi_reduction <add>, %80, %cst_23 [1, 2] : vector<1x64x1xf32> to vector<1xf32>
    %82 = vector.shape_cast %81 : vector<1xf32> to vector<1x1x1xf32>
    %83 = vector.extract %82[0, 0, 0] : f32 from vector<1x1x1xf32>
    %cst_24 = arith.constant 1.280000e+02 : f32
    %84 = arith.divf %83, %cst_24 : f32
    %85 = vector.broadcast %84 : f32 to vector<64x1xf32>
    %86 = arith.select %77, %85, %75 : vector<64x1xi1>, vector<64x1xf32>
    %c6_i32 = arith.constant 6 : i32
    %87 = vector.broadcast %c6_i32 : i32 to vector<64x1xi32>
    %88 = arith.cmpi eq, %17, %87 : vector<64x1xi32>
    %cst_25 = arith.constant 0.000000e+00 : f32
    %89 = vector.broadcast %cst_25 : f32 to vector<64x1xf32>
    %90 = arith.select %88, %19, %89 : vector<64x1xi1>, vector<64x1xf32>
    %91 = vector.shape_cast %90 : vector<64x1xf32> to vector<1x64x1xf32>
    %cst_26 = arith.constant dense<0.000000e+00> : vector<1xf32>
    %92 = vector.multi_reduction <add>, %91, %cst_26 [1, 2] : vector<1x64x1xf32> to vector<1xf32>
    %93 = vector.shape_cast %92 : vector<1xf32> to vector<1x1x1xf32>
    %94 = vector.extract %93[0, 0, 0] : f32 from vector<1x1x1xf32>
    %cst_27 = arith.constant 1.280000e+02 : f32
    %95 = arith.divf %94, %cst_27 : f32
    %96 = vector.broadcast %95 : f32 to vector<64x1xf32>
    %97 = arith.select %88, %96, %86 : vector<64x1xi1>, vector<64x1xf32>
    %c7_i32 = arith.constant 7 : i32
    %98 = vector.broadcast %c7_i32 : i32 to vector<64x1xi32>
    %99 = arith.cmpi eq, %17, %98 : vector<64x1xi32>
    %cst_28 = arith.constant 0.000000e+00 : f32
    %100 = vector.broadcast %cst_28 : f32 to vector<64x1xf32>
    %101 = arith.select %99, %19, %100 : vector<64x1xi1>, vector<64x1xf32>
    %102 = vector.shape_cast %101 : vector<64x1xf32> to vector<1x64x1xf32>
    %cst_29 = arith.constant dense<0.000000e+00> : vector<1xf32>
    %103 = vector.multi_reduction <add>, %102, %cst_29 [1, 2] : vector<1x64x1xf32> to vector<1xf32>
    %104 = vector.shape_cast %103 : vector<1xf32> to vector<1x1x1xf32>
    %105 = vector.extract %104[0, 0, 0] : f32 from vector<1x1x1xf32>
    %cst_30 = arith.constant 1.280000e+02 : f32
    %106 = arith.divf %105, %cst_30 : f32
    %107 = vector.broadcast %106 : f32 to vector<64x1xf32>
    %108 = arith.select %99, %107, %97 : vector<64x1xi1>, vector<64x1xf32>
    %109 = vector.broadcast %108 : vector<64x1xf32> to vector<64x16xf32>
    %110 = arith.subf %0, %109 : vector<64x16xf32>
    %111 = arith.mulf %110, %110 : vector<64x16xf32>
    %cst_31 = arith.constant dense<0.000000e+00> : vector<64xf32>
    %112 = vector.multi_reduction <add>, %111, %cst_31 [1] : vector<64x16xf32> to vector<64xf32>
    %113 = vector.shape_cast %112 : vector<64xf32> to vector<64x1xf32>
    %cst_32 = arith.constant 0.000000e+00 : f32
    %114 = vector.broadcast %cst_32 : f32 to vector<64x1xf32>
    %c0_i32_33 = arith.constant 0 : i32
    %115 = vector.broadcast %c0_i32_33 : i32 to vector<64x1xi32>
    %116 = arith.cmpi eq, %17, %115 : vector<64x1xi32>
    %cst_34 = arith.constant 0.000000e+00 : f32
    %117 = vector.broadcast %cst_34 : f32 to vector<64x1xf32>
    %118 = arith.select %116, %113, %117 : vector<64x1xi1>, vector<64x1xf32>
    %119 = vector.shape_cast %118 : vector<64x1xf32> to vector<1x64x1xf32>
    %cst_35 = arith.constant dense<0.000000e+00> : vector<1xf32>
    %120 = vector.multi_reduction <add>, %119, %cst_35 [1, 2] : vector<1x64x1xf32> to vector<1xf32>
    %121 = vector.shape_cast %120 : vector<1xf32> to vector<1x1x1xf32>
    %122 = vector.extract %121[0, 0, 0] : f32 from vector<1x1x1xf32>
    %cst_36 = arith.constant 1.280000e+02 : f32
    %123 = arith.divf %122, %cst_36 : f32
    %cst_37 = arith.constant 9.99999974E-6 : f32
    %124 = arith.addf %123, %cst_37 : f32
    %125 = math.rsqrt %124 : f32
    %126 = vector.broadcast %125 : f32 to vector<64x1xf32>
    %127 = arith.select %116, %126, %114 : vector<64x1xi1>, vector<64x1xf32>
    %c1_i32_38 = arith.constant 1 : i32
    %128 = vector.broadcast %c1_i32_38 : i32 to vector<64x1xi32>
    %129 = arith.cmpi eq, %17, %128 : vector<64x1xi32>
    %cst_39 = arith.constant 0.000000e+00 : f32
    %130 = vector.broadcast %cst_39 : f32 to vector<64x1xf32>
    %131 = arith.select %129, %113, %130 : vector<64x1xi1>, vector<64x1xf32>
    %132 = vector.shape_cast %131 : vector<64x1xf32> to vector<1x64x1xf32>
    %cst_40 = arith.constant dense<0.000000e+00> : vector<1xf32>
    %133 = vector.multi_reduction <add>, %132, %cst_40 [1, 2] : vector<1x64x1xf32> to vector<1xf32>
    %134 = vector.shape_cast %133 : vector<1xf32> to vector<1x1x1xf32>
    %135 = vector.extract %134[0, 0, 0] : f32 from vector<1x1x1xf32>
    %cst_41 = arith.constant 1.280000e+02 : f32
    %136 = arith.divf %135, %cst_41 : f32
    %cst_42 = arith.constant 9.99999974E-6 : f32
    %137 = arith.addf %136, %cst_42 : f32
    %138 = math.rsqrt %137 : f32
    %139 = vector.broadcast %138 : f32 to vector<64x1xf32>
    %140 = arith.select %129, %139, %127 : vector<64x1xi1>, vector<64x1xf32>
    %c2_i32_43 = arith.constant 2 : i32
    %141 = vector.broadcast %c2_i32_43 : i32 to vector<64x1xi32>
    %142 = arith.cmpi eq, %17, %141 : vector<64x1xi32>
    %cst_44 = arith.constant 0.000000e+00 : f32
    %143 = vector.broadcast %cst_44 : f32 to vector<64x1xf32>
    %144 = arith.select %142, %113, %143 : vector<64x1xi1>, vector<64x1xf32>
    %145 = vector.shape_cast %144 : vector<64x1xf32> to vector<1x64x1xf32>
    %cst_45 = arith.constant dense<0.000000e+00> : vector<1xf32>
    %146 = vector.multi_reduction <add>, %145, %cst_45 [1, 2] : vector<1x64x1xf32> to vector<1xf32>
    %147 = vector.shape_cast %146 : vector<1xf32> to vector<1x1x1xf32>
    %148 = vector.extract %147[0, 0, 0] : f32 from vector<1x1x1xf32>
    %cst_46 = arith.constant 1.280000e+02 : f32
    %149 = arith.divf %148, %cst_46 : f32
    %cst_47 = arith.constant 9.99999974E-6 : f32
    %150 = arith.addf %149, %cst_47 : f32
    %151 = math.rsqrt %150 : f32
    %152 = vector.broadcast %151 : f32 to vector<64x1xf32>
    %153 = arith.select %142, %152, %140 : vector<64x1xi1>, vector<64x1xf32>
    %c3_i32_48 = arith.constant 3 : i32
    %154 = vector.broadcast %c3_i32_48 : i32 to vector<64x1xi32>
    %155 = arith.cmpi eq, %17, %154 : vector<64x1xi32>
    %cst_49 = arith.constant 0.000000e+00 : f32
    %156 = vector.broadcast %cst_49 : f32 to vector<64x1xf32>
    %157 = arith.select %155, %113, %156 : vector<64x1xi1>, vector<64x1xf32>
    %158 = vector.shape_cast %157 : vector<64x1xf32> to vector<1x64x1xf32>
    %cst_50 = arith.constant dense<0.000000e+00> : vector<1xf32>
    %159 = vector.multi_reduction <add>, %158, %cst_50 [1, 2] : vector<1x64x1xf32> to vector<1xf32>
    %160 = vector.shape_cast %159 : vector<1xf32> to vector<1x1x1xf32>
    %161 = vector.extract %160[0, 0, 0] : f32 from vector<1x1x1xf32>
    %cst_51 = arith.constant 1.280000e+02 : f32
    %162 = arith.divf %161, %cst_51 : f32
    %cst_52 = arith.constant 9.99999974E-6 : f32
    %163 = arith.addf %162, %cst_52 : f32
    %164 = math.rsqrt %163 : f32
    %165 = vector.broadcast %164 : f32 to vector<64x1xf32>
    %166 = arith.select %155, %165, %153 : vector<64x1xi1>, vector<64x1xf32>
    %c4_i32_53 = arith.constant 4 : i32
    %167 = vector.broadcast %c4_i32_53 : i32 to vector<64x1xi32>
    %168 = arith.cmpi eq, %17, %167 : vector<64x1xi32>
    %cst_54 = arith.constant 0.000000e+00 : f32
    %169 = vector.broadcast %cst_54 : f32 to vector<64x1xf32>
    %170 = arith.select %168, %113, %169 : vector<64x1xi1>, vector<64x1xf32>
    %171 = vector.shape_cast %170 : vector<64x1xf32> to vector<1x64x1xf32>
    %cst_55 = arith.constant dense<0.000000e+00> : vector<1xf32>
    %172 = vector.multi_reduction <add>, %171, %cst_55 [1, 2] : vector<1x64x1xf32> to vector<1xf32>
    %173 = vector.shape_cast %172 : vector<1xf32> to vector<1x1x1xf32>
    %174 = vector.extract %173[0, 0, 0] : f32 from vector<1x1x1xf32>
    %cst_56 = arith.constant 1.280000e+02 : f32
    %175 = arith.divf %174, %cst_56 : f32
    %cst_57 = arith.constant 9.99999974E-6 : f32
    %176 = arith.addf %175, %cst_57 : f32
    %177 = math.rsqrt %176 : f32
    %178 = vector.broadcast %177 : f32 to vector<64x1xf32>
    %179 = arith.select %168, %178, %166 : vector<64x1xi1>, vector<64x1xf32>
    %c5_i32_58 = arith.constant 5 : i32
    %180 = vector.broadcast %c5_i32_58 : i32 to vector<64x1xi32>
    %181 = arith.cmpi eq, %17, %180 : vector<64x1xi32>
    %cst_59 = arith.constant 0.000000e+00 : f32
    %182 = vector.broadcast %cst_59 : f32 to vector<64x1xf32>
    %183 = arith.select %181, %113, %182 : vector<64x1xi1>, vector<64x1xf32>
    %184 = vector.shape_cast %183 : vector<64x1xf32> to vector<1x64x1xf32>
    %cst_60 = arith.constant dense<0.000000e+00> : vector<1xf32>
    %185 = vector.multi_reduction <add>, %184, %cst_60 [1, 2] : vector<1x64x1xf32> to vector<1xf32>
    %186 = vector.shape_cast %185 : vector<1xf32> to vector<1x1x1xf32>
    %187 = vector.extract %186[0, 0, 0] : f32 from vector<1x1x1xf32>
    %cst_61 = arith.constant 1.280000e+02 : f32
    %188 = arith.divf %187, %cst_61 : f32
    %cst_62 = arith.constant 9.99999974E-6 : f32
    %189 = arith.addf %188, %cst_62 : f32
    %190 = math.rsqrt %189 : f32
    %191 = vector.broadcast %190 : f32 to vector<64x1xf32>
    %192 = arith.select %181, %191, %179 : vector<64x1xi1>, vector<64x1xf32>
    %c6_i32_63 = arith.constant 6 : i32
    %193 = vector.broadcast %c6_i32_63 : i32 to vector<64x1xi32>
    %194 = arith.cmpi eq, %17, %193 : vector<64x1xi32>
    %cst_64 = arith.constant 0.000000e+00 : f32
    %195 = vector.broadcast %cst_64 : f32 to vector<64x1xf32>
    %196 = arith.select %194, %113, %195 : vector<64x1xi1>, vector<64x1xf32>
    %197 = vector.shape_cast %196 : vector<64x1xf32> to vector<1x64x1xf32>
    %cst_65 = arith.constant dense<0.000000e+00> : vector<1xf32>
    %198 = vector.multi_reduction <add>, %197, %cst_65 [1, 2] : vector<1x64x1xf32> to vector<1xf32>
    %199 = vector.shape_cast %198 : vector<1xf32> to vector<1x1x1xf32>
    %200 = vector.extract %199[0, 0, 0] : f32 from vector<1x1x1xf32>
    %cst_66 = arith.constant 1.280000e+02 : f32
    %201 = arith.divf %200, %cst_66 : f32
    %cst_67 = arith.constant 9.99999974E-6 : f32
    %202 = arith.addf %201, %cst_67 : f32
    %203 = math.rsqrt %202 : f32
    %204 = vector.broadcast %203 : f32 to vector<64x1xf32>
    %205 = arith.select %194, %204, %192 : vector<64x1xi1>, vector<64x1xf32>
    %c7_i32_68 = arith.constant 7 : i32
    %206 = vector.broadcast %c7_i32_68 : i32 to vector<64x1xi32>
    %207 = arith.cmpi eq, %17, %206 : vector<64x1xi32>
    %cst_69 = arith.constant 0.000000e+00 : f32
    %208 = vector.broadcast %cst_69 : f32 to vector<64x1xf32>
    %209 = arith.select %207, %113, %208 : vector<64x1xi1>, vector<64x1xf32>
    %210 = vector.shape_cast %209 : vector<64x1xf32> to vector<1x64x1xf32>
    %cst_70 = arith.constant dense<0.000000e+00> : vector<1xf32>
    %211 = vector.multi_reduction <add>, %210, %cst_70 [1, 2] : vector<1x64x1xf32> to vector<1xf32>
    %212 = vector.shape_cast %211 : vector<1xf32> to vector<1x1x1xf32>
    %213 = vector.extract %212[0, 0, 0] : f32 from vector<1x1x1xf32>
    %cst_71 = arith.constant 1.280000e+02 : f32
    %214 = arith.divf %213, %cst_71 : f32
    %cst_72 = arith.constant 9.99999974E-6 : f32
    %215 = arith.addf %214, %cst_72 : f32
    %216 = math.rsqrt %215 : f32
    %217 = vector.broadcast %216 : f32 to vector<64x1xf32>
    %218 = arith.select %207, %217, %205 : vector<64x1xi1>, vector<64x1xf32>
    %219 = vector.broadcast %218 : vector<64x1xf32> to vector<64x16xf32>
    %220 = arith.mulf %110, %219 : vector<64x16xf32>
    %c0_73 = arith.constant 0 : index
    %c0_74 = arith.constant 0 : index
    %221 = vector.load %arg1[%c0_73, %c0_74] : memref<64x16xf32, #tpu.memory_space<vmem>>, vector<64x16xf32>
    %222 = arith.mulf %220, %221 : vector<64x16xf32>
    %c0_75 = arith.constant 0 : index
    %c0_76 = arith.constant 0 : index
    %223 = vector.load %arg2[%c0_75, %c0_76] : memref<64x16xf32, #tpu.memory_space<vmem>>, vector<64x16xf32>
    %224 = arith.addf %222, %223 : vector<64x16xf32>
    %c0_77 = arith.constant 0 : index
    %c0_78 = arith.constant 0 : index
    %225 = vector.load %arg3[%c0_77, %c0_78] : memref<16x256xf32, #tpu.memory_space<vmem>>, vector<16x256xf32>
    %cst_79 = arith.constant dense<0.000000e+00> : vector<64x256xf32>
    %226 = tpu.matmul %224, %225, %cst_79 {dimension_numbers = #tpu.dot_dimension_numbers<[1], [0], [0], [1], [0, 0, 1, 1], [], []>} : vector<64x16xf32>, vector<16x256xf32>, vector<64x256xf32> -> vector<64x256xf32>
    %c0_80 = arith.constant 0 : index
    %c0_81 = arith.constant 0 : index
    %227 = vector.load %arg5[%c0_80, %c0_81] : memref<1x256xf32, #tpu.memory_space<vmem>>, vector<1x256xf32>
    %228 = vector.broadcast %227 : vector<1x256xf32> to vector<64x256xf32>
    %229 = arith.addf %226, %228 : vector<64x256xf32>
    %c0_82 = arith.constant 0 : index
    %c0_83 = arith.constant 0 : index
    %230 = vector.load %arg19[%c0_82, %c0_83] : memref<64x256xf32, #tpu.memory_space<vmem>>, vector<64x256xf32>
    tpu.vector_store %arg19[%c0_82, %c0_83], %229 {strides = array<i32>} : memref<64x256xf32, #tpu.memory_space<vmem>>, vector<64x256xf32>,
    %c0_84 = arith.constant 0 : index
    %c0_85 = arith.constant 0 : index
    %231 = vector.load %arg4[%c0_84, %c0_85] : memref<16x256xf32, #tpu.memory_space<vmem>>, vector<16x256xf32>
    %cst_86 = arith.constant dense<0.000000e+00> : vector<64x256xf32>
    %232 = tpu.matmul %224, %231, %cst_86 {dimension_numbers = #tpu.dot_dimension_numbers<[1], [0], [0], [1], [0, 0, 1, 1], [], []>} : vector<64x16xf32>, vector<16x256xf32>, vector<64x256xf32> -> vector<64x256xf32>
    %c0_87 = arith.constant 0 : index
    %c0_88 = arith.constant 0 : index
    %233 = vector.load %arg20[%c0_87, %c0_88] : memref<64x256xf32, #tpu.memory_space<vmem>>, vector<64x256xf32>
    tpu.vector_store %arg20[%c0_87, %c0_88], %232 {strides = array<i32>} : memref<64x256xf32, #tpu.memory_space<vmem>>, vector<64x256xf32>,
    %c0_89 = arith.constant 0 : index
    %c0_90 = arith.constant 0 : index
    %234 = vector.load %arg6[%c0_89, %c0_90] : memref<64x256xf32, #tpu.memory_space<vmem>>, vector<64x256xf32>
    %cst_91 = arith.constant 0.000000e+00 : f32
    %235 = vector.broadcast %cst_91 : f32 to vector<8x64xf32>
    %cst_92 = arith.constant 0.000000e+00 : f32
    %236 = vector.broadcast %cst_92 : f32 to vector<8x64xf32>
    %c0_93 = arith.constant 0 : index
    %c0_94 = arith.constant 0 : index
    %237 = vector.load %arg19[%c0_93, %c0_94] : memref<64x256xf32, #tpu.memory_space<vmem>>, vector<8x256xf32>
    %c56 = arith.constant 56 : index
    %c0_95 = arith.constant 0 : index
    %238 = vector.load %arg20[%c56, %c0_95] : memref<64x256xf32, #tpu.memory_space<vmem>>, vector<8x256xf32>
    %239 = arith.addf %237, %238 : vector<8x256xf32>
    %cst_96 = arith.constant dense<0.000000e+00> : vector<8x256xf32>
    %240 = tpu.matmul %235, %234, %cst_96 {dimension_numbers = #tpu.dot_dimension_numbers<[1], [0], [0], [1], [0, 0, 1, 1], [], []>} : vector<8x64xf32>, vector<64x256xf32>, vector<8x256xf32> -> vector<8x256xf32>
    %241 = arith.addf %239, %240 : vector<8x256xf32>
    %242 = vector.extract_strided_slice %241 {offsets = [0, 0], sizes = [8, 64], strides = [1, 1]} : vector<8x256xf32> to vector<8x64xf32>
    %243 = arith.negf %242 : vector<8x64xf32>
    %244 = math.exp %243 : vector<8x64xf32>
    %cst_97 = arith.constant 1.000000e+00 : f32
    %245 = vector.broadcast %cst_97 : f32 to vector<8x64xf32>
    %246 = arith.addf %245, %244 : vector<8x64xf32>
    %247 = arith.divf %245, %246 : vector<8x64xf32>
    %248 = vector.extract_strided_slice %241 {offsets = [0, 64], sizes = [8, 64], strides = [1, 1]} : vector<8x256xf32> to vector<8x64xf32>
    %249 = arith.negf %248 : vector<8x64xf32>
    %250 = math.exp %249 : vector<8x64xf32>
    %cst_98 = arith.constant 1.000000e+00 : f32
    %251 = vector.broadcast %cst_98 : f32 to vector<8x64xf32>
    %252 = arith.addf %251, %250 : vector<8x64xf32>
    %253 = arith.divf %251, %252 : vector<8x64xf32>
    %254 = vector.extract_strided_slice %241 {offsets = [0, 128], sizes = [8, 64], strides = [1, 1]} : vector<8x256xf32> to vector<8x64xf32>
    %255 = math.tanh %254 : vector<8x64xf32>
    %256 = vector.extract_strided_slice %241 {offsets = [0, 192], sizes = [8, 64], strides = [1, 1]} : vector<8x256xf32> to vector<8x64xf32>
    %257 = arith.negf %256 : vector<8x64xf32>
    %258 = math.exp %257 : vector<8x64xf32>
    %cst_99 = arith.constant 1.000000e+00 : f32
    %259 = vector.broadcast %cst_99 : f32 to vector<8x64xf32>
    %260 = arith.addf %259, %258 : vector<8x64xf32>
    %261 = arith.divf %259, %260 : vector<8x64xf32>
    %262 = arith.mulf %253, %236 : vector<8x64xf32>
    %263 = arith.mulf %247, %255 : vector<8x64xf32>
    %264 = arith.addf %262, %263 : vector<8x64xf32>
    %265 = math.tanh %264 : vector<8x64xf32>
    %266 = arith.mulf %261, %265 : vector<8x64xf32>
    %267 = vector.extract_strided_slice %266 {offsets = [0, 0], sizes = [8, 32], strides = [1, 1]} : vector<8x64xf32> to vector<8x32xf32>
    %c0_100 = arith.constant 0 : index
    %c0_101 = arith.constant 0 : index
    %268 = vector.load %arg21[%c0_100, %c0_101] : memref<64x32xf32, #tpu.memory_space<vmem>>, vector<8x32xf32>
    tpu.vector_store %arg21[%c0_100, %c0_101], %267 {strides = array<i32>} : memref<64x32xf32, #tpu.memory_space<vmem>>, vector<8x32xf32>,
    %269 = vector.extract_strided_slice %266 {offsets = [0, 32], sizes = [8, 32], strides = [1, 1]} : vector<8x64xf32> to vector<8x32xf32>
    %c56_102 = arith.constant 56 : index
    %c0_103 = arith.constant 0 : index
    %270 = vector.load %arg22[%c56_102, %c0_103] : memref<64x32xf32, #tpu.memory_space<vmem>>, vector<8x32xf32>
    tpu.vector_store %arg22[%c56_102, %c0_103], %269 {strides = array<i32>} : memref<64x32xf32, #tpu.memory_space<vmem>>, vector<8x32xf32>,
    %c8 = arith.constant 8 : index
    %c0_104 = arith.constant 0 : index
    %271 = vector.load %arg19[%c8, %c0_104] : memref<64x256xf32, #tpu.memory_space<vmem>>, vector<8x256xf32>
    %c48 = arith.constant 48 : index
    %c0_105 = arith.constant 0 : index
    %272 = vector.load %arg20[%c48, %c0_105] : memref<64x256xf32, #tpu.memory_space<vmem>>, vector<8x256xf32>
    %273 = arith.addf %271, %272 : vector<8x256xf32>
    %cst_106 = arith.constant dense<0.000000e+00> : vector<8x256xf32>
    %274 = tpu.matmul %266, %234, %cst_106 {dimension_numbers = #tpu.dot_dimension_numbers<[1], [0], [0], [1], [0, 0, 1, 1], [], []>} : vector<8x64xf32>, vector<64x256xf32>, vector<8x256xf32> -> vector<8x256xf32>
    %275 = arith.addf %273, %274 : vector<8x256xf32>
    %276 = vector.extract_strided_slice %275 {offsets = [0, 0], sizes = [8, 64], strides = [1, 1]} : vector<8x256xf32> to vector<8x64xf32>
    %277 = arith.negf %276 : vector<8x64xf32>
    %278 = math.exp %277 : vector<8x64xf32>
    %cst_107 = arith.constant 1.000000e+00 : f32
    %279 = vector.broadcast %cst_107 : f32 to vector<8x64xf32>
    %280 = arith.addf %279, %278 : vector<8x64xf32>
    %281 = arith.divf %279, %280 : vector<8x64xf32>
    %282 = vector.extract_strided_slice %275 {offsets = [0, 64], sizes = [8, 64], strides = [1, 1]} : vector<8x256xf32> to vector<8x64xf32>
    %283 = arith.negf %282 : vector<8x64xf32>
    %284 = math.exp %283 : vector<8x64xf32>
    %cst_108 = arith.constant 1.000000e+00 : f32
    %285 = vector.broadcast %cst_108 : f32 to vector<8x64xf32>
    %286 = arith.addf %285, %284 : vector<8x64xf32>
    %287 = arith.divf %285, %286 : vector<8x64xf32>
    %288 = vector.extract_strided_slice %275 {offsets = [0, 128], sizes = [8, 64], strides = [1, 1]} : vector<8x256xf32> to vector<8x64xf32>
    %289 = math.tanh %288 : vector<8x64xf32>
    %290 = vector.extract_strided_slice %275 {offsets = [0, 192], sizes = [8, 64], strides = [1, 1]} : vector<8x256xf32> to vector<8x64xf32>
    %291 = arith.negf %290 : vector<8x64xf32>
    %292 = math.exp %291 : vector<8x64xf32>
    %cst_109 = arith.constant 1.000000e+00 : f32
    %293 = vector.broadcast %cst_109 : f32 to vector<8x64xf32>
    %294 = arith.addf %293, %292 : vector<8x64xf32>
    %295 = arith.divf %293, %294 : vector<8x64xf32>
    %296 = arith.mulf %287, %264 : vector<8x64xf32>
    %297 = arith.mulf %281, %289 : vector<8x64xf32>
    %298 = arith.addf %296, %297 : vector<8x64xf32>
    %299 = math.tanh %298 : vector<8x64xf32>
    %300 = arith.mulf %295, %299 : vector<8x64xf32>
    %301 = vector.extract_strided_slice %300 {offsets = [0, 0], sizes = [8, 32], strides = [1, 1]} : vector<8x64xf32> to vector<8x32xf32>
    %c8_110 = arith.constant 8 : index
    %c0_111 = arith.constant 0 : index
    %302 = vector.load %arg21[%c8_110, %c0_111] : memref<64x32xf32, #tpu.memory_space<vmem>>, vector<8x32xf32>
    tpu.vector_store %arg21[%c8_110, %c0_111], %301 {strides = array<i32>} : memref<64x32xf32, #tpu.memory_space<vmem>>, vector<8x32xf32>,
    %303 = vector.extract_strided_slice %300 {offsets = [0, 32], sizes = [8, 32], strides = [1, 1]} : vector<8x64xf32> to vector<8x32xf32>
    %c48_112 = arith.constant 48 : index
    %c0_113 = arith.constant 0 : index
    %304 = vector.load %arg22[%c48_112, %c0_113] : memref<64x32xf32, #tpu.memory_space<vmem>>, vector<8x32xf32>
    tpu.vector_store %arg22[%c48_112, %c0_113], %303 {strides = array<i32>} : memref<64x32xf32, #tpu.memory_space<vmem>>, vector<8x32xf32>,
    %c16 = arith.constant 16 : index
    %c0_114 = arith.constant 0 : index
    %305 = vector.load %arg19[%c16, %c0_114] : memref<64x256xf32, #tpu.memory_space<vmem>>, vector<8x256xf32>
    %c40 = arith.constant 40 : index
    %c0_115 = arith.constant 0 : index
    %306 = vector.load %arg20[%c40, %c0_115] : memref<64x256xf32, #tpu.memory_space<vmem>>, vector<8x256xf32>
    %307 = arith.addf %305, %306 : vector<8x256xf32>
    %cst_116 = arith.constant dense<0.000000e+00> : vector<8x256xf32>
    %308 = tpu.matmul %300, %234, %cst_116 {dimension_numbers = #tpu.dot_dimension_numbers<[1], [0], [0], [1], [0, 0, 1, 1], [], []>} : vector<8x64xf32>, vector<64x256xf32>, vector<8x256xf32> -> vector<8x256xf32>
    %309 = arith.addf %307, %308 : vector<8x256xf32>
    %310 = vector.extract_strided_slice %309 {offsets = [0, 0], sizes = [8, 64], strides = [1, 1]} : vector<8x256xf32> to vector<8x64xf32>
    %311 = arith.negf %310 : vector<8x64xf32>
    %312 = math.exp %311 : vector<8x64xf32>
    %cst_117 = arith.constant 1.000000e+00 : f32
    %313 = vector.broadcast %cst_117 : f32 to vector<8x64xf32>
    %314 = arith.addf %313, %312 : vector<8x64xf32>
    %315 = arith.divf %313, %314 : vector<8x64xf32>
    %316 = vector.extract_strided_slice %309 {offsets = [0, 64], sizes = [8, 64], strides = [1, 1]} : vector<8x256xf32> to vector<8x64xf32>
    %317 = arith.negf %316 : vector<8x64xf32>
    %318 = math.exp %317 : vector<8x64xf32>
    %cst_118 = arith.constant 1.000000e+00 : f32
    %319 = vector.broadcast %cst_118 : f32 to vector<8x64xf32>
    %320 = arith.addf %319, %318 : vector<8x64xf32>
    %321 = arith.divf %319, %320 : vector<8x64xf32>
    %322 = vector.extract_strided_slice %309 {offsets = [0, 128], sizes = [8, 64], strides = [1, 1]} : vector<8x256xf32> to vector<8x64xf32>
    %323 = math.tanh %322 : vector<8x64xf32>
    %324 = vector.extract_strided_slice %309 {offsets = [0, 192], sizes = [8, 64], strides = [1, 1]} : vector<8x256xf32> to vector<8x64xf32>
    %325 = arith.negf %324 : vector<8x64xf32>
    %326 = math.exp %325 : vector<8x64xf32>
    %cst_119 = arith.constant 1.000000e+00 : f32
    %327 = vector.broadcast %cst_119 : f32 to vector<8x64xf32>
    %328 = arith.addf %327, %326 : vector<8x64xf32>
    %329 = arith.divf %327, %328 : vector<8x64xf32>
    %330 = arith.mulf %321, %298 : vector<8x64xf32>
    %331 = arith.mulf %315, %323 : vector<8x64xf32>
    %332 = arith.addf %330, %331 : vector<8x64xf32>
    %333 = math.tanh %332 : vector<8x64xf32>
    %334 = arith.mulf %329, %333 : vector<8x64xf32>
    %335 = vector.extract_strided_slice %334 {offsets = [0, 0], sizes = [8, 32], strides = [1, 1]} : vector<8x64xf32> to vector<8x32xf32>
    %c16_120 = arith.constant 16 : index
    %c0_121 = arith.constant 0 : index
    %336 = vector.load %arg21[%c16_120, %c0_121] : memref<64x32xf32, #tpu.memory_space<vmem>>, vector<8x32xf32>
    tpu.vector_store %arg21[%c16_120, %c0_121], %335 {strides = array<i32>} : memref<64x32xf32, #tpu.memory_space<vmem>>, vector<8x32xf32>,
    %337 = vector.extract_strided_slice %334 {offsets = [0, 32], sizes = [8, 32], strides = [1, 1]} : vector<8x64xf32> to vector<8x32xf32>
    %c40_122 = arith.constant 40 : index
    %c0_123 = arith.constant 0 : index
    %338 = vector.load %arg22[%c40_122, %c0_123] : memref<64x32xf32, #tpu.memory_space<vmem>>, vector<8x32xf32>
    tpu.vector_store %arg22[%c40_122, %c0_123], %337 {strides = array<i32>} : memref<64x32xf32, #tpu.memory_space<vmem>>, vector<8x32xf32>,
    %c24 = arith.constant 24 : index
    %c0_124 = arith.constant 0 : index
    %339 = vector.load %arg19[%c24, %c0_124] : memref<64x256xf32, #tpu.memory_space<vmem>>, vector<8x256xf32>
    %c32 = arith.constant 32 : index
    %c0_125 = arith.constant 0 : index
    %340 = vector.load %arg20[%c32, %c0_125] : memref<64x256xf32, #tpu.memory_space<vmem>>, vector<8x256xf32>
    %341 = arith.addf %339, %340 : vector<8x256xf32>
    %cst_126 = arith.constant dense<0.000000e+00> : vector<8x256xf32>
    %342 = tpu.matmul %334, %234, %cst_126 {dimension_numbers = #tpu.dot_dimension_numbers<[1], [0], [0], [1], [0, 0, 1, 1], [], []>} : vector<8x64xf32>, vector<64x256xf32>, vector<8x256xf32> -> vector<8x256xf32>
    %343 = arith.addf %341, %342 : vector<8x256xf32>
    %344 = vector.extract_strided_slice %343 {offsets = [0, 0], sizes = [8, 64], strides = [1, 1]} : vector<8x256xf32> to vector<8x64xf32>
    %345 = arith.negf %344 : vector<8x64xf32>
    %346 = math.exp %345 : vector<8x64xf32>
    %cst_127 = arith.constant 1.000000e+00 : f32
    %347 = vector.broadcast %cst_127 : f32 to vector<8x64xf32>
    %348 = arith.addf %347, %346 : vector<8x64xf32>
    %349 = arith.divf %347, %348 : vector<8x64xf32>
    %350 = vector.extract_strided_slice %343 {offsets = [0, 64], sizes = [8, 64], strides = [1, 1]} : vector<8x256xf32> to vector<8x64xf32>
    %351 = arith.negf %350 : vector<8x64xf32>
    %352 = math.exp %351 : vector<8x64xf32>
    %cst_128 = arith.constant 1.000000e+00 : f32
    %353 = vector.broadcast %cst_128 : f32 to vector<8x64xf32>
    %354 = arith.addf %353, %352 : vector<8x64xf32>
    %355 = arith.divf %353, %354 : vector<8x64xf32>
    %356 = vector.extract_strided_slice %343 {offsets = [0, 128], sizes = [8, 64], strides = [1, 1]} : vector<8x256xf32> to vector<8x64xf32>
    %357 = math.tanh %356 : vector<8x64xf32>
    %358 = vector.extract_strided_slice %343 {offsets = [0, 192], sizes = [8, 64], strides = [1, 1]} : vector<8x256xf32> to vector<8x64xf32>
    %359 = arith.negf %358 : vector<8x64xf32>
    %360 = math.exp %359 : vector<8x64xf32>
    %cst_129 = arith.constant 1.000000e+00 : f32
    %361 = vector.broadcast %cst_129 : f32 to vector<8x64xf32>
    %362 = arith.addf %361, %360 : vector<8x64xf32>
    %363 = arith.divf %361, %362 : vector<8x64xf32>
    %364 = arith.mulf %355, %332 : vector<8x64xf32>
    %365 = arith.mulf %349, %357 : vector<8x64xf32>
    %366 = arith.addf %364, %365 : vector<8x64xf32>
    %367 = math.tanh %366 : vector<8x64xf32>
    %368 = arith.mulf %363, %367 : vector<8x64xf32>
    %369 = vector.extract_strided_slice %368 {offsets = [0, 0], sizes = [8, 32], strides = [1, 1]} : vector<8x64xf32> to vector<8x32xf32>
    %c24_130 = arith.constant 24 : index
    %c0_131 = arith.constant 0 : index
    %370 = vector.load %arg21[%c24_130, %c0_131] : memref<64x32xf32, #tpu.memory_space<vmem>>, vector<8x32xf32>
    tpu.vector_store %arg21[%c24_130, %c0_131], %369 {strides = array<i32>} : memref<64x32xf32, #tpu.memory_space<vmem>>, vector<8x32xf32>,
    %371 = vector.extract_strided_slice %368 {offsets = [0, 32], sizes = [8, 32], strides = [1, 1]} : vector<8x64xf32> to vector<8x32xf32>
    %c32_132 = arith.constant 32 : index
    %c0_133 = arith.constant 0 : index
    %372 = vector.load %arg22[%c32_132, %c0_133] : memref<64x32xf32, #tpu.memory_space<vmem>>, vector<8x32xf32>
    tpu.vector_store %arg22[%c32_132, %c0_133], %371 {strides = array<i32>} : memref<64x32xf32, #tpu.memory_space<vmem>>, vector<8x32xf32>,
    %c32_134 = arith.constant 32 : index
    %c0_135 = arith.constant 0 : index
    %373 = vector.load %arg19[%c32_134, %c0_135] : memref<64x256xf32, #tpu.memory_space<vmem>>, vector<8x256xf32>
    %c24_136 = arith.constant 24 : index
    %c0_137 = arith.constant 0 : index
    %374 = vector.load %arg20[%c24_136, %c0_137] : memref<64x256xf32, #tpu.memory_space<vmem>>, vector<8x256xf32>
    %375 = arith.addf %373, %374 : vector<8x256xf32>
    %cst_138 = arith.constant dense<0.000000e+00> : vector<8x256xf32>
    %376 = tpu.matmul %368, %234, %cst_138 {dimension_numbers = #tpu.dot_dimension_numbers<[1], [0], [0], [1], [0, 0, 1, 1], [], []>} : vector<8x64xf32>, vector<64x256xf32>, vector<8x256xf32> -> vector<8x256xf32>
    %377 = arith.addf %375, %376 : vector<8x256xf32>
    %378 = vector.extract_strided_slice %377 {offsets = [0, 0], sizes = [8, 64], strides = [1, 1]} : vector<8x256xf32> to vector<8x64xf32>
    %379 = arith.negf %378 : vector<8x64xf32>
    %380 = math.exp %379 : vector<8x64xf32>
    %cst_139 = arith.constant 1.000000e+00 : f32
    %381 = vector.broadcast %cst_139 : f32 to vector<8x64xf32>
    %382 = arith.addf %381, %380 : vector<8x64xf32>
    %383 = arith.divf %381, %382 : vector<8x64xf32>
    %384 = vector.extract_strided_slice %377 {offsets = [0, 64], sizes = [8, 64], strides = [1, 1]} : vector<8x256xf32> to vector<8x64xf32>
    %385 = arith.negf %384 : vector<8x64xf32>
    %386 = math.exp %385 : vector<8x64xf32>
    %cst_140 = arith.constant 1.000000e+00 : f32
    %387 = vector.broadcast %cst_140 : f32 to vector<8x64xf32>
    %388 = arith.addf %387, %386 : vector<8x64xf32>
    %389 = arith.divf %387, %388 : vector<8x64xf32>
    %390 = vector.extract_strided_slice %377 {offsets = [0, 128], sizes = [8, 64], strides = [1, 1]} : vector<8x256xf32> to vector<8x64xf32>
    %391 = math.tanh %390 : vector<8x64xf32>
    %392 = vector.extract_strided_slice %377 {offsets = [0, 192], sizes = [8, 64], strides = [1, 1]} : vector<8x256xf32> to vector<8x64xf32>
    %393 = arith.negf %392 : vector<8x64xf32>
    %394 = math.exp %393 : vector<8x64xf32>
    %cst_141 = arith.constant 1.000000e+00 : f32
    %395 = vector.broadcast %cst_141 : f32 to vector<8x64xf32>
    %396 = arith.addf %395, %394 : vector<8x64xf32>
    %397 = arith.divf %395, %396 : vector<8x64xf32>
    %398 = arith.mulf %389, %366 : vector<8x64xf32>
    %399 = arith.mulf %383, %391 : vector<8x64xf32>
    %400 = arith.addf %398, %399 : vector<8x64xf32>
    %401 = math.tanh %400 : vector<8x64xf32>
    %402 = arith.mulf %397, %401 : vector<8x64xf32>
    %403 = vector.extract_strided_slice %402 {offsets = [0, 0], sizes = [8, 32], strides = [1, 1]} : vector<8x64xf32> to vector<8x32xf32>
    %c32_142 = arith.constant 32 : index
    %c0_143 = arith.constant 0 : index
    %404 = vector.load %arg21[%c32_142, %c0_143] : memref<64x32xf32, #tpu.memory_space<vmem>>, vector<8x32xf32>
    tpu.vector_store %arg21[%c32_142, %c0_143], %403 {strides = array<i32>} : memref<64x32xf32, #tpu.memory_space<vmem>>, vector<8x32xf32>,
    %405 = vector.extract_strided_slice %402 {offsets = [0, 32], sizes = [8, 32], strides = [1, 1]} : vector<8x64xf32> to vector<8x32xf32>
    %c24_144 = arith.constant 24 : index
    %c0_145 = arith.constant 0 : index
    %406 = vector.load %arg22[%c24_144, %c0_145] : memref<64x32xf32, #tpu.memory_space<vmem>>, vector<8x32xf32>
    tpu.vector_store %arg22[%c24_144, %c0_145], %405 {strides = array<i32>} : memref<64x32xf32, #tpu.memory_space<vmem>>, vector<8x32xf32>,
    %c40_146 = arith.constant 40 : index
    %c0_147 = arith.constant 0 : index
    %407 = vector.load %arg19[%c40_146, %c0_147] : memref<64x256xf32, #tpu.memory_space<vmem>>, vector<8x256xf32>
    %c16_148 = arith.constant 16 : index
    %c0_149 = arith.constant 0 : index
    %408 = vector.load %arg20[%c16_148, %c0_149] : memref<64x256xf32, #tpu.memory_space<vmem>>, vector<8x256xf32>
    %409 = arith.addf %407, %408 : vector<8x256xf32>
    %cst_150 = arith.constant dense<0.000000e+00> : vector<8x256xf32>
    %410 = tpu.matmul %402, %234, %cst_150 {dimension_numbers = #tpu.dot_dimension_numbers<[1], [0], [0], [1], [0, 0, 1, 1], [], []>} : vector<8x64xf32>, vector<64x256xf32>, vector<8x256xf32> -> vector<8x256xf32>
    %411 = arith.addf %409, %410 : vector<8x256xf32>
    %412 = vector.extract_strided_slice %411 {offsets = [0, 0], sizes = [8, 64], strides = [1, 1]} : vector<8x256xf32> to vector<8x64xf32>
    %413 = arith.negf %412 : vector<8x64xf32>
    %414 = math.exp %413 : vector<8x64xf32>
    %cst_151 = arith.constant 1.000000e+00 : f32
    %415 = vector.broadcast %cst_151 : f32 to vector<8x64xf32>
    %416 = arith.addf %415, %414 : vector<8x64xf32>
    %417 = arith.divf %415, %416 : vector<8x64xf32>
    %418 = vector.extract_strided_slice %411 {offsets = [0, 64], sizes = [8, 64], strides = [1, 1]} : vector<8x256xf32> to vector<8x64xf32>
    %419 = arith.negf %418 : vector<8x64xf32>
    %420 = math.exp %419 : vector<8x64xf32>
    %cst_152 = arith.constant 1.000000e+00 : f32
    %421 = vector.broadcast %cst_152 : f32 to vector<8x64xf32>
    %422 = arith.addf %421, %420 : vector<8x64xf32>
    %423 = arith.divf %421, %422 : vector<8x64xf32>
    %424 = vector.extract_strided_slice %411 {offsets = [0, 128], sizes = [8, 64], strides = [1, 1]} : vector<8x256xf32> to vector<8x64xf32>
    %425 = math.tanh %424 : vector<8x64xf32>
    %426 = vector.extract_strided_slice %411 {offsets = [0, 192], sizes = [8, 64], strides = [1, 1]} : vector<8x256xf32> to vector<8x64xf32>
    %427 = arith.negf %426 : vector<8x64xf32>
    %428 = math.exp %427 : vector<8x64xf32>
    %cst_153 = arith.constant 1.000000e+00 : f32
    %429 = vector.broadcast %cst_153 : f32 to vector<8x64xf32>
    %430 = arith.addf %429, %428 : vector<8x64xf32>
    %431 = arith.divf %429, %430 : vector<8x64xf32>
    %432 = arith.mulf %423, %400 : vector<8x64xf32>
    %433 = arith.mulf %417, %425 : vector<8x64xf32>
    %434 = arith.addf %432, %433 : vector<8x64xf32>
    %435 = math.tanh %434 : vector<8x64xf32>
    %436 = arith.mulf %431, %435 : vector<8x64xf32>
    %437 = vector.extract_strided_slice %436 {offsets = [0, 0], sizes = [8, 32], strides = [1, 1]} : vector<8x64xf32> to vector<8x32xf32>
    %c40_154 = arith.constant 40 : index
    %c0_155 = arith.constant 0 : index
    %438 = vector.load %arg21[%c40_154, %c0_155] : memref<64x32xf32, #tpu.memory_space<vmem>>, vector<8x32xf32>
    tpu.vector_store %arg21[%c40_154, %c0_155], %437 {strides = array<i32>} : memref<64x32xf32, #tpu.memory_space<vmem>>, vector<8x32xf32>,
    %439 = vector.extract_strided_slice %436 {offsets = [0, 32], sizes = [8, 32], strides = [1, 1]} : vector<8x64xf32> to vector<8x32xf32>
    %c16_156 = arith.constant 16 : index
    %c0_157 = arith.constant 0 : index
    %440 = vector.load %arg22[%c16_156, %c0_157] : memref<64x32xf32, #tpu.memory_space<vmem>>, vector<8x32xf32>
    tpu.vector_store %arg22[%c16_156, %c0_157], %439 {strides = array<i32>} : memref<64x32xf32, #tpu.memory_space<vmem>>, vector<8x32xf32>,
    %c48_158 = arith.constant 48 : index
    %c0_159 = arith.constant 0 : index
    %441 = vector.load %arg19[%c48_158, %c0_159] : memref<64x256xf32, #tpu.memory_space<vmem>>, vector<8x256xf32>
    %c8_160 = arith.constant 8 : index
    %c0_161 = arith.constant 0 : index
    %442 = vector.load %arg20[%c8_160, %c0_161] : memref<64x256xf32, #tpu.memory_space<vmem>>, vector<8x256xf32>
    %443 = arith.addf %441, %442 : vector<8x256xf32>
    %cst_162 = arith.constant dense<0.000000e+00> : vector<8x256xf32>
    %444 = tpu.matmul %436, %234, %cst_162 {dimension_numbers = #tpu.dot_dimension_numbers<[1], [0], [0], [1], [0, 0, 1, 1], [], []>} : vector<8x64xf32>, vector<64x256xf32>, vector<8x256xf32> -> vector<8x256xf32>
    %445 = arith.addf %443, %444 : vector<8x256xf32>
    %446 = vector.extract_strided_slice %445 {offsets = [0, 0], sizes = [8, 64], strides = [1, 1]} : vector<8x256xf32> to vector<8x64xf32>
    %447 = arith.negf %446 : vector<8x64xf32>
    %448 = math.exp %447 : vector<8x64xf32>
    %cst_163 = arith.constant 1.000000e+00 : f32
    %449 = vector.broadcast %cst_163 : f32 to vector<8x64xf32>
    %450 = arith.addf %449, %448 : vector<8x64xf32>
    %451 = arith.divf %449, %450 : vector<8x64xf32>
    %452 = vector.extract_strided_slice %445 {offsets = [0, 64], sizes = [8, 64], strides = [1, 1]} : vector<8x256xf32> to vector<8x64xf32>
    %453 = arith.negf %452 : vector<8x64xf32>
    %454 = math.exp %453 : vector<8x64xf32>
    %cst_164 = arith.constant 1.000000e+00 : f32
    %455 = vector.broadcast %cst_164 : f32 to vector<8x64xf32>
    %456 = arith.addf %455, %454 : vector<8x64xf32>
    %457 = arith.divf %455, %456 : vector<8x64xf32>
    %458 = vector.extract_strided_slice %445 {offsets = [0, 128], sizes = [8, 64], strides = [1, 1]} : vector<8x256xf32> to vector<8x64xf32>
    %459 = math.tanh %458 : vector<8x64xf32>
    %460 = vector.extract_strided_slice %445 {offsets = [0, 192], sizes = [8, 64], strides = [1, 1]} : vector<8x256xf32> to vector<8x64xf32>
    %461 = arith.negf %460 : vector<8x64xf32>
    %462 = math.exp %461 : vector<8x64xf32>
    %cst_165 = arith.constant 1.000000e+00 : f32
    %463 = vector.broadcast %cst_165 : f32 to vector<8x64xf32>
    %464 = arith.addf %463, %462 : vector<8x64xf32>
    %465 = arith.divf %463, %464 : vector<8x64xf32>
    %466 = arith.mulf %457, %434 : vector<8x64xf32>
    %467 = arith.mulf %451, %459 : vector<8x64xf32>
    %468 = arith.addf %466, %467 : vector<8x64xf32>
    %469 = math.tanh %468 : vector<8x64xf32>
    %470 = arith.mulf %465, %469 : vector<8x64xf32>
    %471 = vector.extract_strided_slice %470 {offsets = [0, 0], sizes = [8, 32], strides = [1, 1]} : vector<8x64xf32> to vector<8x32xf32>
    %c48_166 = arith.constant 48 : index
    %c0_167 = arith.constant 0 : index
    %472 = vector.load %arg21[%c48_166, %c0_167] : memref<64x32xf32, #tpu.memory_space<vmem>>, vector<8x32xf32>
    tpu.vector_store %arg21[%c48_166, %c0_167], %471 {strides = array<i32>} : memref<64x32xf32, #tpu.memory_space<vmem>>, vector<8x32xf32>,
    %473 = vector.extract_strided_slice %470 {offsets = [0, 32], sizes = [8, 32], strides = [1, 1]} : vector<8x64xf32> to vector<8x32xf32>
    %c8_168 = arith.constant 8 : index
    %c0_169 = arith.constant 0 : index
    %474 = vector.load %arg22[%c8_168, %c0_169] : memref<64x32xf32, #tpu.memory_space<vmem>>, vector<8x32xf32>
    tpu.vector_store %arg22[%c8_168, %c0_169], %473 {strides = array<i32>} : memref<64x32xf32, #tpu.memory_space<vmem>>, vector<8x32xf32>,
    %c56_170 = arith.constant 56 : index
    %c0_171 = arith.constant 0 : index
    %475 = vector.load %arg19[%c56_170, %c0_171] : memref<64x256xf32, #tpu.memory_space<vmem>>, vector<8x256xf32>
    %c0_172 = arith.constant 0 : index
    %c0_173 = arith.constant 0 : index
    %476 = vector.load %arg20[%c0_172, %c0_173] : memref<64x256xf32, #tpu.memory_space<vmem>>, vector<8x256xf32>
    %477 = arith.addf %475, %476 : vector<8x256xf32>
    %cst_174 = arith.constant dense<0.000000e+00> : vector<8x256xf32>
    %478 = tpu.matmul %470, %234, %cst_174 {dimension_numbers = #tpu.dot_dimension_numbers<[1], [0], [0], [1], [0, 0, 1, 1], [], []>} : vector<8x64xf32>, vector<64x256xf32>, vector<8x256xf32> -> vector<8x256xf32>
    %479 = arith.addf %477, %478 : vector<8x256xf32>
    %480 = vector.extract_strided_slice %479 {offsets = [0, 0], sizes = [8, 64], strides = [1, 1]} : vector<8x256xf32> to vector<8x64xf32>
    %481 = arith.negf %480 : vector<8x64xf32>
    %482 = math.exp %481 : vector<8x64xf32>
    %cst_175 = arith.constant 1.000000e+00 : f32
    %483 = vector.broadcast %cst_175 : f32 to vector<8x64xf32>
    %484 = arith.addf %483, %482 : vector<8x64xf32>
    %485 = arith.divf %483, %484 : vector<8x64xf32>
    %486 = vector.extract_strided_slice %479 {offsets = [0, 64], sizes = [8, 64], strides = [1, 1]} : vector<8x256xf32> to vector<8x64xf32>
    %487 = arith.negf %486 : vector<8x64xf32>
    %488 = math.exp %487 : vector<8x64xf32>
    %cst_176 = arith.constant 1.000000e+00 : f32
    %489 = vector.broadcast %cst_176 : f32 to vector<8x64xf32>
    %490 = arith.addf %489, %488 : vector<8x64xf32>
    %491 = arith.divf %489, %490 : vector<8x64xf32>
    %492 = vector.extract_strided_slice %479 {offsets = [0, 128], sizes = [8, 64], strides = [1, 1]} : vector<8x256xf32> to vector<8x64xf32>
    %493 = math.tanh %492 : vector<8x64xf32>
    %494 = vector.extract_strided_slice %479 {offsets = [0, 192], sizes = [8, 64], strides = [1, 1]} : vector<8x256xf32> to vector<8x64xf32>
    %495 = arith.negf %494 : vector<8x64xf32>
    %496 = math.exp %495 : vector<8x64xf32>
    %cst_177 = arith.constant 1.000000e+00 : f32
    %497 = vector.broadcast %cst_177 : f32 to vector<8x64xf32>
    %498 = arith.addf %497, %496 : vector<8x64xf32>
    %499 = arith.divf %497, %498 : vector<8x64xf32>
    %500 = arith.mulf %491, %468 : vector<8x64xf32>
    %501 = arith.mulf %485, %493 : vector<8x64xf32>
    %502 = arith.addf %500, %501 : vector<8x64xf32>
    %503 = math.tanh %502 : vector<8x64xf32>
    %504 = arith.mulf %499, %503 : vector<8x64xf32>
    %505 = vector.extract_strided_slice %504 {offsets = [0, 0], sizes = [8, 32], strides = [1, 1]} : vector<8x64xf32> to vector<8x32xf32>
    %c56_178 = arith.constant 56 : index
    %c0_179 = arith.constant 0 : index
    %506 = vector.load %arg21[%c56_178, %c0_179] : memref<64x32xf32, #tpu.memory_space<vmem>>, vector<8x32xf32>
    tpu.vector_store %arg21[%c56_178, %c0_179], %505 {strides = array<i32>} : memref<64x32xf32, #tpu.memory_space<vmem>>, vector<8x32xf32>,
    %507 = vector.extract_strided_slice %504 {offsets = [0, 32], sizes = [8, 32], strides = [1, 1]} : vector<8x64xf32> to vector<8x32xf32>
    %c0_180 = arith.constant 0 : index
    %c0_181 = arith.constant 0 : index
    %508 = vector.load %arg22[%c0_180, %c0_181] : memref<64x32xf32, #tpu.memory_space<vmem>>, vector<8x32xf32>
    tpu.vector_store %arg22[%c0_180, %c0_181], %507 {strides = array<i32>} : memref<64x32xf32, #tpu.memory_space<vmem>>, vector<8x32xf32>,
    %c0_182 = arith.constant 0 : index
    %c0_183 = arith.constant 0 : index
    %509 = vector.load %arg21[%c0_182, %c0_183] : memref<64x32xf32, #tpu.memory_space<vmem>>, vector<64x32xf32>
    %c0_184 = arith.constant 0 : index
    %c0_185 = arith.constant 0 : index
    %510 = vector.load %arg22[%c0_184, %c0_185] : memref<64x32xf32, #tpu.memory_space<vmem>>, vector<64x32xf32>
    %c0_186 = arith.constant 0 : index
    %c0_187 = arith.constant 0 : index
    %511 = vector.load %arg7[%c0_186, %c0_187] : memref<32x256xf32, #tpu.memory_space<vmem>>, vector<32x256xf32>
    %cst_188 = arith.constant dense<0.000000e+00> : vector<64x256xf32>
    %512 = tpu.matmul %509, %511, %cst_188 {dimension_numbers = #tpu.dot_dimension_numbers<[1], [0], [0], [1], [0, 0, 1, 1], [], []>} : vector<64x32xf32>, vector<32x256xf32>, vector<64x256xf32> -> vector<64x256xf32>
    %c0_189 = arith.constant 0 : index
    %c0_190 = arith.constant 0 : index
    %513 = vector.load %arg8[%c0_189, %c0_190] : memref<32x256xf32, #tpu.memory_space<vmem>>, vector<32x256xf32>
    %cst_191 = arith.constant dense<0.000000e+00> : vector<64x256xf32>
    %514 = tpu.matmul %510, %513, %cst_191 {dimension_numbers = #tpu.dot_dimension_numbers<[1], [0], [0], [1], [0, 0, 1, 1], [], []>} : vector<64x32xf32>, vector<32x256xf32>, vector<64x256xf32> -> vector<64x256xf32>
    %515 = arith.addf %512, %514 : vector<64x256xf32>
    %c0_192 = arith.constant 0 : index
    %c0_193 = arith.constant 0 : index
    %516 = vector.load %arg11[%c0_192, %c0_193] : memref<1x256xf32, #tpu.memory_space<vmem>>, vector<1x256xf32>
    %517 = vector.broadcast %516 : vector<1x256xf32> to vector<64x256xf32>
    %518 = arith.addf %515, %517 : vector<64x256xf32>
    %c0_194 = arith.constant 0 : index
    %c0_195 = arith.constant 0 : index
    %519 = vector.load %arg19[%c0_194, %c0_195] : memref<64x256xf32, #tpu.memory_space<vmem>>, vector<64x256xf32>
    tpu.vector_store %arg19[%c0_194, %c0_195], %518 {strides = array<i32>} : memref<64x256xf32, #tpu.memory_space<vmem>>, vector<64x256xf32>,
    %c0_196 = arith.constant 0 : index
    %c0_197 = arith.constant 0 : index
    %520 = vector.load %arg9[%c0_196, %c0_197] : memref<32x256xf32, #tpu.memory_space<vmem>>, vector<32x256xf32>
    %cst_198 = arith.constant dense<0.000000e+00> : vector<64x256xf32>
    %521 = tpu.matmul %509, %520, %cst_198 {dimension_numbers = #tpu.dot_dimension_numbers<[1], [0], [0], [1], [0, 0, 1, 1], [], []>} : vector<64x32xf32>, vector<32x256xf32>, vector<64x256xf32> -> vector<64x256xf32>
    %c0_199 = arith.constant 0 : index
    %c0_200 = arith.constant 0 : index
    %522 = vector.load %arg10[%c0_199, %c0_200] : memref<32x256xf32, #tpu.memory_space<vmem>>, vector<32x256xf32>
    %cst_201 = arith.constant dense<0.000000e+00> : vector<64x256xf32>
    %523 = tpu.matmul %510, %522, %cst_201 {dimension_numbers = #tpu.dot_dimension_numbers<[1], [0], [0], [1], [0, 0, 1, 1], [], []>} : vector<64x32xf32>, vector<32x256xf32>, vector<64x256xf32> -> vector<64x256xf32>
    %524 = arith.addf %521, %523 : vector<64x256xf32>
    %c0_202 = arith.constant 0 : index
    %c0_203 = arith.constant 0 : index
    %525 = vector.load %arg20[%c0_202, %c0_203] : memref<64x256xf32, #tpu.memory_space<vmem>>, vector<64x256xf32>
    tpu.vector_store %arg20[%c0_202, %c0_203], %524 {strides = array<i32>} : memref<64x256xf32, #tpu.memory_space<vmem>>, vector<64x256xf32>,
    %c0_204 = arith.constant 0 : index
    %c0_205 = arith.constant 0 : index
    %526 = vector.load %arg12[%c0_204, %c0_205] : memref<64x256xf32, #tpu.memory_space<vmem>>, vector<64x256xf32>
    %cst_206 = arith.constant 0.000000e+00 : f32
    %527 = vector.broadcast %cst_206 : f32 to vector<8x64xf32>
    %cst_207 = arith.constant 0.000000e+00 : f32
    %528 = vector.broadcast %cst_207 : f32 to vector<8x64xf32>
    %c0_208 = arith.constant 0 : index
    %c0_209 = arith.constant 0 : index
    %529 = vector.load %arg19[%c0_208, %c0_209] : memref<64x256xf32, #tpu.memory_space<vmem>>, vector<8x256xf32>
    %c56_210 = arith.constant 56 : index
    %c0_211 = arith.constant 0 : index
    %530 = vector.load %arg20[%c56_210, %c0_211] : memref<64x256xf32, #tpu.memory_space<vmem>>, vector<8x256xf32>
    %531 = arith.addf %529, %530 : vector<8x256xf32>
    %cst_212 = arith.constant dense<0.000000e+00> : vector<8x256xf32>
    %532 = tpu.matmul %527, %526, %cst_212 {dimension_numbers = #tpu.dot_dimension_numbers<[1], [0], [0], [1], [0, 0, 1, 1], [], []>} : vector<8x64xf32>, vector<64x256xf32>, vector<8x256xf32> -> vector<8x256xf32>
    %533 = arith.addf %531, %532 : vector<8x256xf32>
    %534 = vector.extract_strided_slice %533 {offsets = [0, 0], sizes = [8, 64], strides = [1, 1]} : vector<8x256xf32> to vector<8x64xf32>
    %535 = arith.negf %534 : vector<8x64xf32>
    %536 = math.exp %535 : vector<8x64xf32>
    %cst_213 = arith.constant 1.000000e+00 : f32
    %537 = vector.broadcast %cst_213 : f32 to vector<8x64xf32>
    %538 = arith.addf %537, %536 : vector<8x64xf32>
    %539 = arith.divf %537, %538 : vector<8x64xf32>
    %540 = vector.extract_strided_slice %533 {offsets = [0, 64], sizes = [8, 64], strides = [1, 1]} : vector<8x256xf32> to vector<8x64xf32>
    %541 = arith.negf %540 : vector<8x64xf32>
    %542 = math.exp %541 : vector<8x64xf32>
    %cst_214 = arith.constant 1.000000e+00 : f32
    %543 = vector.broadcast %cst_214 : f32 to vector<8x64xf32>
    %544 = arith.addf %543, %542 : vector<8x64xf32>
    %545 = arith.divf %543, %544 : vector<8x64xf32>
    %546 = vector.extract_strided_slice %533 {offsets = [0, 128], sizes = [8, 64], strides = [1, 1]} : vector<8x256xf32> to vector<8x64xf32>
    %547 = math.tanh %546 : vector<8x64xf32>
    %548 = vector.extract_strided_slice %533 {offsets = [0, 192], sizes = [8, 64], strides = [1, 1]} : vector<8x256xf32> to vector<8x64xf32>
    %549 = arith.negf %548 : vector<8x64xf32>
    %550 = math.exp %549 : vector<8x64xf32>
    %cst_215 = arith.constant 1.000000e+00 : f32
    %551 = vector.broadcast %cst_215 : f32 to vector<8x64xf32>
    %552 = arith.addf %551, %550 : vector<8x64xf32>
    %553 = arith.divf %551, %552 : vector<8x64xf32>
    %554 = arith.mulf %545, %528 : vector<8x64xf32>
    %555 = arith.mulf %539, %547 : vector<8x64xf32>
    %556 = arith.addf %554, %555 : vector<8x64xf32>
    %557 = math.tanh %556 : vector<8x64xf32>
    %558 = arith.mulf %553, %557 : vector<8x64xf32>
    %559 = vector.extract_strided_slice %558 {offsets = [0, 0], sizes = [8, 32], strides = [1, 1]} : vector<8x64xf32> to vector<8x32xf32>
    %c0_216 = arith.constant 0 : index
    %c0_217 = arith.constant 0 : index
    %560 = vector.load %arg23[%c0_216, %c0_217] : memref<64x32xf32, #tpu.memory_space<vmem>>, vector<8x32xf32>
    tpu.vector_store %arg23[%c0_216, %c0_217], %559 {strides = array<i32>} : memref<64x32xf32, #tpu.memory_space<vmem>>, vector<8x32xf32>,
    %561 = vector.extract_strided_slice %558 {offsets = [0, 32], sizes = [8, 32], strides = [1, 1]} : vector<8x64xf32> to vector<8x32xf32>
    %c56_218 = arith.constant 56 : index
    %c0_219 = arith.constant 0 : index
    %562 = vector.load %arg24[%c56_218, %c0_219] : memref<64x32xf32, #tpu.memory_space<vmem>>, vector<8x32xf32>
    tpu.vector_store %arg24[%c56_218, %c0_219], %561 {strides = array<i32>} : memref<64x32xf32, #tpu.memory_space<vmem>>, vector<8x32xf32>,
    %c8_220 = arith.constant 8 : index
    %c0_221 = arith.constant 0 : index
    %563 = vector.load %arg19[%c8_220, %c0_221] : memref<64x256xf32, #tpu.memory_space<vmem>>, vector<8x256xf32>
    %c48_222 = arith.constant 48 : index
    %c0_223 = arith.constant 0 : index
    %564 = vector.load %arg20[%c48_222, %c0_223] : memref<64x256xf32, #tpu.memory_space<vmem>>, vector<8x256xf32>
    %565 = arith.addf %563, %564 : vector<8x256xf32>
    %cst_224 = arith.constant dense<0.000000e+00> : vector<8x256xf32>
    %566 = tpu.matmul %558, %526, %cst_224 {dimension_numbers = #tpu.dot_dimension_numbers<[1], [0], [0], [1], [0, 0, 1, 1], [], []>} : vector<8x64xf32>, vector<64x256xf32>, vector<8x256xf32> -> vector<8x256xf32>
    %567 = arith.addf %565, %566 : vector<8x256xf32>
    %568 = vector.extract_strided_slice %567 {offsets = [0, 0], sizes = [8, 64], strides = [1, 1]} : vector<8x256xf32> to vector<8x64xf32>
    %569 = arith.negf %568 : vector<8x64xf32>
    %570 = math.exp %569 : vector<8x64xf32>
    %cst_225 = arith.constant 1.000000e+00 : f32
    %571 = vector.broadcast %cst_225 : f32 to vector<8x64xf32>
    %572 = arith.addf %571, %570 : vector<8x64xf32>
    %573 = arith.divf %571, %572 : vector<8x64xf32>
    %574 = vector.extract_strided_slice %567 {offsets = [0, 64], sizes = [8, 64], strides = [1, 1]} : vector<8x256xf32> to vector<8x64xf32>
    %575 = arith.negf %574 : vector<8x64xf32>
    %576 = math.exp %575 : vector<8x64xf32>
    %cst_226 = arith.constant 1.000000e+00 : f32
    %577 = vector.broadcast %cst_226 : f32 to vector<8x64xf32>
    %578 = arith.addf %577, %576 : vector<8x64xf32>
    %579 = arith.divf %577, %578 : vector<8x64xf32>
    %580 = vector.extract_strided_slice %567 {offsets = [0, 128], sizes = [8, 64], strides = [1, 1]} : vector<8x256xf32> to vector<8x64xf32>
    %581 = math.tanh %580 : vector<8x64xf32>
    %582 = vector.extract_strided_slice %567 {offsets = [0, 192], sizes = [8, 64], strides = [1, 1]} : vector<8x256xf32> to vector<8x64xf32>
    %583 = arith.negf %582 : vector<8x64xf32>
    %584 = math.exp %583 : vector<8x64xf32>
    %cst_227 = arith.constant 1.000000e+00 : f32
    %585 = vector.broadcast %cst_227 : f32 to vector<8x64xf32>
    %586 = arith.addf %585, %584 : vector<8x64xf32>
    %587 = arith.divf %585, %586 : vector<8x64xf32>
    %588 = arith.mulf %579, %556 : vector<8x64xf32>
    %589 = arith.mulf %573, %581 : vector<8x64xf32>
    %590 = arith.addf %588, %589 : vector<8x64xf32>
    %591 = math.tanh %590 : vector<8x64xf32>
    %592 = arith.mulf %587, %591 : vector<8x64xf32>
    %593 = vector.extract_strided_slice %592 {offsets = [0, 0], sizes = [8, 32], strides = [1, 1]} : vector<8x64xf32> to vector<8x32xf32>
    %c8_228 = arith.constant 8 : index
    %c0_229 = arith.constant 0 : index
    %594 = vector.load %arg23[%c8_228, %c0_229] : memref<64x32xf32, #tpu.memory_space<vmem>>, vector<8x32xf32>
    tpu.vector_store %arg23[%c8_228, %c0_229], %593 {strides = array<i32>} : memref<64x32xf32, #tpu.memory_space<vmem>>, vector<8x32xf32>,
    %595 = vector.extract_strided_slice %592 {offsets = [0, 32], sizes = [8, 32], strides = [1, 1]} : vector<8x64xf32> to vector<8x32xf32>
    %c48_230 = arith.constant 48 : index
    %c0_231 = arith.constant 0 : index
    %596 = vector.load %arg24[%c48_230, %c0_231] : memref<64x32xf32, #tpu.memory_space<vmem>>, vector<8x32xf32>
    tpu.vector_store %arg24[%c48_230, %c0_231], %595 {strides = array<i32>} : memref<64x32xf32, #tpu.memory_space<vmem>>, vector<8x32xf32>,
    %c16_232 = arith.constant 16 : index
    %c0_233 = arith.constant 0 : index
    %597 = vector.load %arg19[%c16_232, %c0_233] : memref<64x256xf32, #tpu.memory_space<vmem>>, vector<8x256xf32>
    %c40_234 = arith.constant 40 : index
    %c0_235 = arith.constant 0 : index
    %598 = vector.load %arg20[%c40_234, %c0_235] : memref<64x256xf32, #tpu.memory_space<vmem>>, vector<8x256xf32>
    %599 = arith.addf %597, %598 : vector<8x256xf32>
    %cst_236 = arith.constant dense<0.000000e+00> : vector<8x256xf32>
    %600 = tpu.matmul %592, %526, %cst_236 {dimension_numbers = #tpu.dot_dimension_numbers<[1], [0], [0], [1], [0, 0, 1, 1], [], []>} : vector<8x64xf32>, vector<64x256xf32>, vector<8x256xf32> -> vector<8x256xf32>
    %601 = arith.addf %599, %600 : vector<8x256xf32>
    %602 = vector.extract_strided_slice %601 {offsets = [0, 0], sizes = [8, 64], strides = [1, 1]} : vector<8x256xf32> to vector<8x64xf32>
    %603 = arith.negf %602 : vector<8x64xf32>
    %604 = math.exp %603 : vector<8x64xf32>
    %cst_237 = arith.constant 1.000000e+00 : f32
    %605 = vector.broadcast %cst_237 : f32 to vector<8x64xf32>
    %606 = arith.addf %605, %604 : vector<8x64xf32>
    %607 = arith.divf %605, %606 : vector<8x64xf32>
    %608 = vector.extract_strided_slice %601 {offsets = [0, 64], sizes = [8, 64], strides = [1, 1]} : vector<8x256xf32> to vector<8x64xf32>
    %609 = arith.negf %608 : vector<8x64xf32>
    %610 = math.exp %609 : vector<8x64xf32>
    %cst_238 = arith.constant 1.000000e+00 : f32
    %611 = vector.broadcast %cst_238 : f32 to vector<8x64xf32>
    %612 = arith.addf %611, %610 : vector<8x64xf32>
    %613 = arith.divf %611, %612 : vector<8x64xf32>
    %614 = vector.extract_strided_slice %601 {offsets = [0, 128], sizes = [8, 64], strides = [1, 1]} : vector<8x256xf32> to vector<8x64xf32>
    %615 = math.tanh %614 : vector<8x64xf32>
    %616 = vector.extract_strided_slice %601 {offsets = [0, 192], sizes = [8, 64], strides = [1, 1]} : vector<8x256xf32> to vector<8x64xf32>
    %617 = arith.negf %616 : vector<8x64xf32>
    %618 = math.exp %617 : vector<8x64xf32>
    %cst_239 = arith.constant 1.000000e+00 : f32
    %619 = vector.broadcast %cst_239 : f32 to vector<8x64xf32>
    %620 = arith.addf %619, %618 : vector<8x64xf32>
    %621 = arith.divf %619, %620 : vector<8x64xf32>
    %622 = arith.mulf %613, %590 : vector<8x64xf32>
    %623 = arith.mulf %607, %615 : vector<8x64xf32>
    %624 = arith.addf %622, %623 : vector<8x64xf32>
    %625 = math.tanh %624 : vector<8x64xf32>
    %626 = arith.mulf %621, %625 : vector<8x64xf32>
    %627 = vector.extract_strided_slice %626 {offsets = [0, 0], sizes = [8, 32], strides = [1, 1]} : vector<8x64xf32> to vector<8x32xf32>
    %c16_240 = arith.constant 16 : index
    %c0_241 = arith.constant 0 : index
    %628 = vector.load %arg23[%c16_240, %c0_241] : memref<64x32xf32, #tpu.memory_space<vmem>>, vector<8x32xf32>
    tpu.vector_store %arg23[%c16_240, %c0_241], %627 {strides = array<i32>} : memref<64x32xf32, #tpu.memory_space<vmem>>, vector<8x32xf32>,
    %629 = vector.extract_strided_slice %626 {offsets = [0, 32], sizes = [8, 32], strides = [1, 1]} : vector<8x64xf32> to vector<8x32xf32>
    %c40_242 = arith.constant 40 : index
    %c0_243 = arith.constant 0 : index
    %630 = vector.load %arg24[%c40_242, %c0_243] : memref<64x32xf32, #tpu.memory_space<vmem>>, vector<8x32xf32>
    tpu.vector_store %arg24[%c40_242, %c0_243], %629 {strides = array<i32>} : memref<64x32xf32, #tpu.memory_space<vmem>>, vector<8x32xf32>,
    %c24_244 = arith.constant 24 : index
    %c0_245 = arith.constant 0 : index
    %631 = vector.load %arg19[%c24_244, %c0_245] : memref<64x256xf32, #tpu.memory_space<vmem>>, vector<8x256xf32>
    %c32_246 = arith.constant 32 : index
    %c0_247 = arith.constant 0 : index
    %632 = vector.load %arg20[%c32_246, %c0_247] : memref<64x256xf32, #tpu.memory_space<vmem>>, vector<8x256xf32>
    %633 = arith.addf %631, %632 : vector<8x256xf32>
    %cst_248 = arith.constant dense<0.000000e+00> : vector<8x256xf32>
    %634 = tpu.matmul %626, %526, %cst_248 {dimension_numbers = #tpu.dot_dimension_numbers<[1], [0], [0], [1], [0, 0, 1, 1], [], []>} : vector<8x64xf32>, vector<64x256xf32>, vector<8x256xf32> -> vector<8x256xf32>
    %635 = arith.addf %633, %634 : vector<8x256xf32>
    %636 = vector.extract_strided_slice %635 {offsets = [0, 0], sizes = [8, 64], strides = [1, 1]} : vector<8x256xf32> to vector<8x64xf32>
    %637 = arith.negf %636 : vector<8x64xf32>
    %638 = math.exp %637 : vector<8x64xf32>
    %cst_249 = arith.constant 1.000000e+00 : f32
    %639 = vector.broadcast %cst_249 : f32 to vector<8x64xf32>
    %640 = arith.addf %639, %638 : vector<8x64xf32>
    %641 = arith.divf %639, %640 : vector<8x64xf32>
    %642 = vector.extract_strided_slice %635 {offsets = [0, 64], sizes = [8, 64], strides = [1, 1]} : vector<8x256xf32> to vector<8x64xf32>
    %643 = arith.negf %642 : vector<8x64xf32>
    %644 = math.exp %643 : vector<8x64xf32>
    %cst_250 = arith.constant 1.000000e+00 : f32
    %645 = vector.broadcast %cst_250 : f32 to vector<8x64xf32>
    %646 = arith.addf %645, %644 : vector<8x64xf32>
    %647 = arith.divf %645, %646 : vector<8x64xf32>
    %648 = vector.extract_strided_slice %635 {offsets = [0, 128], sizes = [8, 64], strides = [1, 1]} : vector<8x256xf32> to vector<8x64xf32>
    %649 = math.tanh %648 : vector<8x64xf32>
    %650 = vector.extract_strided_slice %635 {offsets = [0, 192], sizes = [8, 64], strides = [1, 1]} : vector<8x256xf32> to vector<8x64xf32>
    %651 = arith.negf %650 : vector<8x64xf32>
    %652 = math.exp %651 : vector<8x64xf32>
    %cst_251 = arith.constant 1.000000e+00 : f32
    %653 = vector.broadcast %cst_251 : f32 to vector<8x64xf32>
    %654 = arith.addf %653, %652 : vector<8x64xf32>
    %655 = arith.divf %653, %654 : vector<8x64xf32>
    %656 = arith.mulf %647, %624 : vector<8x64xf32>
    %657 = arith.mulf %641, %649 : vector<8x64xf32>
    %658 = arith.addf %656, %657 : vector<8x64xf32>
    %659 = math.tanh %658 : vector<8x64xf32>
    %660 = arith.mulf %655, %659 : vector<8x64xf32>
    %661 = vector.extract_strided_slice %660 {offsets = [0, 0], sizes = [8, 32], strides = [1, 1]} : vector<8x64xf32> to vector<8x32xf32>
    %c24_252 = arith.constant 24 : index
    %c0_253 = arith.constant 0 : index
    %662 = vector.load %arg23[%c24_252, %c0_253] : memref<64x32xf32, #tpu.memory_space<vmem>>, vector<8x32xf32>
    tpu.vector_store %arg23[%c24_252, %c0_253], %661 {strides = array<i32>} : memref<64x32xf32, #tpu.memory_space<vmem>>, vector<8x32xf32>,
    %663 = vector.extract_strided_slice %660 {offsets = [0, 32], sizes = [8, 32], strides = [1, 1]} : vector<8x64xf32> to vector<8x32xf32>
    %c32_254 = arith.constant 32 : index
    %c0_255 = arith.constant 0 : index
    %664 = vector.load %arg24[%c32_254, %c0_255] : memref<64x32xf32, #tpu.memory_space<vmem>>, vector<8x32xf32>
    tpu.vector_store %arg24[%c32_254, %c0_255], %663 {strides = array<i32>} : memref<64x32xf32, #tpu.memory_space<vmem>>, vector<8x32xf32>,
    %c32_256 = arith.constant 32 : index
    %c0_257 = arith.constant 0 : index
    %665 = vector.load %arg19[%c32_256, %c0_257] : memref<64x256xf32, #tpu.memory_space<vmem>>, vector<8x256xf32>
    %c24_258 = arith.constant 24 : index
    %c0_259 = arith.constant 0 : index
    %666 = vector.load %arg20[%c24_258, %c0_259] : memref<64x256xf32, #tpu.memory_space<vmem>>, vector<8x256xf32>
    %667 = arith.addf %665, %666 : vector<8x256xf32>
    %cst_260 = arith.constant dense<0.000000e+00> : vector<8x256xf32>
    %668 = tpu.matmul %660, %526, %cst_260 {dimension_numbers = #tpu.dot_dimension_numbers<[1], [0], [0], [1], [0, 0, 1, 1], [], []>} : vector<8x64xf32>, vector<64x256xf32>, vector<8x256xf32> -> vector<8x256xf32>
    %669 = arith.addf %667, %668 : vector<8x256xf32>
    %670 = vector.extract_strided_slice %669 {offsets = [0, 0], sizes = [8, 64], strides = [1, 1]} : vector<8x256xf32> to vector<8x64xf32>
    %671 = arith.negf %670 : vector<8x64xf32>
    %672 = math.exp %671 : vector<8x64xf32>
    %cst_261 = arith.constant 1.000000e+00 : f32
    %673 = vector.broadcast %cst_261 : f32 to vector<8x64xf32>
    %674 = arith.addf %673, %672 : vector<8x64xf32>
    %675 = arith.divf %673, %674 : vector<8x64xf32>
    %676 = vector.extract_strided_slice %669 {offsets = [0, 64], sizes = [8, 64], strides = [1, 1]} : vector<8x256xf32> to vector<8x64xf32>
    %677 = arith.negf %676 : vector<8x64xf32>
    %678 = math.exp %677 : vector<8x64xf32>
    %cst_262 = arith.constant 1.000000e+00 : f32
    %679 = vector.broadcast %cst_262 : f32 to vector<8x64xf32>
    %680 = arith.addf %679, %678 : vector<8x64xf32>
    %681 = arith.divf %679, %680 : vector<8x64xf32>
    %682 = vector.extract_strided_slice %669 {offsets = [0, 128], sizes = [8, 64], strides = [1, 1]} : vector<8x256xf32> to vector<8x64xf32>
    %683 = math.tanh %682 : vector<8x64xf32>
    %684 = vector.extract_strided_slice %669 {offsets = [0, 192], sizes = [8, 64], strides = [1, 1]} : vector<8x256xf32> to vector<8x64xf32>
    %685 = arith.negf %684 : vector<8x64xf32>
    %686 = math.exp %685 : vector<8x64xf32>
    %cst_263 = arith.constant 1.000000e+00 : f32
    %687 = vector.broadcast %cst_263 : f32 to vector<8x64xf32>
    %688 = arith.addf %687, %686 : vector<8x64xf32>
    %689 = arith.divf %687, %688 : vector<8x64xf32>
    %690 = arith.mulf %681, %658 : vector<8x64xf32>
    %691 = arith.mulf %675, %683 : vector<8x64xf32>
    %692 = arith.addf %690, %691 : vector<8x64xf32>
    %693 = math.tanh %692 : vector<8x64xf32>
    %694 = arith.mulf %689, %693 : vector<8x64xf32>
    %695 = vector.extract_strided_slice %694 {offsets = [0, 0], sizes = [8, 32], strides = [1, 1]} : vector<8x64xf32> to vector<8x32xf32>
    %c32_264 = arith.constant 32 : index
    %c0_265 = arith.constant 0 : index
    %696 = vector.load %arg23[%c32_264, %c0_265] : memref<64x32xf32, #tpu.memory_space<vmem>>, vector<8x32xf32>
    tpu.vector_store %arg23[%c32_264, %c0_265], %695 {strides = array<i32>} : memref<64x32xf32, #tpu.memory_space<vmem>>, vector<8x32xf32>,
    %697 = vector.extract_strided_slice %694 {offsets = [0, 32], sizes = [8, 32], strides = [1, 1]} : vector<8x64xf32> to vector<8x32xf32>
    %c24_266 = arith.constant 24 : index
    %c0_267 = arith.constant 0 : index
    %698 = vector.load %arg24[%c24_266, %c0_267] : memref<64x32xf32, #tpu.memory_space<vmem>>, vector<8x32xf32>
    tpu.vector_store %arg24[%c24_266, %c0_267], %697 {strides = array<i32>} : memref<64x32xf32, #tpu.memory_space<vmem>>, vector<8x32xf32>,
    %c40_268 = arith.constant 40 : index
    %c0_269 = arith.constant 0 : index
    %699 = vector.load %arg19[%c40_268, %c0_269] : memref<64x256xf32, #tpu.memory_space<vmem>>, vector<8x256xf32>
    %c16_270 = arith.constant 16 : index
    %c0_271 = arith.constant 0 : index
    %700 = vector.load %arg20[%c16_270, %c0_271] : memref<64x256xf32, #tpu.memory_space<vmem>>, vector<8x256xf32>
    %701 = arith.addf %699, %700 : vector<8x256xf32>
    %cst_272 = arith.constant dense<0.000000e+00> : vector<8x256xf32>
    %702 = tpu.matmul %694, %526, %cst_272 {dimension_numbers = #tpu.dot_dimension_numbers<[1], [0], [0], [1], [0, 0, 1, 1], [], []>} : vector<8x64xf32>, vector<64x256xf32>, vector<8x256xf32> -> vector<8x256xf32>
    %703 = arith.addf %701, %702 : vector<8x256xf32>
    %704 = vector.extract_strided_slice %703 {offsets = [0, 0], sizes = [8, 64], strides = [1, 1]} : vector<8x256xf32> to vector<8x64xf32>
    %705 = arith.negf %704 : vector<8x64xf32>
    %706 = math.exp %705 : vector<8x64xf32>
    %cst_273 = arith.constant 1.000000e+00 : f32
    %707 = vector.broadcast %cst_273 : f32 to vector<8x64xf32>
    %708 = arith.addf %707, %706 : vector<8x64xf32>
    %709 = arith.divf %707, %708 : vector<8x64xf32>
    %710 = vector.extract_strided_slice %703 {offsets = [0, 64], sizes = [8, 64], strides = [1, 1]} : vector<8x256xf32> to vector<8x64xf32>
    %711 = arith.negf %710 : vector<8x64xf32>
    %712 = math.exp %711 : vector<8x64xf32>
    %cst_274 = arith.constant 1.000000e+00 : f32
    %713 = vector.broadcast %cst_274 : f32 to vector<8x64xf32>
    %714 = arith.addf %713, %712 : vector<8x64xf32>
    %715 = arith.divf %713, %714 : vector<8x64xf32>
    %716 = vector.extract_strided_slice %703 {offsets = [0, 128], sizes = [8, 64], strides = [1, 1]} : vector<8x256xf32> to vector<8x64xf32>
    %717 = math.tanh %716 : vector<8x64xf32>
    %718 = vector.extract_strided_slice %703 {offsets = [0, 192], sizes = [8, 64], strides = [1, 1]} : vector<8x256xf32> to vector<8x64xf32>
    %719 = arith.negf %718 : vector<8x64xf32>
    %720 = math.exp %719 : vector<8x64xf32>
    %cst_275 = arith.constant 1.000000e+00 : f32
    %721 = vector.broadcast %cst_275 : f32 to vector<8x64xf32>
    %722 = arith.addf %721, %720 : vector<8x64xf32>
    %723 = arith.divf %721, %722 : vector<8x64xf32>
    %724 = arith.mulf %715, %692 : vector<8x64xf32>
    %725 = arith.mulf %709, %717 : vector<8x64xf32>
    %726 = arith.addf %724, %725 : vector<8x64xf32>
    %727 = math.tanh %726 : vector<8x64xf32>
    %728 = arith.mulf %723, %727 : vector<8x64xf32>
    %729 = vector.extract_strided_slice %728 {offsets = [0, 0], sizes = [8, 32], strides = [1, 1]} : vector<8x64xf32> to vector<8x32xf32>
    %c40_276 = arith.constant 40 : index
    %c0_277 = arith.constant 0 : index
    %730 = vector.load %arg23[%c40_276, %c0_277] : memref<64x32xf32, #tpu.memory_space<vmem>>, vector<8x32xf32>
    tpu.vector_store %arg23[%c40_276, %c0_277], %729 {strides = array<i32>} : memref<64x32xf32, #tpu.memory_space<vmem>>, vector<8x32xf32>,
    %731 = vector.extract_strided_slice %728 {offsets = [0, 32], sizes = [8, 32], strides = [1, 1]} : vector<8x64xf32> to vector<8x32xf32>
    %c16_278 = arith.constant 16 : index
    %c0_279 = arith.constant 0 : index
    %732 = vector.load %arg24[%c16_278, %c0_279] : memref<64x32xf32, #tpu.memory_space<vmem>>, vector<8x32xf32>
    tpu.vector_store %arg24[%c16_278, %c0_279], %731 {strides = array<i32>} : memref<64x32xf32, #tpu.memory_space<vmem>>, vector<8x32xf32>,
    %c48_280 = arith.constant 48 : index
    %c0_281 = arith.constant 0 : index
    %733 = vector.load %arg19[%c48_280, %c0_281] : memref<64x256xf32, #tpu.memory_space<vmem>>, vector<8x256xf32>
    %c8_282 = arith.constant 8 : index
    %c0_283 = arith.constant 0 : index
    %734 = vector.load %arg20[%c8_282, %c0_283] : memref<64x256xf32, #tpu.memory_space<vmem>>, vector<8x256xf32>
    %735 = arith.addf %733, %734 : vector<8x256xf32>
    %cst_284 = arith.constant dense<0.000000e+00> : vector<8x256xf32>
    %736 = tpu.matmul %728, %526, %cst_284 {dimension_numbers = #tpu.dot_dimension_numbers<[1], [0], [0], [1], [0, 0, 1, 1], [], []>} : vector<8x64xf32>, vector<64x256xf32>, vector<8x256xf32> -> vector<8x256xf32>
    %737 = arith.addf %735, %736 : vector<8x256xf32>
    %738 = vector.extract_strided_slice %737 {offsets = [0, 0], sizes = [8, 64], strides = [1, 1]} : vector<8x256xf32> to vector<8x64xf32>
    %739 = arith.negf %738 : vector<8x64xf32>
    %740 = math.exp %739 : vector<8x64xf32>
    %cst_285 = arith.constant 1.000000e+00 : f32
    %741 = vector.broadcast %cst_285 : f32 to vector<8x64xf32>
    %742 = arith.addf %741, %740 : vector<8x64xf32>
    %743 = arith.divf %741, %742 : vector<8x64xf32>
    %744 = vector.extract_strided_slice %737 {offsets = [0, 64], sizes = [8, 64], strides = [1, 1]} : vector<8x256xf32> to vector<8x64xf32>
    %745 = arith.negf %744 : vector<8x64xf32>
    %746 = math.exp %745 : vector<8x64xf32>
    %cst_286 = arith.constant 1.000000e+00 : f32
    %747 = vector.broadcast %cst_286 : f32 to vector<8x64xf32>
    %748 = arith.addf %747, %746 : vector<8x64xf32>
    %749 = arith.divf %747, %748 : vector<8x64xf32>
    %750 = vector.extract_strided_slice %737 {offsets = [0, 128], sizes = [8, 64], strides = [1, 1]} : vector<8x256xf32> to vector<8x64xf32>
    %751 = math.tanh %750 : vector<8x64xf32>
    %752 = vector.extract_strided_slice %737 {offsets = [0, 192], sizes = [8, 64], strides = [1, 1]} : vector<8x256xf32> to vector<8x64xf32>
    %753 = arith.negf %752 : vector<8x64xf32>
    %754 = math.exp %753 : vector<8x64xf32>
    %cst_287 = arith.constant 1.000000e+00 : f32
    %755 = vector.broadcast %cst_287 : f32 to vector<8x64xf32>
    %756 = arith.addf %755, %754 : vector<8x64xf32>
    %757 = arith.divf %755, %756 : vector<8x64xf32>
    %758 = arith.mulf %749, %726 : vector<8x64xf32>
    %759 = arith.mulf %743, %751 : vector<8x64xf32>
    %760 = arith.addf %758, %759 : vector<8x64xf32>
    %761 = math.tanh %760 : vector<8x64xf32>
    %762 = arith.mulf %757, %761 : vector<8x64xf32>
    %763 = vector.extract_strided_slice %762 {offsets = [0, 0], sizes = [8, 32], strides = [1, 1]} : vector<8x64xf32> to vector<8x32xf32>
    %c48_288 = arith.constant 48 : index
    %c0_289 = arith.constant 0 : index
    %764 = vector.load %arg23[%c48_288, %c0_289] : memref<64x32xf32, #tpu.memory_space<vmem>>, vector<8x32xf32>
    tpu.vector_store %arg23[%c48_288, %c0_289], %763 {strides = array<i32>} : memref<64x32xf32, #tpu.memory_space<vmem>>, vector<8x32xf32>,
    %765 = vector.extract_strided_slice %762 {offsets = [0, 32], sizes = [8, 32], strides = [1, 1]} : vector<8x64xf32> to vector<8x32xf32>
    %c8_290 = arith.constant 8 : index
    %c0_291 = arith.constant 0 : index
    %766 = vector.load %arg24[%c8_290, %c0_291] : memref<64x32xf32, #tpu.memory_space<vmem>>, vector<8x32xf32>
    tpu.vector_store %arg24[%c8_290, %c0_291], %765 {strides = array<i32>} : memref<64x32xf32, #tpu.memory_space<vmem>>, vector<8x32xf32>,
    %c56_292 = arith.constant 56 : index
    %c0_293 = arith.constant 0 : index
    %767 = vector.load %arg19[%c56_292, %c0_293] : memref<64x256xf32, #tpu.memory_space<vmem>>, vector<8x256xf32>
    %c0_294 = arith.constant 0 : index
    %c0_295 = arith.constant 0 : index
    %768 = vector.load %arg20[%c0_294, %c0_295] : memref<64x256xf32, #tpu.memory_space<vmem>>, vector<8x256xf32>
    %769 = arith.addf %767, %768 : vector<8x256xf32>
    %cst_296 = arith.constant dense<0.000000e+00> : vector<8x256xf32>
    %770 = tpu.matmul %762, %526, %cst_296 {dimension_numbers = #tpu.dot_dimension_numbers<[1], [0], [0], [1], [0, 0, 1, 1], [], []>} : vector<8x64xf32>, vector<64x256xf32>, vector<8x256xf32> -> vector<8x256xf32>
    %771 = arith.addf %769, %770 : vector<8x256xf32>
    %772 = vector.extract_strided_slice %771 {offsets = [0, 0], sizes = [8, 64], strides = [1, 1]} : vector<8x256xf32> to vector<8x64xf32>
    %773 = arith.negf %772 : vector<8x64xf32>
    %774 = math.exp %773 : vector<8x64xf32>
    %cst_297 = arith.constant 1.000000e+00 : f32
    %775 = vector.broadcast %cst_297 : f32 to vector<8x64xf32>
    %776 = arith.addf %775, %774 : vector<8x64xf32>
    %777 = arith.divf %775, %776 : vector<8x64xf32>
    %778 = vector.extract_strided_slice %771 {offsets = [0, 64], sizes = [8, 64], strides = [1, 1]} : vector<8x256xf32> to vector<8x64xf32>
    %779 = arith.negf %778 : vector<8x64xf32>
    %780 = math.exp %779 : vector<8x64xf32>
    %cst_298 = arith.constant 1.000000e+00 : f32
    %781 = vector.broadcast %cst_298 : f32 to vector<8x64xf32>
    %782 = arith.addf %781, %780 : vector<8x64xf32>
    %783 = arith.divf %781, %782 : vector<8x64xf32>
    %784 = vector.extract_strided_slice %771 {offsets = [0, 128], sizes = [8, 64], strides = [1, 1]} : vector<8x256xf32> to vector<8x64xf32>
    %785 = math.tanh %784 : vector<8x64xf32>
    %786 = vector.extract_strided_slice %771 {offsets = [0, 192], sizes = [8, 64], strides = [1, 1]} : vector<8x256xf32> to vector<8x64xf32>
    %787 = arith.negf %786 : vector<8x64xf32>
    %788 = math.exp %787 : vector<8x64xf32>
    %cst_299 = arith.constant 1.000000e+00 : f32
    %789 = vector.broadcast %cst_299 : f32 to vector<8x64xf32>
    %790 = arith.addf %789, %788 : vector<8x64xf32>
    %791 = arith.divf %789, %790 : vector<8x64xf32>
    %792 = arith.mulf %783, %760 : vector<8x64xf32>
    %793 = arith.mulf %777, %785 : vector<8x64xf32>
    %794 = arith.addf %792, %793 : vector<8x64xf32>
    %795 = math.tanh %794 : vector<8x64xf32>
    %796 = arith.mulf %791, %795 : vector<8x64xf32>
    %797 = vector.extract_strided_slice %796 {offsets = [0, 0], sizes = [8, 32], strides = [1, 1]} : vector<8x64xf32> to vector<8x32xf32>
    %c56_300 = arith.constant 56 : index
    %c0_301 = arith.constant 0 : index
    %798 = vector.load %arg23[%c56_300, %c0_301] : memref<64x32xf32, #tpu.memory_space<vmem>>, vector<8x32xf32>
    tpu.vector_store %arg23[%c56_300, %c0_301], %797 {strides = array<i32>} : memref<64x32xf32, #tpu.memory_space<vmem>>, vector<8x32xf32>,
    %799 = vector.extract_strided_slice %796 {offsets = [0, 32], sizes = [8, 32], strides = [1, 1]} : vector<8x64xf32> to vector<8x32xf32>
    %c0_302 = arith.constant 0 : index
    %c0_303 = arith.constant 0 : index
    %800 = vector.load %arg24[%c0_302, %c0_303] : memref<64x32xf32, #tpu.memory_space<vmem>>, vector<8x32xf32>
    tpu.vector_store %arg24[%c0_302, %c0_303], %799 {strides = array<i32>} : memref<64x32xf32, #tpu.memory_space<vmem>>, vector<8x32xf32>,
    %c0_304 = arith.constant 0 : index
    %c0_305 = arith.constant 0 : index
    %801 = vector.load %arg23[%c0_304, %c0_305] : memref<64x32xf32, #tpu.memory_space<vmem>>, vector<64x32xf32>
    %c0_306 = arith.constant 0 : index
    %c0_307 = arith.constant 0 : index
    %802 = vector.load %arg24[%c0_306, %c0_307] : memref<64x32xf32, #tpu.memory_space<vmem>>, vector<64x32xf32>
    %803 = arith.addf %801, %802 : vector<64x32xf32>
    %c0_308 = arith.constant 0 : index
    %c0_309 = arith.constant 0 : index
    %804 = vector.load %arg13[%c0_308, %c0_309] : memref<32x32xf32, #tpu.memory_space<vmem>>, vector<32x32xf32>
    %cst_310 = arith.constant dense<0.000000e+00> : vector<64x32xf32>
    %805 = tpu.matmul %803, %804, %cst_310 {dimension_numbers = #tpu.dot_dimension_numbers<[1], [0], [0], [1], [0, 0, 1, 1], [], []>} : vector<64x32xf32>, vector<32x32xf32>, vector<64x32xf32> -> vector<64x32xf32>
    %806 = tpu.iota {dimensions = array<i32: 0>} : vector<64x8xi32>
    %c8_i32_311 = arith.constant 8 : i32
    %c0_i32_312 = arith.constant 0 : i32
    %807 = arith.cmpi eq, %c8_i32_311, %c0_i32_312 : i32
    %c1_i32_313 = arith.constant 1 : i32
    %808 = arith.select %807, %c1_i32_313, %c8_i32_311 : i32
    %809 = vector.broadcast %808 : i32 to vector<64x8xi32>
    %810 = arith.remsi %806, %809 : vector<64x8xi32>
    %c0_i32_314 = arith.constant 0 : i32
    %811 = vector.broadcast %c0_i32_314 : i32 to vector<64x8xi32>
    %812 = arith.cmpi ne, %810, %811 : vector<64x8xi32>
    %c0_i32_315 = arith.constant 0 : i32
    %813 = vector.broadcast %c0_i32_315 : i32 to vector<64x8xi32>
    %814 = arith.cmpi slt, %810, %813 : vector<64x8xi32>
    %c0_i32_316 = arith.constant 0 : i32
    %815 = arith.cmpi slt, %808, %c0_i32_316 : i32
    %816 = vector.broadcast %815 : i1 to vector<64x8xi1>
    %817 = vector.broadcast %816 : vector<64x8xi1> to vector<64x8xi1>
    %818 = arith.xori %814, %817 : vector<64x8xi1>
    %819 = arith.andi %818, %812 : vector<64x8xi1>
    %820 = vector.broadcast %808 : i32 to vector<64x8xi32>
    %821 = arith.addi %810, %820 : vector<64x8xi32>
    %822 = arith.select %819, %821, %810 : vector<64x8xi1>, vector<64x8xi32>
    %823 = tpu.iota {dimensions = array<i32: 1>} : vector<64x8xi32>
    %824 = arith.cmpi eq, %822, %823 : vector<64x8xi32>
    %825 = arith.extui %824 : vector<64x8xi1> to vector<64x8xi32>
    %826 = arith.sitofp %825 : vector<64x8xi32> to vector<64x8xf32>
    %827 = vector.extract_strided_slice %504 {offsets = [0, 0], sizes = [8, 32], strides = [1, 1]} : vector<8x64xf32> to vector<8x32xf32>
    %828 = vector.extract_strided_slice %504 {offsets = [0, 32], sizes = [8, 32], strides = [1, 1]} : vector<8x64xf32> to vector<8x32xf32>
    %829 = vector.extract_strided_slice %796 {offsets = [0, 0], sizes = [8, 32], strides = [1, 1]} : vector<8x64xf32> to vector<8x32xf32>
    %830 = vector.extract_strided_slice %796 {offsets = [0, 32], sizes = [8, 32], strides = [1, 1]} : vector<8x64xf32> to vector<8x32xf32>
    %cst_317 = arith.constant dense<0.000000e+00> : vector<64x32xf32>
    %831 = tpu.matmul %826, %827, %cst_317 {dimension_numbers = #tpu.dot_dimension_numbers<[1], [0], [0], [1], [0, 0, 1, 1], [], []>} : vector<64x8xf32>, vector<8x32xf32>, vector<64x32xf32> -> vector<64x32xf32>
    %cst_318 = arith.constant dense<0.000000e+00> : vector<64x32xf32>
    %832 = tpu.matmul %826, %828, %cst_318 {dimension_numbers = #tpu.dot_dimension_numbers<[1], [0], [0], [1], [0, 0, 1, 1], [], []>} : vector<64x8xf32>, vector<8x32xf32>, vector<64x32xf32> -> vector<64x32xf32>
    %cst_319 = arith.constant dense<0.000000e+00> : vector<64x32xf32>
    %833 = tpu.matmul %826, %829, %cst_319 {dimension_numbers = #tpu.dot_dimension_numbers<[1], [0], [0], [1], [0, 0, 1, 1], [], []>} : vector<64x8xf32>, vector<8x32xf32>, vector<64x32xf32> -> vector<64x32xf32>
    %cst_320 = arith.constant dense<0.000000e+00> : vector<64x32xf32>
    %834 = tpu.matmul %826, %830, %cst_320 {dimension_numbers = #tpu.dot_dimension_numbers<[1], [0], [0], [1], [0, 0, 1, 1], [], []>} : vector<64x8xf32>, vector<8x32xf32>, vector<64x32xf32> -> vector<64x32xf32>
    %835 = arith.mulf %805, %831 : vector<64x32xf32>
    %cst_321 = arith.constant dense<0.000000e+00> : vector<64xf32>
    %836 = vector.multi_reduction <add>, %835, %cst_321 [1] : vector<64x32xf32> to vector<64xf32>
    %837 = vector.shape_cast %836 : vector<64xf32> to vector<64x1xf32>
    %838 = arith.mulf %805, %832 : vector<64x32xf32>
    %cst_322 = arith.constant dense<0.000000e+00> : vector<64xf32>
    %839 = vector.multi_reduction <add>, %838, %cst_322 [1] : vector<64x32xf32> to vector<64xf32>
    %840 = vector.shape_cast %839 : vector<64xf32> to vector<64x1xf32>
    %841 = arith.mulf %805, %833 : vector<64x32xf32>
    %cst_323 = arith.constant dense<0.000000e+00> : vector<64xf32>
    %842 = vector.multi_reduction <add>, %841, %cst_323 [1] : vector<64x32xf32> to vector<64xf32>
    %843 = vector.shape_cast %842 : vector<64xf32> to vector<64x1xf32>
    %844 = arith.mulf %805, %834 : vector<64x32xf32>
    %cst_324 = arith.constant dense<0.000000e+00> : vector<64xf32>
    %845 = vector.multi_reduction <add>, %844, %cst_324 [1] : vector<64x32xf32> to vector<64xf32>
    %846 = vector.shape_cast %845 : vector<64xf32> to vector<64x1xf32>
    %847 = arith.maximumf %837, %840 : vector<64x1xf32>
    %848 = arith.maximumf %843, %846 : vector<64x1xf32>
    %849 = arith.maximumf %847, %848 : vector<64x1xf32>
    %850 = arith.subf %837, %849 : vector<64x1xf32>
    %851 = math.exp %850 : vector<64x1xf32>
    %852 = arith.subf %840, %849 : vector<64x1xf32>
    %853 = math.exp %852 : vector<64x1xf32>
    %854 = arith.subf %843, %849 : vector<64x1xf32>
    %855 = math.exp %854 : vector<64x1xf32>
    %856 = arith.subf %846, %849 : vector<64x1xf32>
    %857 = math.exp %856 : vector<64x1xf32>
    %858 = arith.addf %851, %853 : vector<64x1xf32>
    %859 = arith.addf %858, %855 : vector<64x1xf32>
    %860 = arith.addf %859, %857 : vector<64x1xf32>
    %861 = tpu.reciprocal %860 {approx = true} : vector<64x1xf32> -> vector<64x1xf32>
    %862 = vector.broadcast %851 : vector<64x1xf32> to vector<64x32xf32>
    %863 = arith.mulf %862, %831 : vector<64x32xf32>
    %864 = vector.broadcast %853 : vector<64x1xf32> to vector<64x32xf32>
    %865 = arith.mulf %864, %832 : vector<64x32xf32>
    %866 = arith.addf %863, %865 : vector<64x32xf32>
    %867 = vector.broadcast %855 : vector<64x1xf32> to vector<64x32xf32>
    %868 = arith.mulf %867, %833 : vector<64x32xf32>
    %869 = arith.addf %866, %868 : vector<64x32xf32>
    %870 = vector.broadcast %857 : vector<64x1xf32> to vector<64x32xf32>
    %871 = arith.mulf %870, %834 : vector<64x32xf32>
    %872 = arith.addf %869, %871 : vector<64x32xf32>
    %873 = vector.broadcast %861 : vector<64x1xf32> to vector<64x32xf32>
    %874 = arith.mulf %872, %873 : vector<64x32xf32>
    %c0_325 = arith.constant 0 : index
    %c0_326 = arith.constant 0 : index
    %875 = vector.load %arg14[%c0_325, %c0_326] : memref<32x32xf32, #tpu.memory_space<vmem>>, vector<32x32xf32>
    %cst_327 = arith.constant dense<0.000000e+00> : vector<64x32xf32>
    %876 = tpu.matmul %874, %875, %cst_327 {dimension_numbers = #tpu.dot_dimension_numbers<[1], [0], [0], [1], [0, 0, 1, 1], [], []>} : vector<64x32xf32>, vector<32x32xf32>, vector<64x32xf32> -> vector<64x32xf32>
    %c0_328 = arith.constant 0 : index
    %c0_329 = arith.constant 0 : index
    %877 = vector.load %arg15[%c0_328, %c0_329] : memref<32x32xf32, #tpu.memory_space<vmem>>, vector<32x32xf32>
    %cst_330 = arith.constant dense<0.000000e+00> : vector<64x32xf32>
    %878 = tpu.matmul %805, %877, %cst_330 {dimension_numbers = #tpu.dot_dimension_numbers<[1], [0], [0], [1], [0, 0, 1, 1], [], []>} : vector<64x32xf32>, vector<32x32xf32>, vector<64x32xf32> -> vector<64x32xf32>
    %879 = arith.addf %876, %878 : vector<64x32xf32>
    %880 = math.tanh %879 : vector<64x32xf32>
    %c0_331 = arith.constant 0 : index
    %c0_332 = arith.constant 0 : index
    %881 = vector.load %arg16[%c0_331, %c0_332] : memref<32x2xf32, #tpu.memory_space<vmem>>, vector<32x2xf32>
    %cst_333 = arith.constant dense<0.000000e+00> : vector<64x2xf32>
    %882 = tpu.matmul %880, %881, %cst_333 {dimension_numbers = #tpu.dot_dimension_numbers<[1], [0], [0], [1], [0, 0, 1, 1], [], []>} : vector<64x32xf32>, vector<32x2xf32>, vector<64x2xf32> -> vector<64x2xf32>
    %c0_334 = arith.constant 0 : index
    %c0_335 = arith.constant 0 : index
    %883 = vector.load %arg17[%c0_334, %c0_335] : memref<1x2xf32, #tpu.memory_space<vmem>>, vector<1x2xf32>
    %884 = vector.broadcast %883 : vector<1x2xf32> to vector<64x2xf32>
    %885 = arith.addf %882, %884 : vector<64x2xf32>
    %886 = arith.negf %885 : vector<64x2xf32>
    %887 = math.exp %886 : vector<64x2xf32>
    %cst_336 = arith.constant 1.000000e+00 : f32
    %888 = vector.broadcast %cst_336 : f32 to vector<64x2xf32>
    %889 = arith.addf %888, %887 : vector<64x2xf32>
    %890 = arith.divf %888, %889 : vector<64x2xf32>
    %c0_337 = arith.constant 0 : index
    %c0_338 = arith.constant 0 : index
    %891 = vector.load %arg18[%c0_337, %c0_338] : memref<64x2xf32, #tpu.memory_space<vmem>>, vector<64x2xf32>
    tpu.vector_store %arg18[%c0_337, %c0_338], %890 {strides = array<i32>} : memref<64x2xf32, #tpu.memory_space<vmem>>, vector<64x2xf32>,
    return
  }
}

</mosaic_0001>

<bundles_post_ra>
// kernel: model_forward.1
= control target key start
LH: loop header
LB: loop body
LE: loop exit
PB: predicated region body
PF: predicated region fallthrough
CT: control target
= control target key end

     0   :  { %vm8943_vm0 = vcmask 130048   ;;  %v67_v16 = vlaneseq  ;;  %vm8980_vm2 = vcmask 7168   ;;  %s8921_s0 = inlined_call_operand.vmem [shape: f32[64,16], index: 0, kind: input, shape index: {}]   ;;  %s8922_s3 = inlined_call_operand.vmem [shape: f32[16,256], index: 3, kind: input, shape index: {}]   ;;  %s8923_s4 = inlined_call_operand.vmem [shape: f32[16,256], index: 4, kind: input, shape index: {}]   ;;  %s8924_s1 = inlined_call_operand.vmem [shape: f32[64,16], index: 1, kind: input, shape index: {}]   ;;  %s8925_s2 = inlined_call_operand.vmem [shape: f32[64,16], index: 2, kind: input, shape index: {}]   ;;  %s8926_s6 = inlined_call_operand.vmem [shape: f32[64,256], index: 6, kind: input, shape index: {}]   ;;  %s8927_s5 = inlined_call_operand.vmem [shape: f32[1,256], index: 5, kind: input, shape index: {}]   ;;  %s8928_s8 = inlined_call_operand.vmem [shape: f32[32,256], index: 8, kind: input, shape index: {}]   ;;  %s8929_s7 = inlined_call_operand.vmem [shape: f32[32,256], index: 7, kind: input, shape index: {}]   ;;  %s8930_s13 = inlined_call_operand.vmem [shape: f32[32,32], index: 13, kind: input, shape index: {}]   ;;  %s8931_s10 = inlined_call_operand.vmem [shape: f32[32,256], index: 10, kind: input, shape index: {}]   ;;  %s8932_s9 = inlined_call_operand.vmem [shape: f32[32,256], index: 9, kind: input, shape index: {}]   ;;  %s8933_s12 = inlined_call_operand.vmem [shape: f32[64,256], index: 12, kind: input, shape index: {}]   ;;  %s8934_s11 = inlined_call_operand.vmem [shape: f32[1,256], index: 11, kind: input, shape index: {}]   ;;  %s8935_s15 = inlined_call_operand.vmem [shape: f32[32,32], index: 15, kind: input, shape index: {}]   ;;  %s8936_s14 = inlined_call_operand.vmem [shape: f32[32,32], index: 14, kind: input, shape index: {}]   ;;  %s8937_s16 = inlined_call_operand.vmem [shape: f32[32,2], index: 16, kind: input, shape index: {}]   ;;  %s8938_s17 = inlined_call_operand.vmem [shape: f32[1,2], index: 17, kind: input, shape index: {}]   ;;  %s8939_s18 = inlined_call_operand.vmem [shape: f32[64,2], index: 18, kind: output, shape index: {}]  }
   0x1   :  { %8995 = sst [smem:[#allocation15_spill]] %s8921_s0 }
   0x2   :  { %8996 = sst [smem:[#allocation16_spill]] %s8922_s3  ;;  %s8998_s29 = sld [smem:[#allocation15_spill]]  ;;  %v6661_v17 = vshrl.u32 %v67_v16, 7 }
   0x3   :  { %8997 = sst [smem:[#allocation17_spill]] %s8923_s4 }
   0x4   :  { %v69_v18 = vadd.s32 8, %v6661_v17  ;;  %v70_v19 = vadd.s32 16, %v6661_v17  ;;  %v71_v20 = vadd.s32 24, %v6661_v17  ;;  %v6667_v21 = vand.u32 7, %v6661_v17 }
   0x5   :  { %v72_v22 = vadd.s32 32, %v6661_v17  ;;  %v73_v25 = vadd.s32 40, %v6661_v17  ;;  %v74_v26 = vadd.s32 48, %v6661_v17  ;;  %v75_v27 = vadd.s32 56, %v6661_v17 }
   0x6   :  { %v6670_v23 = vand.u32 7, %v69_v18  ;;  %v6672_v24 = vand.u32 7, %v70_v19  ;;  %v6677_v28 = vand.u32 7, %v71_v20  ;;  %vm8944_vm1 = vcmp.eq.s32.totalorder %v6667_v21, 1 }
   0x7   :  { %v6680_v29 = vand.u32 7, %v72_v22  ;;  %vm8946_vm3 = vcmp.eq.s32.totalorder %v6667_v21, 0  ;;  %vm8949_vm4 = vcmp.eq.s32.totalorder %v6667_v21, 3  ;;  %v6688_v30 = vand.u32 7, %v73_v25 }
   0x8   :  { %v6607_v0 = vld [vmem:[%s8998_s29] sm:$0xff]  ;;  %v6612_v1 = vld [vmem:[%s8998_s29 + $0x10] sm:$0xff]  ;;  %v6617_v2 = vld [vmem:[%s8998_s29 + $0x8] sm:$0xff]  ;;  %vm8951_vm5 = vcmp.eq.s32.totalorder %v6670_v23, 1  ;;  %vm8945_vm6 = vcmp.eq.s32.totalorder %v6672_v24, 1  ;;  %vm8953_vm7 = vcmp.eq.s32.totalorder %v6670_v23, 0 }
   0x9   :  { %v173_v3 = vsel %vm8943_vm0, %v6607_v0, 0.0  ;;  %v179_v4 = vsel %vm8943_vm0, %v6612_v1, 0.0  ;;  %v6626_v5 = vld [vmem:[%s8998_s29 + $0x18] sm:$0xff]  ;;  %v176_v6 = vsel %vm8943_vm0, %v6617_v2, 0.0  ;;  %v6635_v8 = vld [vmem:[%s8998_s29 + $0x20] sm:$0xff]  ;;  %v6640_v9 = vld [vmem:[%s8998_s29 + $0x28] sm:$0xff] }
   0xa   :  { %174 = vadd.xlane.f32.xlu0 %v173_v3  ;;  %180 = vadd.xlane.f32.xlu1 %v179_v4  ;;  %v182_v7 = vsel %vm8943_vm0, %v6626_v5, 0.0  ;;  %v185_v10 = vsel %vm8943_vm0, %v6635_v8, 0.0  ;;  %v188_v11 = vsel %vm8943_vm0, %v6640_v9, 0.0  ;;  %v6649_v12 = vld [vmem:[%s8998_s29 + $0x30] sm:$0xff]  ;;  %v6654_v13 = vld [vmem:[%s8998_s29 + $0x38] sm:$0xff]  ;;  %vm8947_vm8 = vcmp.eq.s32.totalorder %v6672_v24, 0 }
   0xb   :  { %v191_v14 = vsel %vm8943_vm0, %v6649_v12, 0.0  ;;  %v194_v15 = vsel %vm8943_vm0, %v6654_v13, 0.0  ;;  %v6690_v31 = vand.u32 7, %v74_v26  ;;  %vm8948_vm10 = vcmp.eq.s32.totalorder %v6672_v24, 3 }
   0xc   :  { %v6694_v32 = vand.u32 7, %v75_v27  ;;  %vm8950_vm11 = vcmp.eq.s32.totalorder %v6677_v28, 1  ;;  %vm8952_vm12 = vcmp.eq.s32.totalorder %v6677_v28, 0  ;;  %vm8954_vm13 = vcmp.eq.s32.totalorder %v6667_v21, 2 }
   0xd   :  { %vm8955_vm0 = vcmp.eq.s32.totalorder %v6688_v30, 1  ;;  %vm8959_vm15 = vcmp.eq.s32.totalorder %v6690_v31, 1  ;;  %vm8956_vm14 = vcmp.eq.s32.totalorder %v6688_v30, 0 }
   0xe   :  { %177 = vadd.xlane.f32.xlu0 %v176_v6  ;;  %183 = vadd.xlane.f32.xlu1 %v182_v7  ;;  %vm8957_vm9 = vcmp.eq.s32.totalorder %v6694_v32, 1 }
  0x12   :  { %186 = vadd.xlane.f32.xlu0 %v185_v10  ;;  %189 = vadd.xlane.f32.xlu1 %v188_v11 }
  0x16   :  { %192 = vadd.xlane.f32.xlu0 %v191_v14  ;;  %195 = vadd.xlane.f32.xlu1 %v194_v15 }
  0x97   :  { %v6699_v33 = vpop.xlane.xlu0 %174  ;;  %v6701_v34 = vpop.xlane.xlu1 %180 }
  0x98   :  { %v258_v35 = vsel %vm8944_vm1, %v6699_v33, 0.0  ;;  %v260_v36 = vsel %vm8945_vm6, %v6701_v34, 0.0  ;;  %v205_v37 = vsel %vm8946_vm3, %v6699_v33, 0.0  ;;  %v207_v38 = vsel %vm8947_vm8, %v6701_v34, 0.0 }
  0x99   :  { %vm8963_vm1 = vcmp.eq.s32.totalorder %v6690_v31, 0  ;;  %v266_v39 = vsel %vm8980_vm2, %v258_v35, 0.0  ;;  %v269_v40 = vsel %vm8980_vm2, %v260_v36, 0.0  ;;  %vm8961_vm6 = vcmp.eq.s32.totalorder %v6694_v32, 0 }
  0x9a   :  { %vm8958_vm3 = vcmp.eq.s32.totalorder %v6680_v29, 3  ;;  %v214_v43 = vsel %vm8980_vm2, %v205_v37, 0.0  ;;  %v217_v44 = vsel %vm8980_vm2, %v207_v38, 0.0  ;;  %v362_v45 = vsel %vm8949_vm4, %v6699_v33, 0.0 }
  0x9b   :  { %v6728_v41 = vpop.xlane.xlu0 %177  ;;  %v6730_v42 = vpop.xlane.xlu1 %183  ;;  %v364_v46 = vsel %vm8948_vm10, %v6701_v34, 0.0  ;;  %vm8960_vm8 = vcmp.eq.s32.totalorder %v6670_v23, 2  ;;  %vm8962_vm10 = vcmp.eq.s32.totalorder %v6688_v30, 3  ;;  %vm8964_vm4 = vcmp.eq.s32.totalorder %v6677_v28, 2 }
  0x9c   :  { %v259_v47 = vsel %vm8951_vm5, %v6728_v41, 0.0  ;;  %v261_v48 = vsel %vm8950_vm11, %v6730_v42, 0.0  ;;  %v206_v49 = vsel %vm8953_vm7, %v6728_v41, 0.0  ;;  %v208_v50 = vsel %vm8952_vm12, %v6730_v42, 0.0 }
  0x9d   :  { %v267_v51 = vsel %vm8980_vm2, %v259_v47, 0.0  ;;  %v215_v52 = vsel %vm8980_vm2, %v206_v49, 0.0  ;;  %v310_v53 = vsel %vm8954_vm13, %v6699_v33, 0.0  ;;  %vm8999_vm11 = vcmp.eq.s32.totalorder %v6672_v24, 2 }
  0x9e   :  { %v312_v54 = vsel %vm8999_vm11, %v6701_v34, 0.0  ;;  %v268_v55 = vadd.f32 %v267_v51, %v266_v39  ;;  %v216_v56 = vadd.f32 %v215_v52, %v214_v43  ;;  %vm8965_vm5 = vcmp.eq.s32.totalorder %v6690_v31, 3 }
  0x9f   :  { %vm9000_vm7 = vcmp.eq.s32.totalorder %v6670_v23, 3  ;;  %v370_v58 = vsel %vm8980_vm2, %v362_v45, 0.0  ;;  %v6769_v59 = vpop.xlane.xlu0 %186  ;;  %v6771_v60 = vpop.xlane.xlu1 %189  ;;  %v271_v61 = vsel %vm8980_vm2, %v261_v48, 0.0  ;;  %v219_v62 = vsel %vm8980_vm2, %v208_v50, 0.0 }
  0xa0   :  { %v363_v57 = vsel %vm9000_vm7, %v6728_v41, 0.0  ;;  %v373_v3 = vsel %vm8980_vm2, %v364_v46, 0.0  ;;  %vm9001_vm13 = vcmp.eq.s32.totalorder %v6680_v29, 1  ;;  %v263_v6 = vsel %vm8955_vm0, %v6771_v60, 0.0 }
  0xa1   :  { %v371_v63 = vsel %vm8980_vm2, %v363_v57, 0.0  ;;  %v262_v4 = vsel %vm9001_vm13, %v6769_v59, 0.0  ;;  %v270_v7 = vadd.f32 %v269_v40, %v268_v55  ;;  %vm9002_vm7 = vcmp.eq.s32.totalorder %v6680_v29, 0 }
  0xa2   :  { %v209_v10 = vsel %vm9002_vm7, %v6769_v59, 0.0  ;;  %vm8967_vm12 = vcmp.eq.s32.totalorder %v6688_v30, 2  ;;  %v273_v11 = vsel %vm8980_vm2, %v262_v4, 0.0  ;;  %v210_v14 = vsel %vm8956_vm14, %v6771_v60, 0.0 }
  0xa3   :  { %v218_v15 = vadd.f32 %v217_v44, %v216_v56  ;;  %vm8966_vm13 = vcmp.eq.s32.totalorder %v6690_v31, 2  ;;  %vm8968_vm11 = vcmp.eq.s32.totalorder %v6694_v32, 2  ;;  %v318_v18 = vsel %vm8980_vm2, %v310_v53, 0.0  ;;  %v6802_v26 = vpop.xlane.xlu0 %192  ;;  %v6804_v27 = vpop.xlane.xlu1 %195 }
  0xa4   :  { %v272_v19 = vadd.f32 %v271_v61, %v270_v7  ;;  %v221_v20 = vsel %vm8980_vm2, %v209_v10, 0.0  ;;  %vm9003_vm7 = vcmp.eq.s32.totalorder %v6677_v28, 3  ;;  %v321_v25 = vsel %vm8980_vm2, %v312_v54, 0.0 }
  0xa5   :  { %v365_v22 = vsel %vm9003_vm7, %v6730_v42, 0.0  ;;  %vm8969_vm0 = vcmp.eq.s32.totalorder %v6667_v21, 5  ;;  %v275_v35 = vsel %vm8980_vm2, %v263_v6, 0.0  ;;  %v220_v36 = vadd.f32 %v219_v62, %v218_v15 }
  0xa6   :  { %v223_v37 = vsel %vm8980_vm2, %v210_v14, 0.0  ;;  %v372_v38 = vadd.f32 %v371_v63, %v370_v58  ;;  %v264_v39 = vsel %vm8959_vm15, %v6802_v26, 0.0  ;;  %v265_v40 = vsel %vm8957_vm9, %v6804_v27, 0.0 }
  0xa7   :  { %v274_v43 = vadd.f32 %v273_v11, %v272_v19  ;;  %v211_v44 = vsel %vm8963_vm1, %v6802_v26, 0.0  ;;  %vm8970_vm7 = vcmp.eq.s32.totalorder %v6672_v24, 5  ;;  %vm8971_vm14 = vcmp.eq.s32.totalorder %v6677_v28, 5 }
  0xa8   :  { %v277_v45 = vsel %vm8980_vm2, %v264_v39, 0.0  ;;  %v212_v46 = vsel %vm8961_vm6, %v6804_v27, 0.0  ;;  %v222_v47 = vadd.f32 %v221_v20, %v220_v36  ;;  %v366_v48 = vsel %vm8958_vm3, %v6769_v59, 0.0 }
  0xa9   :  { %v276_v49 = vadd.f32 %v275_v35, %v274_v43  ;;  %v225_v50 = vsel %vm8980_vm2, %v211_v44, 0.0  ;;  %v375_v51 = vsel %vm8980_vm2, %v365_v22, 0.0  ;;  %v311_v52 = vsel %vm8960_vm8, %v6728_v41, 0.0 }
  0xaa   :  { %vm8972_vm9 = vcmp.eq.s32.totalorder %v6680_v29, 5  ;;  %v279_v53 = vsel %vm8980_vm2, %v265_v40, 0.0  ;;  %v224_v54 = vadd.f32 %v223_v37, %v222_v47  ;;  %v367_v55 = vsel %vm8962_vm10, %v6771_v60, 0.0 }
  0xab   :  { %v374_v56 = vadd.f32 %v373_v3, %v372_v38  ;;  %vm8973_vm3 = vcmp.eq.s32.totalorder %v6667_v21, 4  ;;  %v278_v57 = vadd.f32 %v277_v45, %v276_v49  ;;  %v227_v58 = vsel %vm8980_vm2, %v212_v46, 0.0 }
  0xac   :  { %v377_v61 = vsel %vm8980_vm2, %v366_v48, 0.0  ;;  %v313_v62 = vsel %vm8964_vm4, %v6730_v42, 0.0  ;;  %vm8975_vm8 = vcmp.eq.s32.totalorder %v6688_v30, 5  ;;  %v226_v63 = vadd.f32 %v225_v50, %v224_v54 }
  0xad   :  { %v368_v3 = vsel %vm8965_vm5, %v6802_v26, 0.0  ;;  %vm9004_vm10 = vcmp.eq.s32.totalorder %v6694_v32, 3  ;;  %v376_v6 = vadd.f32 %v375_v51, %v374_v56  ;;  %vm8974_vm1 = vcmp.eq.s32.totalorder %v6694_v32, 5 }
  0xae   :  { %v369_v4 = vsel %vm9004_vm10, %v6804_v27, 0.0  ;;  %vm8976_vm15 = vcmp.eq.s32.totalorder %v6672_v24, 4  ;;  %vm409_vm4 = vcmp.eq.s32.totalorder %v6677_v28, 4  ;;  %v280_v7 = vadd.f32 %v279_v53, %v278_v57 }
  0xaf   :  { %v379_v10 = vsel %vm8980_vm2, %v367_v55, 0.0  ;;  %vm9005_vm6 = vcmp.eq.s32.totalorder %v6680_v29, 2  ;;  %v319_v14 = vsel %vm8980_vm2, %v311_v52, 0.0  ;;  %v228_v15 = vadd.f32 %v227_v58, %v226_v63 }
  0xb0   :  { %v314_v11 = vsel %vm9005_vm6, %v6769_v59, 0.0  ;;  %v378_v19 = vadd.f32 %v377_v61, %v376_v6  ;;  %v315_v20 = vsel %vm8967_vm12, %v6771_v60, 0.0  ;;  %v320_v22 = vadd.f32 %v319_v14, %v318_v18  ;;  %281 = vadd.xlane.f32.xlu1 %v280_v7 }
  0xb1   :  { %vm8977_vm10 = vcmp.eq.s32.totalorder %v6680_v29, 4  ;;  %v381_v35 = vsel %vm8980_vm2, %v368_v3, 0.0  ;;  %v316_v36 = vsel %vm8966_vm13, %v6802_v26, 0.0  ;;  %v317_v37 = vsel %vm8968_vm11, %v6804_v27, 0.0  ;;  %229 = vadd.xlane.f32.xlu0 %v228_v15 }
  0xb2   :  { %v323_v38 = vsel %vm8980_vm2, %v313_v62, 0.0  ;;  %v380_v39 = vadd.f32 %v379_v10, %v378_v19  ;;  %v322_v40 = vadd.f32 %v321_v25, %v320_v22  ;;  %v466_v18 = vsel %vm8969_vm0, %v6699_v33, 0.0 }
  0xb3   :  { %vm9006_vm6 = vcmp.eq.s32.totalorder %v6670_v23, 5  ;;  %vm411_vm5 = vcmp.eq.s32.totalorder %v6688_v30, 4  ;;  %vm8978_vm13 = vcmp.eq.s32.totalorder %v6667_v21, 7  ;;  %v383_v44 = vsel %vm8980_vm2, %v369_v4, 0.0 }
  0xb4   :  { %v467_v43 = vsel %vm9006_vm6, %v6728_v41, 0.0  ;;  %v325_v45 = vsel %vm8980_vm2, %v314_v11, 0.0  ;;  %v327_v25 = vsel %vm8980_vm2, %v315_v20, 0.0  ;;  %vm412_vm11 = vcmp.eq.s32.totalorder %v6690_v31, 4 }
  0xb5   :  { %v382_v46 = vadd.f32 %v381_v35, %v380_v39  ;;  %v324_v47 = vadd.f32 %v323_v38, %v322_v40  ;;  %v468_v48 = vsel %vm8970_vm7, %v6701_v34, 0.0  ;;  %v469_v49 = vsel %vm8971_vm14, %v6730_v42, 0.0 }
  0xb6   :  { %vm413_vm6 = vcmp.eq.s32.totalorder %v6694_v32, 4  ;;  %vm564_vm0 = vcmp.eq.s32.totalorder %v6672_v24, 7  ;;  %v329_v50 = vsel %vm8980_vm2, %v316_v36, 0.0  ;;  %v331_v51 = vsel %vm8980_vm2, %v317_v37, 0.0 }
  0xb7   :  { %v474_v52 = vsel %vm8980_vm2, %v466_v18, 0.0  ;;  %v475_v53 = vsel %vm8980_vm2, %v467_v43, 0.0  ;;  %v384_v54 = vadd.f32 %v383_v44, %v382_v46  ;;  %v326_v55 = vadd.f32 %v325_v45, %v324_v47 }
  0xb8   :  { %v470_v56 = vsel %vm8972_vm9, %v6769_v59, 0.0  ;;  %v476_v57 = vadd.f32 %v475_v53, %v474_v52  ;;  %v477_v58 = vsel %vm8980_vm2, %v468_v48, 0.0  ;;  %v479_v61 = vsel %vm8980_vm2, %v469_v49, 0.0 }
  0xb9   :  { %v414_v62 = vsel %vm8973_vm3, %v6699_v33, 0.0  ;;  %vm9007_vm14 = vcmp.eq.s32.totalorder %v6670_v23, 4  ;;  %vm8984_vm12 = vcmp.eq.s32.totalorder %v6688_v30, 7  ;;  %385 = vadd.xlane.f32.xlu1 %v384_v54  ;;  %v328_v3 = vadd.f32 %v327_v25, %v326_v55 }
  0xba   :  { %v415_v63 = vsel %vm9007_vm14, %v6728_v41, 0.0  ;;  %v471_v4 = vsel %vm8975_vm8, %v6771_v60, 0.0  ;;  %vm9008_vm9 = vcmp.eq.s32.totalorder %v6690_v31, 5  ;;  %v478_v7 = vadd.f32 %v477_v58, %v476_v57 }
  0xbb   :  { %v472_v6 = vsel %vm9008_vm9, %v6802_v26, 0.0  ;;  %vm510_vm7 = vcmp.eq.s32.totalorder %v6667_v21, 6  ;;  %vm511_vm3 = vcmp.eq.s32.totalorder %v6670_v23, 6  ;;  %v473_v10 = vsel %vm8974_vm1, %v6804_v27, 0.0 }
  0xbc   :  { %v481_v11 = vsel %vm8980_vm2, %v470_v56, 0.0  ;;  %v416_v14 = vsel %vm8976_vm15, %v6701_v34, 0.0  ;;  %v417_v15 = vsel %vm409_vm4, %v6730_v42, 0.0  ;;  %vm8979_vm9 = vcmp.eq.s32.totalorder %v6690_v31, 7 }
  0xbd   :  { %v330_v19 = vadd.f32 %v329_v50, %v328_v3  ;;  %v480_v20 = vadd.f32 %v479_v61, %v478_v7  ;;  %v422_v22 = vsel %vm8980_vm2, %v414_v62, 0.0  ;;  %v423_v35 = vsel %vm8980_vm2, %v415_v63, 0.0 }
  0xbe   :  { %vm512_vm14 = vcmp.eq.s32.totalorder %v6672_v24, 6  ;;  %vm8987_vm1 = vcmp.eq.s32.totalorder %v6677_v28, 6  ;;  %v483_v36 = vsel %vm8980_vm2, %v471_v4, 0.0  ;;  %v485_v37 = vsel %vm8980_vm2, %v472_v6, 0.0 }
  0xbf   :  { %v418_v38 = vsel %vm8977_vm10, %v6769_v59, 0.0  ;;  %v424_v39 = vadd.f32 %v423_v35, %v422_v22  ;;  %vm8982_vm8 = vcmp.eq.s32.totalorder %v6694_v32, 7  ;;  %v332_v40 = vadd.f32 %v331_v51, %v330_v19 }
  0xc0   :  { %v482_v18 = vadd.f32 %v481_v11, %v480_v20  ;;  %v425_v43 = vsel %vm8980_vm2, %v416_v14, 0.0  ;;  %v427_v44 = vsel %vm8980_vm2, %v417_v15, 0.0  ;;  %vm8985_vm15 = vcmp.eq.s32.totalorder %v6680_v29, 6 }
  0xc1   :  { %v419_v45 = vsel %vm411_vm5, %v6771_v60, 0.0  ;;  %v426_v25 = vadd.f32 %v425_v43, %v424_v39  ;;  %v570_v46 = vsel %vm8978_vm13, %v6699_v33, 0.0  ;;  %vm9009_vm10 = vcmp.eq.s32.totalorder %v6670_v23, 7  ;;  %333 = vadd.xlane.f32.xlu0 %v332_v40 }
  0xc2   :  { %v571_v47 = vsel %vm9009_vm10, %v6728_v41, 0.0  ;;  %v484_v48 = vadd.f32 %v483_v36, %v482_v18  ;;  %v487_v49 = vsel %vm8980_vm2, %v473_v10, 0.0  ;;  %v420_v50 = vsel %vm412_vm11, %v6802_v26, 0.0 }
  0xc3   :  { %v429_v51 = vsel %vm8980_vm2, %v418_v38, 0.0  ;;  %v421_v52 = vsel %vm413_vm6, %v6804_v27, 0.0  ;;  %v428_v53 = vadd.f32 %v427_v44, %v426_v25  ;;  %v572_v54 = vsel %vm564_vm0, %v6701_v34, 0.0 }
  0xc4   :  { %vm9010_vm10 = vcmp.eq.s32.totalorder %v6677_v28, 7  ;;  %v486_v56 = vadd.f32 %v485_v37, %v484_v48  ;;  %v431_v57 = vsel %vm8980_vm2, %v419_v45, 0.0  ;;  %v578_v58 = vsel %vm8980_vm2, %v570_v46, 0.0 }
  0xc5   :  { %v573_v55 = vsel %vm9010_vm10, %v6730_v42, 0.0  ;;  %v579_v61 = vsel %vm8980_vm2, %v571_v47, 0.0  ;;  %v430_v62 = vadd.f32 %v429_v51, %v428_v53  ;;  %v433_v63 = vsel %vm8980_vm2, %v420_v50, 0.0 }
  0xc6   :  { %vm9011_vm13 = vcmp.eq.s32.totalorder %v6680_v29, 7  ;;  %v580_v4 = vadd.f32 %v579_v61, %v578_v58  ;;  %v488_v6 = vadd.f32 %v487_v49, %v486_v56  ;;  %v575_v7 = vsel %vm8984_vm12, %v6771_v60, 0.0 }
  0xc7   :  { %v574_v3 = vsel %vm9011_vm13, %v6769_v59, 0.0  ;;  %v581_v10 = vsel %vm8980_vm2, %v572_v54, 0.0  ;;  %v583_v11 = vsel %vm8980_vm2, %v573_v55, 0.0  ;;  %v432_v14 = vadd.f32 %v431_v57, %v430_v62 }
  0xc8   :  { %v582_v15 = vadd.f32 %v581_v10, %v580_v4  ;;  %v518_v19 = vsel %vm510_vm7, %v6699_v33, 0.0  ;;  %v519_v20 = vsel %vm511_vm3, %v6728_v41, 0.0  ;;  %489 = vadd.xlane.f32.xlu1 %v488_v6  ;;  %v435_v22 = vsel %vm8980_vm2, %v421_v52, 0.0 }
  0xc9   :  { %v576_v35 = vsel %vm8979_vm9, %v6802_v26, 0.0  ;;  %v585_v36 = vsel %vm8980_vm2, %v574_v3, 0.0  ;;  %vm8986_vm13 = vcmp.eq.s32.totalorder %v6688_v30, 6  ;;  %v434_v37 = vadd.f32 %v433_v63, %v432_v14 }
  0xca   :  { %v584_v38 = vadd.f32 %v583_v11, %v582_v15  ;;  %v520_v33 = vsel %vm512_vm14, %v6701_v34, 0.0  ;;  %v521_v41 = vsel %vm8987_vm1, %v6730_v42, 0.0  ;;  %v577_v39 = vsel %vm8982_vm8, %v6804_v27, 0.0 }
  0xcb   :  { %v587_v40 = vsel %vm8980_vm2, %v575_v7, 0.0  ;;  %v526_v18 = vsel %vm8980_vm2, %v518_v19, 0.0  ;;  %v527_v43 = vsel %vm8980_vm2, %v519_v20, 0.0  ;;  %v436_v44 = vadd.f32 %v435_v22, %v434_v37 }
  0xcc   :  { %v586_v45 = vadd.f32 %v585_v36, %v584_v38  ;;  %v522_v34 = vsel %vm8985_vm15, %v6769_v59, 0.0  ;;  %v528_v25 = vadd.f32 %v527_v43, %v526_v18  ;;  %v589_v46 = vsel %vm8980_vm2, %v576_v35, 0.0 }
  0xcd   :  { %vm8981_vm10 = vcmp.eq.s32.totalorder %v6690_v31, 6  ;;  %v529_v42 = vsel %vm8980_vm2, %v520_v33, 0.0  ;;  %v531_v47 = vsel %vm8980_vm2, %v521_v41, 0.0  ;;  %437 = vadd.xlane.f32.xlu0 %v436_v44  ;;  %v523_v49 = vsel %vm8986_vm13, %v6771_v60, 0.0 }
  0xce   :  { %v588_v48 = vadd.f32 %v587_v40, %v586_v45  ;;  %v530_v50 = vadd.f32 %v529_v42, %v528_v25  ;;  %v591_v51 = vsel %vm8980_vm2, %v577_v39, 0.0  ;;  %vm8983_vm9 = vcmp.eq.s32.totalorder %v6694_v32, 6 }
  0xcf   :  { %v533_v59 = vsel %vm8980_vm2, %v522_v34, 0.0  ;;  %v524_v53 = vsel %vm8981_vm10, %v6802_v26, 0.0  ;;  %v535_v55 = vsel %vm8980_vm2, %v523_v49, 0.0  ;;  %v525_v60 = vsel %vm8983_vm9, %v6804_v27, 0.0 }
  0xd0   :  { %v590_v52 = vadd.f32 %v589_v46, %v588_v48  ;;  %v532_v54 = vadd.f32 %v531_v47, %v530_v50  ;;  %v537_v58 = vsel %vm8980_vm2, %v524_v53, 0.0  ;;  %v539_v62 = vsel %vm8980_vm2, %v525_v60, 0.0 }
  0xd1   :  { %vm9012_vm2 = vcmp.eq.s32.totalorder %v6667_v21, 0  ;;  %vm9013_vm10 = vcmp.eq.s32.totalorder %v6670_v23, 0  ;;  %vm9014_vm8 = vcmp.eq.s32.totalorder %v6672_v24, 0  ;;  %vm9015_vm9 = vcmp.eq.s32.totalorder %v6677_v28, 0 }
  0xd2   :  { %v592_v56 = vadd.f32 %v591_v51, %v590_v52  ;;  %v534_v57 = vadd.f32 %v533_v59, %v532_v54  ;;  %vm9016_vm12 = vcmp.eq.s32.totalorder %v6680_v29, 0  ;;  %vm9017_vm15 = vcmp.eq.s32.totalorder %v6688_v30, 0 }
  0xd3   :  { %vm9022_vm13 = vcmp.eq.s32.totalorder %v6672_v24, 1 }
  0xd4   :  { %593 = vadd.xlane.f32.xlu1 %v592_v56  ;;  %v536_v61 = vadd.f32 %v535_v55, %v534_v57 }
  0xd6   :  { %v538_v63 = vadd.f32 %v537_v58, %v536_v61 }
  0xd8   :  { %v540_v3 = vadd.f32 %v539_v62, %v538_v63 }
  0xda   :  { %541 = vadd.xlane.f32.xlu0 %v540_v3 }
 0x13d   :  { %v282_v4 = vpop.xlane.xlu1 %281 }
 0x13e   :  { %v283_v26 = vrot.slane %v282_v4, 4  ;;  %v230_v6 = vpop.xlane.xlu0 %229 }
 0x13f   :  { %v231_v7 = vrot.slane %v230_v6, 4 }
 0x140   :  { %v284_v10 = vadd.f32 %v283_v26, %v282_v4 }
 0x141   :  { %v232_v11 = vadd.f32 %v231_v7, %v230_v6 }
 0x142   :  { %v285_v14 = vrot.slane %v284_v10, 2 }
 0x143   :  { %v233_v15 = vrot.slane %v232_v11, 2 }
 0x144   :  { %v286_v27 = vadd.f32 %v285_v14, %v284_v10 }
 0x145   :  { %v234_v22 = vadd.f32 %v233_v15, %v232_v11 }
 0x146   :  { %v386_v19 = vpop.xlane.xlu1 %385  ;;  %v287_v35 = vrot.slane %v286_v27, 1 }
 0x147   :  { %v387_v20 = vrot.slane %v386_v19, 4  ;;  %v235_v37 = vrot.slane %v234_v22, 1 }
 0x148   :  { %v288_v38 = vadd.f32 %v287_v35, %v286_v27 }
 0x149   :  { %v388_v36 = vadd.f32 %v387_v20, %v386_v19  ;;  %v236_v33 = vadd.f32 %v235_v37, %v234_v22 }
 0x14b   :  { %v389_v41 = vrot.slane %v388_v36, 2  ;;  %6119 = vpush %v236_v33 }
 0x14c   :  { %6121 = vpush %v288_v38 }
 0x14d   :  { %v390_v18 = vadd.f32 %v389_v41, %v388_v36 }
 0x14e   :  { %v334_v39 = vpop.xlane.xlu0 %333 }
 0x14f   :  { %v335_v40 = vrot.slane %v334_v39, 4  ;;  %v391_v34 = vrot.slane %v390_v18, 1 }
 0x151   :  { %v336_v43 = vadd.f32 %v335_v40, %v334_v39  ;;  %v392_v48 = vadd.f32 %v391_v34, %v390_v18 }
 0x153   :  { %v337_v44 = vrot.slane %v336_v43, 2 }
 0x155   :  { %v490_v45 = vpop.xlane.xlu1 %489  ;;  %v338_v46 = vadd.f32 %v337_v44, %v336_v43 }
 0x156   :  { %v491_v25 = vrot.slane %v490_v45, 4 }
 0x157   :  { %v339_v47 = vrot.slane %v338_v46, 1 }
 0x158   :  { %v492_v42 = vadd.f32 %v491_v25, %v490_v45 }
 0x159   :  { %v340_v50 = vadd.f32 %v339_v47, %v338_v46 }
 0x15a   :  { %v438_v49 = vpop.xlane.xlu0 %437  ;;  %v493_v51 = vrot.slane %v492_v42, 2 }
 0x15b   :  { %v439_v59 = vrot.slane %v438_v49, 4  ;;  %6123 = vpush %v340_v50 }
 0x15c   :  { %v494_v52 = vadd.f32 %v493_v51, %v492_v42  ;;  %6125 = vpush %v392_v48 }
 0x15d   :  { %v440_v53 = vadd.f32 %v439_v59, %v438_v49 }
 0x15e   :  { %v495_v56 = vrot.slane %v494_v52, 1 }
 0x15f   :  { %v441_v54 = vrot.slane %v440_v53, 2 }
 0x160   :  { %v496_v62 = vadd.f32 %v495_v56, %v494_v52 }
 0x161   :  { %v594_v55 = vpop.xlane.xlu1 %593  ;;  %v442_v57 = vadd.f32 %v441_v54, %v440_v53 }
 0x162   :  { %v595_v60 = vrot.slane %v594_v55, 4 }
 0x163   :  { %v443_v61 = vrot.slane %v442_v57, 1 }
 0x164   :  { %v596_v58 = vadd.f32 %v595_v60, %v594_v55 }
 0x165   :  { %v444_v3 = vadd.f32 %v443_v61, %v442_v57 }
 0x166   :  { %v597_v63 = vrot.slane %v596_v58, 2 }
 0x167   :  { %v542_v4 = vpop.xlane.xlu0 %541  ;;  %6127 = vpush %v444_v3 }
 0x168   :  { %v543_v26 = vrot.slane %v542_v4, 4  ;;  %6129 = vpush %v496_v62  ;;  %v598_v6 = vadd.f32 %v597_v63, %v596_v58 }
 0x16a   :  { %v544_v7 = vadd.f32 %v543_v26, %v542_v4  ;;  %v599_v11 = vrot.slane %v598_v6, 1 }
 0x16c   :  { %v545_v10 = vrot.slane %v544_v7, 2  ;;  %v600_v19 = vadd.f32 %v599_v11, %v598_v6 }
 0x16e   :  { %v546_v14 = vadd.f32 %v545_v10, %v544_v7 }
 0x170   :  { %v547_v15 = vrot.slane %v546_v14, 1 }
 0x172   :  { %v548_v27 = vadd.f32 %v547_v15, %v546_v14 }
 0x174   :  { %6131 = vpush %v548_v27 }
 0x175   :  { %6133 = vpush %v600_v19 }
 0x17c   :  { %s6120_s29 = spop %6119 }
 0x17d   :  { %s240_s30 = smul.f32 0.0078125, %s6120_s29  ;;  %s6122_s0 = spop %6121 }
 0x17e   :  { %s292_s3 = smul.f32 0.0078125, %s6122_s0 }
 0x17f   :  { %v241_v20 = vstv %s240_s30 }
 0x180   :  { %v242_v22 = vsel %vm9012_vm2, %v241_v20, 0.0  ;;  %v243_v35 = vsel %vm9013_vm10, %v241_v20, 0.0  ;;  %v293_v36 = vstv %s292_s3  ;;  %v244_v37 = vsel %vm9014_vm8, %v241_v20, 0.0 }
 0x181   :  { %v245_v38 = vsel %vm9015_vm9, %v241_v20, 0.0  ;;  %v246_v41 = vsel %vm9016_vm12, %v241_v20, 0.0  ;;  %v247_v39 = vsel %vm9017_vm15, %v241_v20, 0.0  ;;  %vm9018_vm2 = vcmp.eq.s32.totalorder %v6690_v31, 0 }
 0x182   :  { %v248_v40 = vsel %vm9018_vm2, %v241_v20, 0.0  ;;  %vm9019_vm10 = vcmp.eq.s32.totalorder %v6694_v32, 0  ;;  %vm9020_vm8 = vcmp.eq.s32.totalorder %v6667_v21, 1  ;;  %vm9021_vm9 = vcmp.eq.s32.totalorder %v6670_v23, 1 }
 0x183   :  { %v249_v18 = vsel %vm9019_vm10, %v241_v20, 0.0  ;;  %v294_v43 = vsel %vm9020_vm8, %v293_v36, %v242_v22  ;;  %v295_v44 = vsel %vm9021_vm9, %v293_v36, %v243_v35  ;;  %v296_v45 = vsel %vm9022_vm13, %v293_v36, %v244_v37 }
 0x184   :  { %vm9023_vm12 = vcmp.eq.s32.totalorder %v6677_v28, 1  ;;  %vm9024_vm15 = vcmp.eq.s32.totalorder %v6670_v23, 2  ;;  %vm9025_vm2 = vcmp.eq.s32.totalorder %v6688_v30, 1  ;;  %vm9026_vm10 = vcmp.eq.s32.totalorder %v6667_v21, 2 }
 0x185   :  { %v297_v34 = vsel %vm9023_vm12, %v293_v36, %v245_v38  ;;  %v299_v42 = vsel %vm9025_vm2, %v293_v36, %v247_v39  ;;  %vm9027_vm8 = vcmp.eq.s32.totalorder %v6677_v28, 2  ;;  %vm9028_vm9 = vcmp.eq.s32.totalorder %v6672_v24, 2 }
 0x186   :  { %vm9029_vm13 = vcmp.eq.s32.totalorder %v6680_v29, 1  ;;  %vm9030_vm12 = vcmp.eq.s32.totalorder %v6688_v30, 2  ;;  %vm9032_vm2 = vcmp.eq.s32.totalorder %v6694_v32, 1 }
 0x187   :  { %v298_v50 = vsel %vm9029_vm13, %v293_v36, %v246_v41  ;;  %v301_v53 = vsel %vm9032_vm2, %v293_v36, %v249_v18  ;;  %vm9036_vm13 = vcmp.eq.s32.totalorder %v6677_v28, 3  ;;  %vm9039_vm2 = vcmp.eq.s32.totalorder %v6670_v23, 4 }
 0x18c   :  { %s6124_s19 = spop %6123 }
 0x18d   :  { %s344_s20 = smul.f32 0.0078125, %s6124_s19  ;;  %s6126_s21 = spop %6125 }
 0x18e   :  { %s396_s4 = smul.f32 0.0078125, %s6126_s21 }
 0x18f   :  { %v345_v33 = vstv %s344_s20 }
 0x190   :  { %v397_v25 = vstv %s396_s4  ;;  %v347_v46 = vsel %vm9024_vm15, %v345_v33, %v295_v44  ;;  %v346_v47 = vsel %vm9026_vm10, %v345_v33, %v294_v43  ;;  %v349_v48 = vsel %vm9027_vm8, %v345_v33, %v297_v34 }
 0x191   :  { %v348_v49 = vsel %vm9028_vm9, %v345_v33, %v296_v45  ;;  %v351_v59 = vsel %vm9030_vm12, %v345_v33, %v299_v42  ;;  %vm9031_vm15 = vcmp.eq.s32.totalorder %v6690_v31, 1  ;;  %vm9033_vm10 = vcmp.eq.s32.totalorder %v6670_v23, 3 }
 0x192   :  { %v300_v52 = vsel %vm9031_vm15, %v293_v36, %v248_v40  ;;  %v399_v54 = vsel %vm9033_vm10, %v397_v25, %v347_v46  ;;  %vm9034_vm8 = vcmp.eq.s32.totalorder %v6680_v29, 2  ;;  %vm9035_vm9 = vcmp.eq.s32.totalorder %v6667_v21, 3 }
 0x193   :  { %v350_v55 = vsel %vm9034_vm8, %v345_v33, %v298_v50  ;;  %v398_v56 = vsel %vm9035_vm9, %v397_v25, %v346_v47  ;;  %v401_v60 = vsel %vm9036_vm13, %v397_v25, %v349_v48  ;;  %vm9037_vm12 = vcmp.eq.s32.totalorder %v6672_v24, 3 }
 0x194   :  { %v400_v57 = vsel %vm9037_vm12, %v397_v25, %v348_v49  ;;  %vm9038_vm15 = vcmp.eq.s32.totalorder %v6694_v32, 2  ;;  %vm9040_vm10 = vcmp.eq.s32.totalorder %v6688_v30, 3  ;;  %vm9041_vm8 = vcmp.eq.s32.totalorder %v6690_v31, 2 }
 0x195   :  { %v353_v58 = vsel %vm9038_vm15, %v345_v33, %v301_v53  ;;  %v403_v63 = vsel %vm9040_vm10, %v397_v25, %v351_v59  ;;  %v352_v3 = vsel %vm9041_vm8, %v345_v33, %v300_v52  ;;  %vm9042_vm9 = vcmp.eq.s32.totalorder %v6667_v21, 4 }
 0x196   :  { %vm9043_vm13 = vcmp.eq.s32.totalorder %v6672_v24, 4  ;;  %vm9044_vm12 = vcmp.eq.s32.totalorder %v6680_v29, 3  ;;  %vm9045_vm15 = vcmp.eq.s32.totalorder %v6680_v29, 4  ;;  %vm9047_vm10 = vcmp.eq.s32.totalorder %v6694_v32, 3 }
 0x197   :  { %v402_v7 = vsel %vm9044_vm12, %v397_v25, %v350_v55  ;;  %v405_v15 = vsel %vm9047_vm10, %v397_v25, %v353_v58  ;;  %vm9048_vm8 = vcmp.eq.s32.totalorder %v6690_v31, 3  ;;  %vm9051_vm12 = vcmp.eq.s32.totalorder %v6672_v24, 5 }
 0x198   :  { %s6128_s22 = spop %6127  ;;  %v404_v19 = vsel %vm9048_vm8, %v397_v25, %v352_v3  ;;  %vm9054_vm10 = vcmp.eq.s32.totalorder %v6670_v23, 7  ;;  %vm9055_vm8 = vcmp.eq.s32.totalorder %v6667_v21, 7 }
 0x199   :  { %s448_s23 = smul.f32 0.0078125, %s6128_s22  ;;  %s6130_s24 = spop %6129 }
 0x19a   :  { %s500_s25 = smul.f32 0.0078125, %s6130_s24 }
 0x19b   :  { %v449_v51 = vstv %s448_s23 }
 0x19c   :  { %v501_v61 = vstv %s500_s25  ;;  %v451_v62 = vsel %vm9039_vm2, %v449_v51, %v399_v54  ;;  %v450_v4 = vsel %vm9042_vm9, %v449_v51, %v398_v56  ;;  %v453_v26 = vsel %vm409_vm4, %v449_v51, %v401_v60 }
 0x19d   :  { %v452_v6 = vsel %vm9043_vm13, %v449_v51, %v400_v57  ;;  %v455_v10 = vsel %vm411_vm5, %v449_v51, %v403_v63  ;;  %v454_v11 = vsel %vm9045_vm15, %v449_v51, %v402_v7  ;;  %vm9046_vm2 = vcmp.eq.s32.totalorder %v6670_v23, 5 }
 0x19e   :  { %v503_v14 = vsel %vm9046_vm2, %v501_v61, %v451_v62  ;;  %vm9049_vm9 = vcmp.eq.s32.totalorder %v6667_v21, 5  ;;  %vm9050_vm13 = vcmp.eq.s32.totalorder %v6677_v28, 5  ;;  %v504_v22 = vsel %vm9051_vm12, %v501_v61, %v452_v6 }
 0x19f   :  { %v502_v27 = vsel %vm9049_vm9, %v501_v61, %v450_v4  ;;  %v505_v20 = vsel %vm9050_vm13, %v501_v61, %v453_v26  ;;  %v457_v35 = vsel %vm413_vm6, %v449_v51, %v405_v15  ;;  %vm9052_vm15 = vcmp.eq.s32.totalorder %v6688_v30, 5 }
 0x1a0   :  { %v507_v37 = vsel %vm9052_vm15, %v501_v61, %v455_v10  ;;  %vm9053_vm2 = vcmp.eq.s32.totalorder %v6680_v29, 5  ;;  %v456_v33 = vsel %vm412_vm11, %v449_v51, %v404_v19  ;;  %vm9056_vm9 = vcmp.eq.s32.totalorder %v6677_v28, 7 }
 0x1a1   :  { %v506_v38 = vsel %vm9053_vm2, %v501_v61, %v454_v11  ;;  %vm9057_vm13 = vcmp.eq.s32.totalorder %v6688_v30, 6  ;;  %vm9058_vm12 = vcmp.eq.s32.totalorder %v6680_v29, 6  ;;  %vm9059_vm15 = vcmp.eq.s32.totalorder %v6694_v32, 5 }
 0x1a2   :  { %vm9060_vm2 = vcmp.eq.s32.totalorder %v6688_v30, 7 }
 0x1a5   :  { %s6132_s26 = spop %6131 }
 0x1a6   :  { %s552_s27 = smul.f32 0.0078125, %s6132_s26  ;;  %s6134_s28 = spop %6133 }
 0x1a7   :  { %s604_s29 = smul.f32 0.0078125, %s6134_s28 }
 0x1a8   :  { %v553_v36 = vstv %s552_s27 }
 0x1a9   :  { %v605_v41 = vstv %s604_s29  ;;  %v555_v39 = vsel %vm511_vm3, %v553_v36, %v503_v14  ;;  %v554_v40 = vsel %vm510_vm7, %v553_v36, %v502_v27  ;;  %v557_v18 = vsel %vm8987_vm1, %v553_v36, %v505_v20 }
 0x1aa   :  { %v607_v43 = vsel %vm9054_vm10, %v605_v41, %v555_v39  ;;  %v606_v44 = vsel %vm9055_vm8, %v605_v41, %v554_v40  ;;  %v609_v45 = vsel %vm9056_vm9, %v605_v41, %v557_v18  ;;  %v556_v34 = vsel %vm512_vm14, %v553_v36, %v504_v22 }
 0x1ab   :  { %v7130_v25 = vsub.f32 %v6617_v2, %v607_v43  ;;  %v7133_v46 = vsub.f32 %v6607_v0, %v606_v44  ;;  %v7136_v42 = vsub.f32 %v6626_v5, %v609_v45  ;;  %v608_v47 = vsel %vm564_vm0, %v605_v41, %v556_v34 }
 0x1ac   :  { %v7141_v48 = vsub.f32 %v6612_v1, %v608_v47  ;;  %v559_v49 = vsel %vm9057_vm13, %v553_v36, %v507_v37  ;;  %v558_v50 = vsel %vm9058_vm12, %v553_v36, %v506_v38  ;;  %v509_v2 = vsel %vm9059_vm15, %v501_v61, %v457_v35 }
 0x1ad   :  { %v623_v0 = vmul.f32 %v7130_v25, %v7130_v25  ;;  %v622_v5 = vmul.f32 %v7133_v46, %v7133_v46  ;;  %v611_v51 = vsel %vm9060_vm2, %v605_v41, %v559_v49  ;;  %vm9061_vm10 = vcmp.eq.s32.totalorder %v6694_v32, 6 }
 0x1ae   :  { %v561_v1 = vsel %vm9061_vm10, %v553_v36, %v509_v2  ;;  %v625_v59 = vmul.f32 %v7136_v42, %v7136_v42  ;;  %v624_v52 = vmul.f32 %v7141_v48, %v7141_v48  ;;  %vm9062_vm8 = vcmp.eq.s32.totalorder %v6680_v29, 7 }
 0x1af   :  { %v610_v53 = vsel %vm9062_vm8, %v605_v41, %v558_v50  ;;  %vm9063_vm9 = vcmp.eq.s32.totalorder %v6690_v31, 5  ;;  %vm9064_vm13 = vcmask 130048   ;;  %v7168_v60 = vsub.f32 %v6640_v9, %v611_v51 }
 0x1b0   :  { %v508_v54 = vsel %vm9063_vm9, %v501_v61, %v456_v33  ;;  %v633_v55 = vsel %vm9064_vm13, %v623_v0, 0.0  ;;  %vm9065_vm12 = vmmov %vm9064_vm13  ;;  %v7171_v57 = vsub.f32 %v6635_v8, %v610_v53  ;;  %vm9066_vm15 = vcmp.eq.s32.totalorder %v6694_v32, 7 }
 0x1b1   :  { %v630_v56 = vsel %vm9065_vm12, %v622_v5, 0.0  ;;  %634 = vadd.xlane.f32.xlu1 %v633_v55  ;;  %v613_v58 = vsel %vm9066_vm15, %v605_v41, %v561_v1  ;;  %vm9067_vm2 = vcmp.eq.s32.totalorder %v6690_v31, 6  ;;  %vm9068_vm10 = vcmp.eq.s32.totalorder %v6690_v31, 7  ;;  %vm9069_vm8 = vmmov %vm9065_vm12 }
 0x1b2   :  { %631 = vadd.xlane.f32.xlu0 %v630_v56  ;;  %v560_v62 = vsel %vm9067_vm2, %v553_v36, %v508_v54  ;;  %v639_v63 = vsel %vm9069_vm8, %v625_v59, 0.0  ;;  %vm9070_vm9 = vmmov %vm9069_vm8  ;;  %v627_v9 = vmul.f32 %v7168_v60, %v7168_v60  ;;  %v626_v8 = vmul.f32 %v7171_v57, %v7171_v57 }
 0x1b3   :  { %v612_v61 = vsel %vm9068_vm10, %v605_v41, %v560_v62  ;;  %v636_v3 = vsel %vm9070_vm9, %v624_v52, 0.0  ;;  %v7186_v4 = vsub.f32 %v6654_v13, %v613_v58  ;;  %vm9071_vm13 = vmmov %vm9069_vm8  ;;  %vm9075_vm10 = vcmp.eq.s32.totalorder %v6667_v21, 1 }
 0x1b4   :  { %v7189_v26 = vsub.f32 %v6649_v12, %v612_v61  ;;  %v645_v6 = vsel %vm9071_vm13, %v627_v9, 0.0  ;;  %vm9072_vm12 = vmmov %vm9069_vm8  ;;  %vm9077_vm9 = vcmp.eq.s32.totalorder %v6667_v21, 0  ;;  %vm9078_vm13 = vcmp.eq.s32.totalorder %v6670_v23, 0 }
 0x1b5   :  { %640 = vadd.xlane.f32.xlu1 %v639_v63  ;;  %v642_v7 = vsel %vm9072_vm12, %v626_v8, 0.0  ;;  %v629_v10 = vmul.f32 %v7186_v4, %v7186_v4  ;;  %vm9073_vm15 = vmmov %vm9069_vm8  ;;  %vm9079_vm12 = vcmask 7168  }
 0x1b6   :  { %637 = vadd.xlane.f32.xlu0 %v636_v3  ;;  %v628_v11 = vmul.f32 %v7189_v26, %v7189_v26  ;;  %vm9074_vm2 = vmmov %vm9069_vm8  ;;  %vm9076_vm8 = vcmp.eq.s32.totalorder %v6670_v23, 1 }
 0x1b7   :  { %v651_v13 = vsel %vm9073_vm15, %v629_v10, 0.0  ;;  %vm9080_vm15 = vmmov %vm9079_vm12 }
 0x1b8   :  { %v648_v14 = vsel %vm9074_vm2, %v628_v11, 0.0  ;;  %vm9081_vm2 = vmmov %vm9079_vm12 }
 0x1b9   :  { %646 = vadd.xlane.f32.xlu1 %v645_v6  ;;  %vm9082_vm1 = vmmov %vm9081_vm2 }
 0x1ba   :  { %643 = vadd.xlane.f32.xlu0 %v642_v7 }
 0x1bd   :  { %652 = vadd.xlane.f32.xlu1 %v651_v13 }
 0x1be   :  { %649 = vadd.xlane.f32.xlu0 %v648_v14 }
 0x23e   :  { %v7199_v12 = vpop.xlane.xlu1 %634 }
 0x23f   :  { %v7201_v15 = vpop.xlane.xlu0 %631  ;;  %v703_v27 = vsel %vm9076_vm8, %v7199_v12, 0.0  ;;  %v655_v22 = vsel %vm9078_vm13, %v7199_v12, 0.0  ;;  %vm9084_vm8 = vcmp.eq.s32.totalorder %v6670_v23, 3  ;;  %vm9087_vm13 = vcmp.eq.s32.totalorder %v6672_v24, 0 }
 0x240   :  { %v702_v19 = vsel %vm9075_vm10, %v7201_v15, 0.0  ;;  %v654_v20 = vsel %vm9077_vm9, %v7201_v15, 0.0  ;;  %v711_v36 = vsel %vm9080_vm15, %v703_v27, 0.0  ;;  %v663_v38 = vsel %vm9082_vm1, %v655_v22, 0.0  ;;  %vm9089_vm15 = vmmov %vm9081_vm2 }
 0x241   :  { %v710_v35 = vsel %vm9079_vm12, %v702_v19, 0.0  ;;  %v662_v37 = vsel %vm9081_vm2, %v654_v20, 0.0  ;;  %vm9083_vm10 = vcmp.eq.s32.totalorder %v6667_v21, 3  ;;  %v799_v41 = vsel %vm9084_vm8, %v7199_v12, 0.0  ;;  %vm9091_vm8 = vmmov %vm9081_vm2 }
 0x242   :  { %v798_v33 = vsel %vm9083_vm10, %v7201_v15, 0.0  ;;  %v7225_v39 = vpop.xlane.xlu1 %640  ;;  %v712_v18 = vadd.f32 %v711_v36, %v710_v35  ;;  %v664_v43 = vadd.f32 %v663_v38, %v662_v37  ;;  %vm9085_vm9 = vcmp.eq.s32.totalorder %v6672_v24, 1  ;;  %vm9090_vm10 = vmmov %vm9081_vm2 }
 0x243   :  { %v7227_v40 = vpop.xlane.xlu0 %637  ;;  %vm9086_vm1 = vcmp.eq.s32.totalorder %v6677_v28, 1  ;;  %vm9088_vm12 = vcmp.eq.s32.totalorder %v6677_v28, 0  ;;  %v806_v2 = vsel %vm9090_vm10, %v798_v33, 0.0  ;;  %v807_v0 = vsel %vm9091_vm8, %v799_v41, 0.0 }
 0x244   :  { %v704_v44 = vsel %vm9085_vm9, %v7227_v40, 0.0  ;;  %v705_v45 = vsel %vm9086_vm1, %v7225_v39, 0.0  ;;  %v656_v34 = vsel %vm9087_vm13, %v7227_v40, 0.0  ;;  %v657_v47 = vsel %vm9088_vm12, %v7225_v39, 0.0  ;;  %vm9094_vm13 = vmmov %vm9081_vm2 }
 0x245   :  { %v713_v49 = vsel %vm9089_vm15, %v704_v44, 0.0  ;;  %v665_v50 = vsel %vm9081_vm2, %v656_v34, 0.0  ;;  %vm9092_vm9 = vcmp.eq.s32.totalorder %v6672_v24, 3  ;;  %vm9093_vm1 = vcmp.eq.s32.totalorder %v6667_v21, 2  ;;  %vm9095_vm12 = vmmov %vm9081_vm2 }
 0x246   :  { %v714_v5 = vadd.f32 %v713_v49, %v712_v18  ;;  %v666_v51 = vadd.f32 %v665_v50, %v664_v43  ;;  %v800_v1 = vsel %vm9092_vm9, %v7227_v40, 0.0  ;;  %v750_v59 = vsel %vm9093_vm1, %v7201_v15, 0.0  ;;  %v7251_v52 = vpop.xlane.xlu1 %646  ;;  %vm9096_vm15 = vmmov %vm9081_vm2 }
 0x247   :  { %v7253_v53 = vpop.xlane.xlu0 %643  ;;  %v715_v54 = vsel %vm9094_vm13, %v705_v45, 0.0  ;;  %v667_v55 = vsel %vm9095_vm12, %v657_v47, 0.0  ;;  %v809_v56 = vsel %vm9096_vm15, %v800_v1, 0.0  ;;  %vm9097_vm2 = vcmp.eq.s32.totalorder %v6670_v23, 2  ;;  %vm9101_vm1 = vmmov %vm9095_vm12 }
 0x248   :  { %v751_v58 = vsel %vm9097_vm2, %v7199_v12, 0.0  ;;  %vm9098_vm10 = vcmp.eq.s32.totalorder %v6680_v29, 1  ;;  %vm9099_vm8 = vcmp.eq.s32.totalorder %v6688_v30, 1  ;;  %v716_v63 = vadd.f32 %v715_v54, %v714_v5  ;;  %vm9103_vm12 = vmmov %vm9101_vm1 }
 0x249   :  { %v706_v62 = vsel %vm9098_vm10, %v7253_v53, 0.0  ;;  %v707_v61 = vsel %vm9099_vm8, %v7251_v52, 0.0  ;;  %vm9100_vm9 = vcmp.eq.s32.totalorder %v6680_v29, 0  ;;  %vm9102_vm13 = vcmp.eq.s32.totalorder %v6688_v30, 0  ;;  %vm9104_vm15 = vmmov %vm9101_vm1 }
 0x24a   :  { %v658_v3 = vsel %vm9100_vm9, %v7253_v53, 0.0  ;;  %v717_v9 = vsel %vm9101_vm1, %v706_v62, 0.0  ;;  %v659_v8 = vsel %vm9102_vm13, %v7251_v52, 0.0  ;;  %v668_v6 = vadd.f32 %v667_v55, %v666_v51  ;;  %v7279_v19 = vpop.xlane.xlu1 %652  ;;  %vm9106_vm10 = vmmov %vm9101_vm1 }
 0x24b   :  { %v808_v7 = vadd.f32 %v807_v0, %v806_v2  ;;  %v718_v10 = vadd.f32 %v717_v9, %v716_v63  ;;  %v719_v11 = vsel %vm9103_vm12, %v707_v61, 0.0  ;;  %v669_v13 = vsel %vm9104_vm15, %v658_v3, 0.0  ;;  %v7281_v27 = vpop.xlane.xlu0 %649  ;;  %vm9111_vm12 = vmmov %vm9106_vm10 }
 0x24c   :  { %vm9105_vm2 = vcmp.eq.s32.totalorder %v6677_v28, 3  ;;  %v670_v20 = vadd.f32 %v669_v13, %v668_v6  ;;  %v671_v22 = vsel %vm9106_vm10, %v659_v8, 0.0  ;;  %vm9107_vm8 = vcmp.eq.s32.totalorder %v6680_v29, 3 }
 0x24d   :  { %v801_v14 = vsel %vm9105_vm2, %v7225_v39, 0.0  ;;  %v802_v35 = vsel %vm9107_vm8, %v7253_v53, 0.0  ;;  %v810_v36 = vadd.f32 %v809_v56, %v808_v7  ;;  %vm9108_vm9 = vcmp.eq.s32.totalorder %v6690_v31, 1  ;;  %vm9113_vm2 = vmmov %vm9106_vm10 }
 0x24e   :  { %v708_v37 = vsel %vm9108_vm9, %v7281_v27, 0.0  ;;  %vm9109_vm1 = vcmp.eq.s32.totalorder %v6694_v32, 1  ;;  %v720_v33 = vadd.f32 %v719_v11, %v718_v10  ;;  %vm9110_vm13 = vcmp.eq.s32.totalorder %v6690_v31, 0  ;;  %vm9114_vm10 = vmmov %vm9113_vm2 }
 0x24f   :  { %v709_v38 = vsel %vm9109_vm1, %v7279_v19, 0.0  ;;  %v660_v41 = vsel %vm9110_vm13, %v7281_v27, 0.0  ;;  %v721_v18 = vsel %vm9111_vm12, %v708_v37, 0.0  ;;  %vm9112_vm15 = vcmp.eq.s32.totalorder %v6694_v32, 0  ;;  %vm9116_vm9 = vmmov %vm9113_vm2 }
 0x250   :  { %v661_v43 = vsel %vm9112_vm15, %v7279_v19, 0.0  ;;  %v672_v44 = vadd.f32 %v671_v22, %v670_v20  ;;  %v811_v45 = vsel %vm9113_vm2, %v801_v14, 0.0  ;;  %v722_v34 = vadd.f32 %v721_v18, %v720_v33  ;;  %vm9117_vm1 = vmmov %vm9113_vm2 }
 0x251   :  { %v673_v47 = vsel %vm9114_vm10, %v660_v41, 0.0  ;;  %vm9115_vm8 = vcmp.eq.s32.totalorder %v6688_v30, 3  ;;  %v813_v50 = vsel %vm9116_vm9, %v802_v35, 0.0  ;;  %v723_v2 = vsel %vm9117_vm1, %v709_v38, 0.0  ;;  %vm9119_vm12 = vmmov %vm9117_vm1 }
 0x252   :  { %v803_v49 = vsel %vm9115_vm8, %v7251_v52, 0.0  ;;  %v674_v0 = vadd.f32 %v673_v47, %v672_v44  ;;  %vm9118_vm13 = vcmp.eq.s32.totalorder %v6690_v31, 3  ;;  %v812_v51 = vadd.f32 %v811_v45, %v810_v36  ;;  %vm9122_vm10 = vmmov %vm9117_vm1 }
 0x253   :  { %v804_v5 = vsel %vm9118_vm13, %v7281_v27, 0.0  ;;  %v724_v1 = vadd.f32 %v723_v2, %v722_v34  ;;  %v675_v54 = vsel %vm9119_vm12, %v661_v43, 0.0  ;;  %vm9120_vm15 = vcmp.eq.s32.totalorder %v6672_v24, 2  ;;  %vm9123_vm8 = vmmov %vm9117_vm1 }
 0x254   :  { %v752_v55 = vsel %vm9120_vm15, %v7227_v40, 0.0  ;;  %v676_v56 = vadd.f32 %v675_v54, %v674_v0  ;;  %vm9121_vm2 = vcmp.eq.s32.totalorder %v6694_v32, 3  ;;  %v814_v61 = vadd.f32 %v813_v50, %v812_v51  ;;  %vm9125_vm13 = vmmov %vm9117_vm1 }
 0x255   :  { %v805_v62 = vsel %vm9121_vm2, %v7279_v19, 0.0  ;;  %v815_v63 = vsel %vm9122_vm10, %v803_v49, 0.0  ;;  %725 = vadd.xlane.f32.xlu1 %v724_v1  ;;  %v817_v3 = vsel %vm9123_vm8, %v804_v5, 0.0  ;;  %vm9124_vm9 = vcmp.eq.s32.totalorder %v6677_v28, 2  ;;  %vm9127_vm15 = vmmov %vm9117_vm1 }
 0x256   :  { %v753_v9 = vsel %vm9124_vm9, %v7225_v39, 0.0  ;;  %v758_v8 = vsel %vm9117_vm1, %v750_v59, 0.0  ;;  %v759_v6 = vsel %vm9125_vm13, %v751_v58, 0.0  ;;  %677 = vadd.xlane.f32.xlu0 %v676_v56  ;;  %v816_v7 = vadd.f32 %v815_v63, %v814_v61  ;;  %vm9131_vm9 = vmmov %vm9117_vm1 }
 0x257   :  { %vm9126_vm12 = vcmp.eq.s32.totalorder %v6680_v29, 2  ;;  %v760_v11 = vadd.f32 %v759_v6, %v758_v8  ;;  %v761_v13 = vsel %vm9127_vm15, %v752_v55, 0.0  ;;  %vm9128_vm2 = vcmp.eq.s32.totalorder %v6688_v30, 2  ;;  %vm9132_vm13 = vmmov %vm9117_vm1 }
 0x258   :  { %v754_v10 = vsel %vm9126_vm12, %v7253_v53, 0.0  ;;  %v755_v14 = vsel %vm9128_vm2, %v7251_v52, 0.0  ;;  %v818_v20 = vadd.f32 %v817_v3, %v816_v7  ;;  %vm9129_vm10 = vcmp.eq.s32.totalorder %v6667_v21, 5 }
 0x259   :  { %v762_v22 = vadd.f32 %v761_v13, %v760_v11  ;;  %v894_v59 = vsel %vm9129_vm10, %v7201_v15, 0.0  ;;  %vm9130_vm8 = vcmp.eq.s32.totalorder %v6670_v23, 5  ;;  %v819_v35 = vsel %vm9131_vm9, %v805_v62, 0.0  ;;  %vm9136_vm10 = vmmov %vm9117_vm1 }
 0x25a   :  { %v895_v58 = vsel %vm9130_vm8, %v7199_v12, 0.0  ;;  %v763_v36 = vsel %vm9117_vm1, %v753_v9, 0.0  ;;  %v765_v37 = vsel %vm9132_vm13, %v754_v10, 0.0  ;;  %vm9133_vm12 = vcmp.eq.s32.totalorder %v6672_v24, 5  ;;  %vm9137_vm8 = vmmov %vm9117_vm1 }
 0x25b   :  { %v896_v38 = vsel %vm9133_vm12, %v7227_v40, 0.0  ;;  %v820_v33 = vadd.f32 %v819_v35, %v818_v20  ;;  %vm9134_vm15 = vcmp.eq.s32.totalorder %v6690_v31, 2  ;;  %vm9135_vm2 = vcmp.eq.s32.totalorder %v6694_v32, 2  ;;  %vm9138_vm9 = vmmov %vm9117_vm1 }
 0x25c   :  { %v756_v41 = vsel %vm9134_vm15, %v7281_v27, 0.0  ;;  %v757_v18 = vsel %vm9135_vm2, %v7279_v19, 0.0  ;;  %v764_v43 = vadd.f32 %v763_v36, %v762_v22  ;;  %v767_v44 = vsel %vm9136_vm10, %v755_v14, 0.0  ;;  %vm9141_vm15 = vmmov %vm9117_vm1 }
 0x25d   :  { %v902_v45 = vsel %vm9137_vm8, %v894_v59, 0.0  ;;  %v903_v34 = vsel %vm9138_vm9, %v895_v58, 0.0  ;;  %v905_v47 = vsel %vm9117_vm1, %v896_v38, 0.0  ;;  %821 = vadd.xlane.f32.xlu1 %v820_v33  ;;  %vm9139_vm13 = vcmp.eq.s32.totalorder %v6677_v28, 5  ;;  %vm9142_vm2 = vmmov %vm9117_vm1 }
 0x25e   :  { %v766_v49 = vadd.f32 %v765_v37, %v764_v43  ;;  %v897_v50 = vsel %vm9139_vm13, %v7225_v39, 0.0  ;;  %vm9140_vm12 = vcmp.eq.s32.totalorder %v6680_v29, 5  ;;  %v904_v0 = vadd.f32 %v903_v34, %v902_v45 }
 0x25f   :  { %v898_v2 = vsel %vm9140_vm12, %v7253_v53, 0.0  ;;  %v769_v5 = vsel %vm9141_vm15, %v756_v41, 0.0  ;;  %v771_v51 = vsel %vm9142_vm2, %v757_v18, 0.0  ;;  %vm9143_vm10 = vcmp.eq.s32.totalorder %v6667_v21, 4  ;;  %vm9149_vm15 = vmmov %vm9142_vm2 }
 0x260   :  { %v846_v1 = vsel %vm9143_vm10, %v7201_v15, 0.0  ;;  %vm9144_vm8 = vcmp.eq.s32.totalorder %v6670_v23, 4  ;;  %v768_v55 = vadd.f32 %v767_v44, %v766_v49  ;;  %vm9145_vm9 = vcmp.eq.s32.totalorder %v6688_v30, 5  ;;  %vm9150_vm10 = vmmov %vm9142_vm2 }
 0x261   :  { %v847_v54 = vsel %vm9144_vm8, %v7199_v12, 0.0  ;;  %v899_v56 = vsel %vm9145_vm9, %v7251_v52, 0.0  ;;  %v906_v62 = vadd.f32 %v905_v47, %v904_v0  ;;  %vm9146_vm1 = vcmp.eq.s32.totalorder %v6672_v24, 4  ;;  %vm9151_vm8 = vmmov %vm9142_vm2 }
 0x262   :  { %v848_v61 = vsel %vm9146_vm1, %v7227_v40, 0.0  ;;  %vm9147_vm13 = vcmp.eq.s32.totalorder %v6690_v31, 5  ;;  %vm9148_vm12 = vcmp.eq.s32.totalorder %v6694_v32, 5  ;;  %v907_v9 = vsel %vm9149_vm15, %v897_v50, 0.0  ;;  %vm9153_vm1 = vmmov %vm9142_vm2 }
 0x263   :  { %v900_v63 = vsel %vm9147_vm13, %v7281_v27, 0.0  ;;  %v901_v3 = vsel %vm9148_vm12, %v7279_v19, 0.0  ;;  %v909_v8 = vsel %vm9142_vm2, %v898_v2, 0.0  ;;  %v770_v6 = vadd.f32 %v769_v5, %v768_v55  ;;  %vm9154_vm13 = vmmov %vm9153_vm1 }
 0x264   :  { %v908_v7 = vadd.f32 %v907_v9, %v906_v62  ;;  %v854_v10 = vsel %vm9150_vm10, %v846_v1, 0.0  ;;  %v855_v11 = vsel %vm9151_vm8, %v847_v54, 0.0  ;;  %v849_v13 = vsel %vm409_vm4, %v7225_v39, 0.0  ;;  %vm9155_vm12 = vmmov %vm9153_vm1 }
 0x265   :  { %vm9152_vm9 = vcmp.eq.s32.totalorder %v6680_v29, 4  ;;  %v856_v20 = vadd.f32 %v855_v11, %v854_v10  ;;  %v857_v22 = vsel %vm9153_vm1, %v848_v61, 0.0  ;;  %v772_v59 = vadd.f32 %v771_v51, %v770_v6  ;;  %vm9156_vm15 = vmmov %vm9153_vm1 }
 0x266   :  { %v850_v14 = vsel %vm9152_vm9, %v7253_v53, 0.0  ;;  %v910_v58 = vadd.f32 %v909_v8, %v908_v7  ;;  %v911_v35 = vsel %vm9154_vm13, %v899_v56, 0.0  ;;  %v913_v36 = vsel %vm9155_vm12, %v900_v63, 0.0  ;;  %vm9159_vm8 = vmmov %vm9153_vm1 }
 0x267   :  { %v915_v37 = vsel %vm9156_vm15, %v901_v3, 0.0  ;;  %v858_v38 = vadd.f32 %v857_v22, %v856_v20  ;;  %vm9157_vm2 = vcmp.eq.s32.totalorder %v6667_v21, 7  ;;  %vm9158_vm10 = vcmp.eq.s32.totalorder %v6670_v23, 7  ;;  %773 = vadd.xlane.f32.xlu0 %v772_v59  ;;  %vm9160_vm9 = vmmov %vm9153_vm1 }
 0x268   :  { %v990_v33 = vsel %vm9157_vm2, %v7201_v15, 0.0  ;;  %v991_v41 = vsel %vm9158_vm10, %v7199_v12, 0.0  ;;  %v912_v18 = vadd.f32 %v911_v35, %v910_v58  ;;  %v859_v43 = vsel %vm9159_vm8, %v849_v13, 0.0  ;;  %vm9161_vm13 = vmmov %vm9153_vm1 }
 0x269   :  { %v861_v44 = vsel %vm9160_vm9, %v850_v14, 0.0  ;;  %v992_v45 = vsel %vm564_vm0, %v7227_v40, 0.0  ;;  %v851_v34 = vsel %vm411_vm5, %v7251_v52, 0.0  ;;  %v852_v47 = vsel %vm412_vm11, %v7281_v27, 0.0  ;;  %vm9162_vm12 = vmmov %vm9153_vm1 }
 0x26a   :  { %v853_v49 = vsel %vm413_vm6, %v7279_v19, 0.0  ;;  %v860_v50 = vadd.f32 %v859_v43, %v858_v38  ;;  %v914_v2 = vadd.f32 %v913_v36, %v912_v18  ;;  %v998_v0 = vsel %vm9153_vm1, %v990_v33, 0.0  ;;  %vm9165_vm10 = vmmov %vm9153_vm1 }
 0x26b   :  { %v999_v5 = vsel %vm9161_vm13, %v991_v41, 0.0  ;;  %v1001_v51 = vsel %vm9162_vm12, %v992_v45, 0.0  ;;  %vm9163_vm15 = vcmp.eq.s32.totalorder %v6677_v28, 7  ;;  %vm9164_vm2 = vcmp.eq.s32.totalorder %v6680_v29, 7  ;;  %vm9166_vm8 = vmmov %vm9153_vm1 }
 0x26c   :  { %v862_v1 = vadd.f32 %v861_v44, %v860_v50  ;;  %v993_v54 = vsel %vm9163_vm15, %v7225_v39, 0.0  ;;  %v994_v55 = vsel %vm9164_vm2, %v7253_v53, 0.0  ;;  %v1000_v56 = vadd.f32 %v999_v5, %v998_v0  ;;  %vm9167_vm9 = vmmov %vm9153_vm1 }
 0x26d   :  { %v916_v62 = vadd.f32 %v915_v37, %v914_v2  ;;  %v863_v61 = vsel %vm9165_vm10, %v851_v34, 0.0  ;;  %v865_v63 = vsel %vm9166_vm8, %v852_v47, 0.0  ;;  %v942_v8 = vsel %vm510_vm7, %v7201_v15, 0.0  ;;  %vm9168_vm13 = vmmov %vm9153_vm1 }
 0x26e   :  { %v864_v3 = vadd.f32 %v863_v61, %v862_v1  ;;  %v1002_v9 = vadd.f32 %v1001_v51, %v1000_v56  ;;  %v943_v6 = vsel %vm511_vm3, %v7199_v12, 0.0  ;;  %v867_v7 = vsel %vm9167_vm9, %v853_v49, 0.0  ;;  %vm9172_vm10 = vmmov %vm9153_vm1 }
 0x26f   :  { %917 = vadd.xlane.f32.xlu1 %v916_v62  ;;  %v1003_v10 = vsel %vm9153_vm1, %v993_v54, 0.0  ;;  %v1005_v11 = vsel %vm9168_vm13, %v994_v55, 0.0  ;;  %v944_v13 = vsel %vm512_vm14, %v7227_v40, 0.0  ;;  %vm9169_vm12 = vcmp.eq.s32.totalorder %v6688_v30, 7  ;;  %vm9173_vm8 = vmmov %vm9153_vm1 }
 0x270   :  { %v866_v14 = vadd.f32 %v865_v63, %v864_v3  ;;  %v995_v15 = vsel %vm9169_vm12, %v7251_v52, 0.0  ;;  %vm9170_vm15 = vcmp.eq.s32.totalorder %v6690_v31, 7  ;;  %v1004_v20 = vadd.f32 %v1003_v10, %v1002_v9  ;;  %vm9174_vm9 = vmmov %vm9153_vm1 }
 0x271   :  { %v996_v12 = vsel %vm9170_vm15, %v7281_v27, 0.0  ;;  %vm9171_vm2 = vcmp.eq.s32.totalorder %v6677_v28, 6  ;;  %v950_v59 = vsel %vm9172_vm10, %v942_v8, 0.0  ;;  %v951_v58 = vsel %vm9173_vm8, %v943_v6, 0.0  ;;  %vm9176_vm13 = vmmov %vm9173_vm8 }
 0x272   :  { %v945_v22 = vsel %vm9171_vm2, %v7225_v39, 0.0  ;;  %v953_v40 = vsel %vm9174_vm9, %v944_v13, 0.0  ;;  %v868_v35 = vadd.f32 %v867_v7, %v866_v14  ;;  %v1006_v36 = vadd.f32 %v1005_v11, %v1004_v20  ;;  %vm9177_vm12 = vmmov %vm9173_vm8 }
 0x273   :  { %vm9175_vm1 = vcmp.eq.s32.totalorder %v6680_v29, 6  ;;  %v952_v38 = vadd.f32 %v951_v58, %v950_v59  ;;  %v1007_v33 = vsel %vm9176_vm13, %v995_v15, 0.0  ;;  %v1009_v41 = vsel %vm9177_vm12, %v996_v12, 0.0  ;;  %vm9179_vm2 = vmmov %vm9173_vm8 }
 0x274   :  { %v946_v37 = vsel %vm9175_vm1, %v7253_v53, 0.0  ;;  %869 = vadd.xlane.f32.xlu0 %v868_v35  ;;  %vm9178_vm15 = vcmp.eq.s32.totalorder %v6694_v32, 7  ;;  %v1008_v18 = vadd.f32 %v1007_v33, %v1006_v36  ;;  %v955_v44 = vsel %vm9179_vm2, %v945_v22, 0.0  ;;  %vm9180_vm10 = vmmov %vm9179_vm2 }
 0x275   :  { %v997_v39 = vsel %vm9178_vm15, %v7279_v19, 0.0  ;;  %v954_v43 = vadd.f32 %v953_v40, %v952_v38  ;;  %v957_v45 = vsel %vm9180_vm10, %v946_v37, 0.0  ;;  %vm9181_vm8 = vcmp.eq.s32.totalorder %v6688_v30, 6  ;;  %vm9183_vm1 = vmmov %vm9179_vm2 }
 0x276   :  { %v1010_v34 = vadd.f32 %v1009_v41, %v1008_v18  ;;  %v947_v53 = vsel %vm9181_vm8, %v7251_v52, 0.0  ;;  %vm9182_vm9 = vcmp.eq.s32.totalorder %v6690_v31, 6  ;;  %v1011_v50 = vsel %vm9183_vm1, %v997_v39, 0.0  ;;  %vm9184_vm13 = vmmov %vm9183_vm1 }
 0x277   :  { %v948_v47 = vsel %vm9182_vm9, %v7281_v27, 0.0  ;;  %v956_v49 = vadd.f32 %v955_v44, %v954_v43  ;;  %v959_v5 = vsel %vm9184_vm13, %v947_v53, 0.0  ;;  %vm9185_vm12 = vmmov %vm9183_vm1  ;;  %vm9186_vm15 = vcmp.eq.s32.totalorder %v6694_v32, 6 }
 0x278   :  { %v1012_v2 = vadd.f32 %v1011_v50, %v1010_v34  ;;  %v961_v51 = vsel %vm9185_vm12, %v948_v47, 0.0  ;;  %v949_v1 = vsel %vm9186_vm15, %v7279_v19, 0.0  ;;  %vm9187_vm2 = vmmov %vm9183_vm1  ;;  %vm9188_vm10 = vcmp.eq.s32.totalorder %v6667_v21, 0 }
 0x279   :  { %v958_v0 = vadd.f32 %v957_v45, %v956_v49  ;;  %v963_v55 = vsel %vm9187_vm2, %v949_v1, 0.0  ;;  %vm9189_vm8 = vcmp.eq.s32.totalorder %v6670_v23, 0  ;;  %vm9190_vm9 = vcmp.eq.s32.totalorder %v6672_v24, 0 }
 0x27a   :  { %1013 = vadd.xlane.f32.xlu1 %v1012_v2  ;;  %vm9191_vm1 = vcmp.eq.s32.totalorder %v6677_v28, 0  ;;  %vm9192_vm13 = vcmp.eq.s32.totalorder %v6680_v29, 0  ;;  %vm9193_vm12 = vcmp.eq.s32.totalorder %v6688_v30, 0  ;;  %vm9194_vm15 = vcmp.eq.s32.totalorder %v6690_v31, 0 }
 0x27b   :  { %v960_v54 = vadd.f32 %v959_v5, %v958_v0  ;;  %vm9195_vm2 = vcmp.eq.s32.totalorder %v6694_v32, 0 }
 0x27d   :  { %v962_v52 = vadd.f32 %v961_v51, %v960_v54 }
 0x27f   :  { %v964_v56 = vadd.f32 %v963_v55, %v962_v52 }
 0x281   :  { %965 = vadd.xlane.f32.xlu0 %v964_v56 }
 0x2e2   :  { %v726_v6 = vpop.xlane.xlu1 %725 }
 0x2e3   :  { %v678_v27 = vpop.xlane.xlu0 %677  ;;  %v727_v7 = vrot.slane %v726_v6, 4 }
 0x2e4   :  { %v679_v62 = vrot.slane %v678_v27, 4 }
 0x2e5   :  { %v728_v10 = vadd.f32 %v727_v7, %v726_v6 }
 0x2e6   :  { %v680_v61 = vadd.f32 %v679_v62, %v678_v27 }
 0x2e7   :  { %v729_v19 = vrot.slane %v728_v10, 2 }
 0x2e8   :  { %v681_v63 = vrot.slane %v680_v61, 2 }
 0x2e9   :  { %v730_v13 = vadd.f32 %v729_v19, %v728_v10 }
 0x2ea   :  { %v682_v3 = vadd.f32 %v681_v63, %v680_v61  ;;  %v822_v33 = vpop.xlane.xlu1 %821 }
 0x2eb   :  { %v731_v14 = vrot.slane %v730_v13, 1  ;;  %v823_v41 = vrot.slane %v822_v33, 4 }
 0x2ec   :  { %v683_v9 = vrot.slane %v682_v3, 1 }
 0x2ed   :  { %v732_v12 = vadd.f32 %v731_v14, %v730_v13  ;;  %v824_v18 = vadd.f32 %v823_v41, %v822_v33 }
 0x2ee   :  { %v684_v8 = vadd.f32 %v683_v9, %v682_v3 }
 0x2ef   :  { %v825_v27 = vrot.slane %v824_v18, 2 }
 0x2f0   :  { %6135 = vpush %v684_v8 }
 0x2f1   :  { %v826_v61 = vadd.f32 %v825_v27, %v824_v18 }
 0x2f3   :  { %v827_v63 = vrot.slane %v826_v61, 1 }
 0x2f4   :  { %v774_v20 = vpop.xlane.xlu0 %773 }
 0x2f5   :  { %v775_v22 = vrot.slane %v774_v20, 4  ;;  %v828_v9 = vadd.f32 %v827_v63, %v826_v61 }
 0x2f7   :  { %v776_v59 = vadd.f32 %v775_v22, %v774_v20 }
 0x2f9   :  { %v777_v58 = vrot.slane %v776_v59, 2 }
 0x2fb   :  { %v778_v35 = vadd.f32 %v777_v58, %v776_v59 }
 0x2fd   :  { %v779_v36 = vrot.slane %v778_v35, 1 }
 0x2ff   :  { %v780_v38 = vadd.f32 %v779_v36, %v778_v35 }
 0x301   :  { %v870_v8 = vpop.xlane.xlu0 %869 }
 0x302   :  { %v871_v6 = vrot.slane %v870_v8, 4 }
 0x304   :  { %v872_v7 = vadd.f32 %v871_v6, %v870_v8 }
 0x306   :  { %v873_v59 = vrot.slane %v872_v7, 2 }
 0x321   :  { %s6136_s30 = spop %6135 }
 0x322   :  { %s688_s0 = smul.f32 0.0078125, %s6136_s30 }
 0x324   :  { %s689_s19 = sadd.f32 1e-05, %s688_s0 }
 0x326   :  { %v690_v11 = vstv %s689_s19 }
 0x327   :  { %6170 = vrsqrt.f32 %v690_v11 }
 0x331   :  { %v6171_v15 = vpop.eup %6170 }
 0x332   :  { %6137 = vpush %v6171_v15 }
 0x333   :  { %6139 = vpush %v732_v12 }
 0x363   :  { %s6138_s3 = spop %6137 }
 0x364   :  { %s6140_s20 = spop %6139  ;;  %v693_v39 = vstv %s6138_s3 }
 0x365   :  { %s736_s21 = smul.f32 0.0078125, %s6140_s20  ;;  %v694_v43 = vsel %vm9188_vm10, %v693_v39, 0.0  ;;  %v695_v44 = vsel %vm9189_vm8, %v693_v39, 0.0  ;;  %v696_v45 = vsel %vm9190_vm9, %v693_v39, 0.0  ;;  %v697_v34 = vsel %vm9191_vm1, %v693_v39, 0.0 }
 0x366   :  { %v698_v53 = vsel %vm9192_vm13, %v693_v39, 0.0  ;;  %v699_v47 = vsel %vm9193_vm12, %v693_v39, 0.0  ;;  %v700_v49 = vsel %vm9194_vm15, %v693_v39, 0.0  ;;  %v701_v50 = vsel %vm9195_vm2, %v693_v39, 0.0 }
 0x367   :  { %s737_s22 = sadd.f32 1e-05, %s736_s21  ;;  %vm9196_vm10 = vcmp.eq.s32.totalorder %v6667_v21, 1  ;;  %vm9197_vm8 = vcmp.eq.s32.totalorder %v6670_v23, 1  ;;  %vm9198_vm9 = vcmp.eq.s32.totalorder %v6672_v24, 1  ;;  %vm9199_vm1 = vcmp.eq.s32.totalorder %v6677_v28, 1 }
 0x368   :  { %vm9200_vm13 = vcmp.eq.s32.totalorder %v6680_v29, 1  ;;  %vm9201_vm12 = vcmp.eq.s32.totalorder %v6688_v30, 1  ;;  %vm9202_vm15 = vcmp.eq.s32.totalorder %v6690_v31, 1  ;;  %vm9203_vm2 = vcmp.eq.s32.totalorder %v6694_v32, 1 }
 0x369   :  { %v738_v40 = vstv %s737_s22 }
 0x36a   :  { %6172 = vrsqrt.f32 %v738_v40  ;;  %v874_v40 = vadd.f32 %v873_v59, %v872_v7 }
 0x36c   :  { %v875_v35 = vrot.slane %v874_v40, 1 }
 0x374   :  { %v6173_v37 = vpop.eup %6172 }
 0x375   :  { %6141 = vpush %v6173_v37  ;;  %v876_v37 = vadd.f32 %v875_v35, %v874_v40 }
 0x376   :  { %6143 = vpush %v780_v38  ;;  %v918_v38 = vpop.xlane.xlu1 %917 }
 0x377   :  { %v919_v33 = vrot.slane %v918_v38, 4 }
 0x379   :  { %v920_v41 = vadd.f32 %v919_v33, %v918_v38 }
 0x3a6   :  { %s6142_s4 = spop %6141 }
 0x3a7   :  { %v741_v2 = vstv %s6142_s4  ;;  %s6144_s23 = spop %6143 }
 0x3a8   :  { %v742_v0 = vsel %vm9196_vm10, %v741_v2, %v694_v43  ;;  %v743_v5 = vsel %vm9197_vm8, %v741_v2, %v695_v44  ;;  %v744_v51 = vsel %vm9198_vm9, %v741_v2, %v696_v45  ;;  %v745_v1 = vsel %vm9199_vm1, %v741_v2, %v697_v34  ;;  %s784_s24 = smul.f32 0.0078125, %s6144_s23 }
 0x3a9   :  { %v746_v54 = vsel %vm9200_vm13, %v741_v2, %v698_v53  ;;  %v747_v52 = vsel %vm9201_vm12, %v741_v2, %v699_v47  ;;  %v748_v55 = vsel %vm9202_vm15, %v741_v2, %v700_v49  ;;  %v749_v56 = vsel %vm9203_vm2, %v741_v2, %v701_v50 }
 0x3aa   :  { %s785_s25 = sadd.f32 1e-05, %s784_s24  ;;  %vm9204_vm10 = vcmp.eq.s32.totalorder %v6667_v21, 2  ;;  %vm9205_vm8 = vcmp.eq.s32.totalorder %v6670_v23, 2  ;;  %vm9206_vm9 = vcmp.eq.s32.totalorder %v6672_v24, 2  ;;  %vm9207_vm1 = vcmp.eq.s32.totalorder %v6677_v28, 2 }
 0x3ab   :  { %vm9208_vm13 = vcmp.eq.s32.totalorder %v6680_v29, 2  ;;  %vm9209_vm12 = vcmp.eq.s32.totalorder %v6688_v30, 2  ;;  %vm9210_vm15 = vcmp.eq.s32.totalorder %v6690_v31, 2  ;;  %vm9211_vm2 = vcmp.eq.s32.totalorder %v6694_v32, 2 }
 0x3ac   :  { %v786_v62 = vstv %s785_s25  ;;  %v921_v50 = vrot.slane %v920_v41, 2 }
 0x3ad   :  { %6174 = vrsqrt.f32 %v786_v62 }
 0x3b7   :  { %v6175_v3 = vpop.eup %6174 }
 0x3b8   :  { %6145 = vpush %v6175_v3 }
 0x3b9   :  { %6147 = vpush %v828_v9 }
 0x3e9   :  { %s6146_s26 = spop %6145 }
 0x3ea   :  { %v789_v10 = vstv %s6146_s26  ;;  %s6148_s27 = spop %6147 }
 0x3eb   :  { %v790_v19 = vsel %vm9204_vm10, %v789_v10, %v742_v0  ;;  %v791_v11 = vsel %vm9205_vm8, %v789_v10, %v743_v5  ;;  %v792_v13 = vsel %vm9206_vm9, %v789_v10, %v744_v51  ;;  %v793_v14 = vsel %vm9207_vm1, %v789_v10, %v745_v1  ;;  %s832_s28 = smul.f32 0.0078125, %s6148_s27 }
 0x3ec   :  { %v794_v15 = vsel %vm9208_vm13, %v789_v10, %v746_v54  ;;  %v795_v12 = vsel %vm9209_vm12, %v789_v10, %v747_v52  ;;  %v796_v20 = vsel %vm9210_vm15, %v789_v10, %v748_v55  ;;  %v797_v22 = vsel %vm9211_vm2, %v789_v10, %v749_v56  ;;  %v966_v54 = vpop.xlane.xlu0 %965 }
 0x3ed   :  { %s833_s29 = sadd.f32 1e-05, %s832_s28  ;;  %vm9212_vm10 = vcmp.eq.s32.totalorder %v6667_v21, 3  ;;  %vm9213_vm8 = vcmp.eq.s32.totalorder %v6670_v23, 3  ;;  %vm9214_vm9 = vcmp.eq.s32.totalorder %v6672_v24, 3  ;;  %vm9215_vm1 = vcmp.eq.s32.totalorder %v6677_v28, 3 }
 0x3ee   :  { %vm9216_vm13 = vcmp.eq.s32.totalorder %v6680_v29, 3  ;;  %vm9217_vm12 = vcmp.eq.s32.totalorder %v6688_v30, 3  ;;  %vm9218_vm15 = vcmp.eq.s32.totalorder %v6690_v31, 3  ;;  %vm9219_vm2 = vcmp.eq.s32.totalorder %v6694_v32, 3 }
 0x3ef   :  { %v834_v58 = vstv %s833_s29  ;;  %v922_v0 = vadd.f32 %v921_v50, %v920_v41  ;;  %v967_v52 = vrot.slane %v966_v54, 4  ;;  %s9232_s29 = sld [smem:[#allocation16_spill]] }
 0x3f0   :  { %6176 = vrsqrt.f32 %v834_v58 }
 0x3f1   :  { %v923_v5 = vrot.slane %v922_v0, 1  ;;  %v968_v55 = vadd.f32 %v967_v52, %v966_v54 }
 0x3f3   :  { %v924_v1 = vadd.f32 %v923_v5, %v922_v0  ;;  %v969_v7 = vrot.slane %v968_v55, 2 }
 0x3fa   :  { %v6177_v36 = vpop.eup %6176 }
 0x3fb   :  { %6149 = vpush %v6177_v36 }
 0x3fc   :  { %6151 = vpush %v876_v37 }
 0x42c   :  { %s6150_s30 = spop %6149 }
 0x42d   :  { %v837_v39 = vstv %s6150_s30  ;;  %s6152_s0 = spop %6151 }
 0x42e   :  { %v838_v18 = vsel %vm9212_vm10, %v837_v39, %v790_v19  ;;  %v839_v43 = vsel %vm9213_vm8, %v837_v39, %v791_v11  ;;  %v840_v44 = vsel %vm9214_vm9, %v837_v39, %v792_v13  ;;  %v841_v45 = vsel %vm9215_vm1, %v837_v39, %v793_v14  ;;  %s880_s19 = smul.f32 0.0078125, %s6152_s0 }
 0x42f   :  { %v842_v34 = vsel %vm9216_vm13, %v837_v39, %v794_v15  ;;  %v843_v53 = vsel %vm9217_vm12, %v837_v39, %v795_v12  ;;  %v844_v47 = vsel %vm9218_vm15, %v837_v39, %v796_v20  ;;  %v845_v49 = vsel %vm9219_vm2, %v837_v39, %v797_v22  ;;  %v1014_v15 = vpop.xlane.xlu1 %1013 }
 0x430   :  { %s881_s3 = sadd.f32 1e-05, %s880_s19  ;;  %vm9220_vm10 = vcmp.eq.s32.totalorder %v6667_v21, 4  ;;  %vm9221_vm8 = vcmp.eq.s32.totalorder %v6670_v23, 4  ;;  %vm9222_vm9 = vcmp.eq.s32.totalorder %v6672_v24, 4  ;;  %vm9223_vm1 = vcmp.eq.s32.totalorder %v6680_v29, 4 }
 0x431   :  { %v970_v19 = vadd.f32 %v969_v7, %v968_v55  ;;  %v1015_v12 = vrot.slane %v1014_v15, 4  ;;  %vm9228_vm13 = vcmp.eq.s32.totalorder %v6680_v29, 5  ;;  %vm9229_vm12 = vcmp.eq.s32.totalorder %v6688_v30, 5 }
 0x432   :  { %v882_v2 = vstv %s881_s3  ;;  %vm9230_vm15 = vcmp.eq.s32.totalorder %v6690_v31, 5  ;;  %vm9231_vm2 = vcmp.eq.s32.totalorder %v6694_v32, 5 }
 0x433   :  { %6178 = vrsqrt.f32 %v882_v2  ;;  %v971_v11 = vrot.slane %v970_v19, 1  ;;  %v1016_v20 = vadd.f32 %v1015_v12, %v1014_v15 }
 0x435   :  { %v972_v14 = vadd.f32 %v971_v11, %v970_v19  ;;  %v1017_v41 = vrot.slane %v1016_v20, 2 }
 0x43d   :  { %v6179_v51 = vpop.eup %6178 }
 0x43e   :  { %6153 = vpush %v6179_v51 }
 0x43f   :  { %6155 = vpush %v924_v1 }
 0x46f   :  { %s6154_s20 = spop %6153 }
 0x470   :  { %v885_v56 = vstv %s6154_s20  ;;  %s6156_s21 = spop %6155 }
 0x471   :  { %v886_v27 = vsel %vm9220_vm10, %v885_v56, %v838_v18  ;;  %v887_v62 = vsel %vm9221_vm8, %v885_v56, %v839_v43  ;;  %v888_v61 = vsel %vm9222_vm9, %v885_v56, %v840_v44  ;;  %v889_v63 = vsel %vm409_vm4, %v885_v56, %v841_v45  ;;  %s928_s22 = smul.f32 0.0078125, %s6156_s21  ;;  %v1079_v18 = vld [vmem:[%s9232_s29 + $0x8] sm:$0xff]  ;;  %v1081_v43 = vld [vmem:[%s9232_s29 + $0x18] sm:$0xff]  ;;  %v1078_v44 = vld [vmem:[%s9232_s29] sm:$0xff] }
 0x472   :  { %v890_v3 = vsel %vm9223_vm1, %v885_v56, %v842_v34  ;;  %v891_v9 = vsel %vm411_vm5, %v885_v56, %v843_v53  ;;  %v892_v8 = vsel %vm412_vm11, %v885_v56, %v844_v47  ;;  %v893_v6 = vsel %vm413_vm6, %v885_v56, %v845_v49  ;;  %v1080_v47 = vld [vmem:[%s9232_s29 + $0x10] sm:$0xff] }
 0x473   :  { %s929_s4 = sadd.f32 1e-05, %s928_s22  ;;  %vm9224_vm4 = vcmp.eq.s32.totalorder %v6667_v21, 5  ;;  %vm9225_vm5 = vcmp.eq.s32.totalorder %v6670_v23, 5  ;;  %vm9226_vm11 = vcmp.eq.s32.totalorder %v6672_v24, 5  ;;  %vm9227_vm6 = vcmp.eq.s32.totalorder %v6677_v28, 5 }
 0x474   :  { %v6506_v45 = vmov 0.0   ;;  %v1018_v34 = vadd.f32 %v1017_v41, %v1016_v20  ;;  %v5655_v53 = vpack.c.bf16 %v1081_v43, %v1079_v18  ;;  %v5657_v2 = vpack.c.bf16 %v1080_v47, %v1078_v44  ;;  %v1047_v20 = vld [vmem:[%s8924_s1 + $0x8] sm:$0xff]  ;;  %v1064_v43 = vld [vmem:[%s8925_s2 + $0x10] sm:$0xff]  ;;  %v1049_v44 = vld [vmem:[%s8924_s1 + $0x18] sm:$0xff]  ;;  %s6508_s22 = smov 32  }
 0x475   :  { %v930_v10 = vstv %s929_s4  ;;  %1182 = vmatprep.mubr.f32.mxu0 %v6506_v45  ;;  %2415 = vmatprep.mubr.f32.mxu1 %v6506_v45  ;;  %vm9234_vm10 = vcmp.eq.s32.totalorder %v6677_v28, 6  ;;  %vm9235_vm8 = vcmp.eq.s32.totalorder %v6680_v29, 6  ;;  %vm9236_vm9 = vcmp.eq.s32.totalorder %v6688_v30, 6 }
 0x476   :  { %6180 = vrsqrt.f32 %v930_v10  ;;  %5656 = vmatprep.subr.bf16.mxu0 %v5655_v53  ;;  %v1019_v5 = vrot.slane %v1018_v34, 1  ;;  %vm9237_vm1 = vcmp.eq.s32.totalorder %v6690_v31, 6  ;;  %v1046_v10 = vld [vmem:[%s8924_s1] sm:$0xff] }
 0x477   :  { %5658 = vmatpush1.bf16.msra.mxu0 %v5657_v2 }
 0x478   :  { %v1020_v1 = vadd.f32 %v1019_v5, %v1018_v34 }
 0x480   :  { %v6181_v13 = vpop.eup %6180 }
 0x481   :  { %6157 = vpush %v6181_v13  ;;  %v1062_v13 = vld [vmem:[%s8925_s2] sm:$0xff] }
 0x482   :  { %6159 = vpush %v972_v14 }
 0x4b2   :  { %s6158_s23 = spop %6157 }
 0x4b3   :  { %v933_v22 = vstv %s6158_s23  ;;  %s6160_s24 = spop %6159  ;;  %s9233_s23 = sld [smem:[#allocation17_spill]] }
 0x4b4   :  { %v934_v59 = vsel %vm9224_vm4, %v933_v22, %v886_v27  ;;  %v935_v58 = vsel %vm9225_vm5, %v933_v22, %v887_v62  ;;  %v936_v40 = vsel %vm9226_vm11, %v933_v22, %v888_v61  ;;  %v937_v35 = vsel %vm9227_vm6, %v933_v22, %v889_v63  ;;  %s976_s25 = smul.f32 0.0078125, %s6160_s24 }
 0x4b5   :  { %v938_v36 = vsel %vm9228_vm13, %v933_v22, %v890_v3  ;;  %v939_v37 = vsel %vm9229_vm12, %v933_v22, %v891_v9  ;;  %v940_v38 = vsel %vm9230_vm15, %v933_v22, %v892_v8  ;;  %v941_v33 = vsel %vm9231_vm2, %v933_v22, %v893_v6  ;;  %v1381_v22 = vld [vmem:[%s8926_s6 + $0x8] sm:$0xff] }
 0x4b6   :  { %s977_s26 = sadd.f32 1e-05, %s976_s25  ;;  %vm9242_vm4 = vcmask 130048   ;;  %vm9243_vm5 = vcmp.eq.s32.totalorder %v6680_v29, 7  ;;  %vm9245_vm6 = vcmp.eq.s32.totalorder %v6688_v30, 7  ;;  %vm9247_vm12 = vcmp.eq.s32.totalorder %v6690_v31, 7 }
 0x4b7   :  { %vm9244_vm11 = vmmov %vm9242_vm4  ;;  %vm9249_vm2 = vcmp.eq.s32.totalorder %v6694_v32, 7 }
 0x4b8   :  { %v978_v39 = vstv %s977_s26  ;;  %vm9246_vm13 = vmmov %vm9242_vm4 }
 0x4b9   :  { %6182 = vrsqrt.f32 %v978_v39  ;;  %v1248_v49 = vld [vmem:[%s9233_s23 + $0x8] sm:$0xff]  ;;  %v1250_v50 = vld [vmem:[%s9233_s23 + $0x18] sm:$0xff]  ;;  %v1247_v14 = vld [vmem:[%s9233_s23] sm:$0xff] }
 0x4ba   :  { %v5659_v0 = vpack.c.bf16 %v1250_v50, %v1248_v49  ;;  %v1249_v15 = vld [vmem:[%s9233_s23 + $0x10] sm:$0xff]  ;;  %v1065_v49 = vld [vmem:[%s8925_s2 + $0x18] sm:$0xff]  ;;  %v1050_v50 = vld [vmem:[%s8924_s1 + $0x20] sm:$0xff] }
 0x4bb   :  { %vm9248_vm15 = vmmov %vm9242_vm4 }
 0x4bc   :  { %5660 = vmatprep.subr.bf16.mxu0 %v5659_v0 }
 0x4c3   :  { %v6183_v51 = vpop.eup %6182 }
 0x4c4   :  { %6161 = vpush %v6183_v51  ;;  %v1066_v51 = vld [vmem:[%s8925_s2 + $0x20] sm:$0xff] }
 0x4c5   :  { %6163 = vpush %v1020_v1  ;;  %v1051_v1 = vld [vmem:[%s8924_s1 + $0x28] sm:$0xff] }
 0x4f5   :  { %s6162_s26 = spop %6161 }
 0x4f6   :  { %v981_v54 = vstv %s6162_s26  ;;  %s6164_s27 = spop %6163 }
 0x4f7   :  { %s1024_s28 = smul.f32 0.0078125, %s6164_s27  ;;  %v982_v52 = vsel %vm510_vm7, %v981_v54, %v934_v59  ;;  %v983_v55 = vsel %vm511_vm3, %v981_v54, %v935_v58  ;;  %v984_v56 = vsel %vm512_vm14, %v981_v54, %v936_v40  ;;  %v985_v27 = vsel %vm9234_vm10, %v981_v54, %v937_v35  ;;  %v1383_v59 = vld [vmem:[%s8926_s6 + $0x18] sm:$0xff]  ;;  %vm9250_vm10 = vmmov %vm9242_vm4 }
 0x4f8   :  { %v986_v62 = vsel %vm9235_vm8, %v981_v54, %v938_v36  ;;  %v987_v61 = vsel %vm9236_vm9, %v981_v54, %v939_v37  ;;  %v988_v63 = vsel %vm9237_vm1, %v981_v54, %v940_v38  ;;  %vm9238_vm7 = vcmp.eq.s32.totalorder %v6694_v32, 6  ;;  %v1063_v38 = vld [vmem:[%s8925_s2 + $0x8] sm:$0xff]  ;;  %vm9251_vm8 = vmmov %vm9242_vm4 }
 0x4f9   :  { %v7603_v3 = vsel %vm9238_vm7, %v981_v54, %v941_v33  ;;  %s1025_s29 = sadd.f32 1e-05, %s1024_s28  ;;  %vm9239_vm3 = vcmp.eq.s32.totalorder %v6667_v21, 7  ;;  %vm9240_vm14 = vcmp.eq.s32.totalorder %v6670_v23, 7  ;;  %v5661_v40 = vpack.c.bf16 %v1249_v15, %v1247_v14  ;;  %v1048_v33 = vld [vmem:[%s8924_s1 + $0x10] sm:$0xff]  ;;  %vm9252_vm9 = vmmov %vm9242_vm4 }
 0x4fa   :  { %v7637_v37 = vpack.c.bf16 %v1383_v59, %v1381_v22  ;;  %vm9253_vm1 = vmmov %vm9242_vm4  ;;  %v1391_v22 = vld [vmem:[%s8926_s6 + $0x58] sm:$0xff] }
 0x4fb   :  { %v1026_v9 = vstv %s1025_s29  ;;  %vm9254_vm7 = vmmov %vm9253_vm1 }
 0x4fc   :  { %6184 = vrsqrt.f32 %v1026_v9  ;;  %v1068_v9 = vld [vmem:[%s8925_s2 + $0x30] sm:$0xff] }
 0x506   :  { %v6185_v8 = vpop.eup %6184 }
 0x507   :  { %6165 = vpush %v6185_v8  ;;  %v1053_v8 = vld [vmem:[%s8924_s1 + $0x38] sm:$0xff] }
 0x538   :  { %s6166_s30 = spop %6165 }
 0x539   :  { %v1029_v6 = vstv %s6166_s30 }
 0x53a   :  { %v1030_v7 = vsel %vm9239_vm3, %v1029_v6, %v982_v52  ;;  %v1031_v19 = vsel %vm9240_vm14, %v1029_v6, %v983_v55  ;;  %v1034_v34 = vsel %vm9243_vm5, %v1029_v6, %v986_v62  ;;  %v1035_v2 = vsel %vm9245_vm6, %v1029_v6, %v987_v61  ;;  %vm9255_vm3 = vmmov %vm9253_vm1 }
 0x53b   :  { %v1038_v11 = vmul.f32 %v1030_v7, %v7133_v46  ;;  %v1039_v12 = vmul.f32 %v1031_v19, %v7130_v25  ;;  %v1032_v46 = vsel %vm564_vm0, %v1029_v6, %v984_v56  ;;  %vm9241_vm0 = vcmp.eq.s32.totalorder %v6677_v28, 7  ;;  %v1067_v56 = vld [vmem:[%s8925_s2 + $0x28] sm:$0xff]  ;;  %v1069_v7 = vld [vmem:[%s8925_s2 + $0x38] sm:$0xff]  ;;  %v1382_v19 = vld [vmem:[%s8926_s6 + $0x10] sm:$0xff] }
 0x53c   :  { %v1040_v36 = vmul.f32 %v1032_v46, %v7141_v48  ;;  %v1033_v41 = vsel %vm9241_vm0, %v1029_v6, %v985_v27  ;;  %v1042_v47 = vmul.f32 %v1034_v34, %v7171_v57  ;;  %v1043_v57 = vmul.f32 %v1035_v2, %v7168_v60  ;;  %v1052_v27 = vld [vmem:[%s8924_s1 + $0x30] sm:$0xff]  ;;  %v1389_v46 = vld [vmem:[%s8926_s6 + $0x48] sm:$0xff]  ;;  %vm9256_vm14 = vmmov %vm9253_vm1 }
 0x53d   :  { %v1054_v58 = vmul.f32 %v1046_v10, %v1038_v11  ;;  %v1055_v25 = vmul.f32 %v1047_v20, %v1039_v12  ;;  %v1041_v18 = vmul.f32 %v1033_v41, %v7136_v42  ;;  %v1036_v54 = vsel %vm9247_vm12, %v1029_v6, %v988_v63  ;;  %v1380_v10 = vld [vmem:[%s8926_s6] sm:$0xff]  ;;  %v1385_v11 = vld [vmem:[%s8926_s6 + $0x28] sm:$0xff]  ;;  %v1386_v20 = vld [vmem:[%s8926_s6 + $0x30] sm:$0xff] }
 0x53e   :  { %v1056_v39 = vmul.f32 %v1048_v33, %v1040_v36  ;;  %v1058_v5 = vmul.f32 %v1050_v50, %v1042_v47  ;;  %v1059_v55 = vmul.f32 %v1051_v1, %v1043_v57  ;;  %v1044_v60 = vmul.f32 %v1036_v54, %v7189_v26  ;;  %v1384_v12 = vld [vmem:[%s8926_s6 + $0x20] sm:$0xff]  ;;  %v1395_v36 = vld [vmem:[%s8926_s6 + $0x78] sm:$0xff]  ;;  %vm9257_vm0 = vmmov %vm9253_vm1 }
 0x53f   :  { %v7634_v35 = vadd.f32 %v1062_v13, %v1054_v58  ;;  %v7650_v48 = vadd.f32 %v1063_v38, %v1055_v25  ;;  %v1057_v42 = vmul.f32 %v1049_v44, %v1041_v18  ;;  %v1037_v62 = vsel %vm9249_vm2, %v1029_v6, %v7603_v3  ;;  %v1387_v13 = vld [vmem:[%s8926_s6 + $0x38] sm:$0xff]  ;;  %v1390_v25 = vld [vmem:[%s8926_s6 + $0x50] sm:$0xff]  ;;  %v1392_v41 = vld [vmem:[%s8926_s6 + $0x60] sm:$0xff] }
 0x540   :  { %v7665_v53 = vadd.f32 %v1064_v43, %v1056_v39  ;;  %v1074_v52 = vadd.f32 %v1066_v51, %v1058_v5  ;;  %v1075_v61 = vadd.f32 %v1067_v56, %v1059_v55  ;;  %v1060_v63 = vmul.f32 %v1052_v27, %v1044_v60  ;;  %v1394_v39 = vld [vmem:[%s8926_s6 + $0x70] sm:$0xff]  ;;  %vm9259_vm5 = vmmov %vm9257_vm0  ;;  %v1082_v43 = vld [vmem:[%s8927_s5] sm:$0x3]  ;;  %s6507_s5 = smov 64  }
 0x541   :  { %5260 = vmatmul.mubr.msk.f32.vlgmr.msra.gmra.mrb[0].mxu0 %vm9242_vm4, %v7634_v35  ;;  %v7679_v0 = vadd.f32 %v1065_v49, %v1057_v42  ;;  %v1045_v26 = vmul.f32 %v1037_v62, %v7186_v4  ;;  %v7733_v14 = vpack.c.bf16 %v1382_v19, %v1380_v10  ;;  %v7735_v15 = vpack.c.bf16 %v1387_v13, %v1385_v11  ;;  %vm9258_vm4 = vmmov %vm9257_vm0 }
 0x542   :  { %5662 = vmatpush1.bf16.msra.mxu0 %v5661_v40  ;;  %1188 = vmatprep.mubr.f32.mxu0 %v6506_v45  ;;  %v1076_v3 = vadd.f32 %v1068_v9, %v1060_v63  ;;  %v7753_v59 = vpack.c.bf16 %v1386_v20, %v1384_v12  ;;  %v7756_v58 = vpack.c.bf16 %v1391_v22, %v1389_v46  ;;  %v1388_v40 = vld [vmem:[%s8926_s6 + $0x40] sm:$0xff]  ;;  %vm9261_vm6 = vmmov %vm9257_vm0  ;;  %v1086_v18 = vsub.s32 0, %v6661_v17 }
 0x543   :  { %5664 = vmatprep.subr.bf16.mxu0 %v7637_v37  ;;  %v1061_v6 = vmul.f32 %v1053_v8, %v1045_v26  ;;  %v7774_v38 = vpack.c.bf16 %v1390_v25, %v1388_v40  ;;  %v1090_v49 = vsub.s32 1, %v6661_v17  ;;  %vm1402_vm12 = vcmask 523264  }
 0x544   :  { %v7821_v44 = vrot.slane %v1082_v43, %v1086_v18  ;;  %vm3996_vm2 = vcmask 64512  }
 0x545   :  { %5261 = vmatmul.mubr.msk.f32.gmra.mrb[2].mxu0 %vm9244_vm11, %v7650_v48  ;;  %v1077_v4 = vadd.f32 %v1069_v7, %v1061_v6  ;;  %vm9260_vm11 = vmmov %vm9257_vm0  ;;  %v7827_v50 = vrot.slane %v1082_v43, %v1090_v49 }
 0x546   :  { %1194 = vmatprep.mubr.f32.mxu0 %v6506_v45 }
 0x549   :  { %5262 = vmatmul.mubr.msk.f32.gmra.mrb[4].mxu0 %vm9246_vm13, %v7665_v53  ;;  %vm1505_vm13 = vcmask 261120  }
 0x54a   :  { %1200 = vmatprep.mubr.f32.mxu0 %v6506_v45 }
 0x54d   :  { %5263 = vmatmul.mubr.msk.f32.gmra.mrb[6].mxu0 %vm9248_vm15, %v7679_v0 }
 0x54e   :  { %1206 = vmatprep.mubr.f32.mxu0 %v6506_v45 }
 0x551   :  { %5264 = vmatmul.mubr.msk.f32.gmra.mrb[8].mxu0 %vm9250_vm10, %v1074_v52 }
 0x552   :  { %1212 = vmatprep.mubr.f32.mxu0 %v6506_v45 }
 0x555   :  { %5265 = vmatmul.mubr.msk.f32.gmra.mrb[10].mxu0 %vm9251_vm8, %v1075_v61 }
 0x556   :  { %1218 = vmatprep.mubr.f32.mxu0 %v6506_v45 }
 0x559   :  { %5266 = vmatmul.mubr.msk.f32.gmra.mrb[12].mxu0 %vm9252_vm9, %v1076_v3 }
 0x55a   :  { %1224 = vmatprep.mubr.f32.mxu0 %v6506_v45 }
 0x55d   :  { %5267 = vmatmul.mubr.msk.f32.gmra.mrb[14].mxu0 %vm9253_vm1, %v1077_v4 }
 0x55e   :  { %1315 = vmatprep.mubr.f32.mxu0 %v6506_v45 }
 0x565   :  { %5268 = vmatmul.mubr.msk.f32.vlgmr.msra.gmra.mrb[14].mxu0 %vm9254_vm7, %v7634_v35  ;;  %v1393_v35 = vld [vmem:[%s8926_s6 + $0x68] sm:$0xff] }
 0x566   :  { %5666 = vmatpush1.bf16.msra.mxu0 %v7733_v14  ;;  %1321 = vmatprep.mubr.f32.mxu0 %v6506_v45  ;;  %v7777_v33 = vpack.c.bf16 %v1395_v36, %v1393_v35 }
 0x567   :  { %5668 = vmatprep.subr.bf16.mxu0 %v7735_v15 }
 0x569   :  { %5269 = vmatmul.mubr.msk.f32.gmra.mrb[12].mxu0 %vm9255_vm3, %v7650_v48  ;;  %v7789_v48 = vpack.c.bf16 %v1394_v39, %v1392_v41 }
 0x56a   :  { %1327 = vmatprep.mubr.f32.mxu0 %v6506_v45  ;;  %5670 = vmatpush1.bf16.msra.mxu0 %v7753_v59 }
 0x56b   :  { %5672 = vmatprep.subr.bf16.mxu0 %v7756_v58 }
 0x56d   :  { %5270 = vmatmul.mubr.msk.f32.gmra.mrb[10].mxu0 %vm9256_vm14, %v7665_v53 }
 0x56e   :  { %1333 = vmatprep.mubr.f32.mxu0 %v6506_v45  ;;  %5674 = vmatpush1.bf16.msra.mxu0 %v7774_v38 }
 0x56f   :  { %5676 = vmatprep.subr.bf16.mxu0 %v7777_v33 }
 0x571   :  { %5271 = vmatmul.mubr.msk.f32.gmra.mrb[8].mxu0 %vm9257_vm0, %v7679_v0  ;;  %vm5247_vm0 = vcmask 15360  }
 0x572   :  { %1339 = vmatprep.mubr.f32.mxu0 %v6506_v45  ;;  %5678 = vmatpush1.bf16.msra.mxu0 %v7789_v48 }
 0x573   :  { %5680 = vmatprep.subr.bf16.mxu0 %v7637_v37 }
 0x575   :  { %5272 = vmatmul.mubr.msk.f32.gmra.mrb[6].mxu0 %vm9258_vm4, %v1074_v52 }
 0x576   :  { %1345 = vmatprep.mubr.f32.mxu0 %v6506_v45 }
 0x579   :  { %5273 = vmatmul.mubr.msk.f32.gmra.mrb[4].mxu0 %vm9259_vm5, %v1075_v61 }
 0x57a   :  { %1351 = vmatprep.mubr.f32.mxu0 %v6506_v45 }
 0x57d   :  { %5274 = vmatmul.mubr.msk.f32.gmra.mrb[2].mxu0 %vm9260_vm11, %v1076_v3 }
 0x57e   :  { %1357 = vmatprep.mubr.f32.mxu0 %v6506_v45 }
 0x581   :  { %5275 = vmatmul.mubr.msk.f32.gmra.mrb[0].mxu0 %vm9261_vm6, %v1077_v4 }
 0x582   :  { %1470 = vmatprep.mubr.f32.mxu0 %v6506_v45 }
 0x589   :  { %1471 = vmatmul.mubr.f32.vlgmr.msra.gmra.mrb[0].mxu0 %v6506_v45 }
 0x58a   :  { %5682 = vmatpush1.bf16.msra.mxu0 %v7733_v14  ;;  %1583 = vmatprep.mubr.f32.mxu0 %v6506_v45 }
 0x58b   :  { %5684 = vmatprep.subr.bf16.mxu0 %v7735_v15 }
 0x58e   :  { %5686 = vmatpush1.bf16.msra.mxu0 %v7753_v59 }
 0x58f   :  { %5688 = vmatprep.subr.bf16.mxu0 %v7756_v58 }
 0x592   :  { %5690 = vmatpush1.bf16.msra.mxu0 %v7774_v38 }
 0x593   :  { %5692 = vmatprep.subr.bf16.mxu0 %v7777_v33 }
 0x596   :  { %5694 = vmatpush1.bf16.msra.mxu0 %v7789_v48 }
 0x597   :  { %5696 = vmatprep.subr.bf16.mxu0 %v7637_v37 }
 0x65c   :  { %v1472_v34 = vpop.f32.mrb[0].mxu0 }
 0x65d   :  { %v5983_v53 = vadd.f32 %v1472_v34, %v7821_v44  ;;  %v1474_v42 = vpop.f32.mrb[1].mxu0 }
 0x65e   :  { %v5984_v2 = vadd.f32 %v1474_v42, %v7827_v50 }
 0x65f   :  { %v5276_v47 = vmul.f32 -1.442695, %v5983_v53 }
 0x660   :  { %v5277_v54 = vmul.f32 -1.442695, %v5984_v2 }
 0x661   :  { %6186 = vpow2.f32 %v5276_v47 }
 0x662   :  { %6188 = vtanh.f32 %v5984_v2 }
 0x66b   :  { %v6187_v0 = vpop.eup %6186 }
 0x66c   :  { %v1482_v5 = vadd.f32 1.0, %v6187_v0  ;;  %v6189_v57 = vpop.eup %6188 }
 0x66e   :  { %6190 = vrcp.f32 %v1482_v5 }
 0x66f   :  { %6192 = vpow2.f32 %v5277_v54 }
 0x678   :  { %v6191_v51 = vpop.eup %6190 }
 0x679   :  { %v1493_v1 = vmul.f32 %v6191_v51, %v6189_v57  ;;  %v6193_v52 = vpop.eup %6192  ;;  %v1492_v60 = vmul.f32 0.0, %v6191_v51 }
 0x67a   :  { %v1489_v55 = vadd.f32 1.0, %v6193_v52 }
 0x67b   :  { %1495 = vrot.lane.b32.xlu0 %v1493_v1, %s6507_s5 }
 0x67c   :  { %6194 = vrcp.f32 %v1489_v55 }
 0x686   :  { %v6195_v62 = vpop.eup %6194 }
 0x6ed   :  { %v1496_v56 = vpop.permute.xlu0 %1495 }
 0x6ee   :  { %v1498_v27 = vadd.f32 %v1496_v56, %v1492_v60 }
 0x6f0   :  { %6196 = vtanh.f32 %v1498_v27 }
 0x6fa   :  { %v6197_v61 = vpop.eup %6196 }
 0x6fb   :  { %v7831_v63 = vmul.f32 %v6197_v61, %v6195_v62 }
 0x6fd   :  { %1502 = vrot.lane.b32.xlu1 %v7831_v63, %s6507_s5 }
 0x76f   :  { %v1503_v26 = vpop.permute.xlu1 %1502 }
 0x770   :  { %1506 = vst.msk [vmem:[#allocation4] sm:$0xff] %vm1505_vm13, %v1503_v26  ;;  %5278 = vmatmul.mubr.msk.f32.vlgmr.msra.gmra.mrb[2].mxu0 %vm1402_vm12, %v1503_v26 }
 0x771   :  { %5698 = vmatpush1.bf16.msra.mxu0 %v7733_v14  ;;  %1695 = vmatprep.mubr.f32.mxu0 %v6506_v45 }
 0x772   :  { %5700 = vmatprep.subr.bf16.mxu0 %v7735_v15 }
 0x775   :  { %5702 = vmatpush1.bf16.msra.mxu0 %v7753_v59 }
 0x776   :  { %5704 = vmatprep.subr.bf16.mxu0 %v7756_v58 }
 0x779   :  { %5706 = vmatpush1.bf16.msra.mxu0 %v7774_v38 }
 0x77a   :  { %5708 = vmatprep.subr.bf16.mxu0 %v7777_v33 }
 0x77d   :  { %5710 = vmatpush1.bf16.msra.mxu0 %v7789_v48 }
 0x77e   :  { %5712 = vmatprep.subr.bf16.mxu0 %v7637_v37 }
 0x843   :  { %v1585_v9 = vpop.f32.mrb[2].mxu0 }
 0x844   :  { %v5985_v8 = vadd.f32 %v1585_v9, %v7821_v44  ;;  %v1587_v3 = vpop.f32.mrb[3].mxu0 }
 0x845   :  { %v5986_v7 = vadd.f32 %v1587_v3, %v7827_v50 }
 0x846   :  { %v5279_v6 = vmul.f32 -1.442695, %v5985_v8 }
 0x847   :  { %v5280_v12 = vmul.f32 -1.442695, %v5986_v7 }
 0x848   :  { %6198 = vpow2.f32 %v5279_v6 }
 0x849   :  { %6200 = vtanh.f32 %v5986_v7 }
 0x852   :  { %v6199_v4 = vpop.eup %6198 }
 0x853   :  { %v1595_v10 = vadd.f32 1.0, %v6199_v4  ;;  %v6201_v19 = vpop.eup %6200 }
 0x855   :  { %6202 = vrcp.f32 %v1595_v10 }
 0x856   :  { %6204 = vpow2.f32 %v5280_v12 }
 0x85f   :  { %v6203_v11 = vpop.eup %6202 }
 0x860   :  { %v1606_v13 = vmul.f32 %v6203_v11, %v6201_v19  ;;  %v6205_v20 = vpop.eup %6204  ;;  %v1605_v22 = vmul.f32 %v6203_v11, %v1498_v27 }
 0x861   :  { %v1602_v46 = vadd.f32 1.0, %v6205_v20 }
 0x862   :  { %1608 = vrot.lane.b32.xlu1 %v1606_v13, %s6507_s5 }
 0x863   :  { %6206 = vrcp.f32 %v1602_v46 }
 0x86d   :  { %v6207_v35 = vpop.eup %6206 }
 0x8d4   :  { %v1609_v40 = vpop.permute.xlu1 %1608 }
 0x8d5   :  { %v1611_v25 = vadd.f32 %v1609_v40, %v1605_v22 }
 0x8d7   :  { %6208 = vtanh.f32 %v1611_v25 }
 0x8e1   :  { %v6209_v36 = vpop.eup %6208 }
 0x8e2   :  { %v7849_v41 = vmul.f32 %v6209_v36, %v6207_v35 }
 0x8e4   :  { %1615 = vrot.lane.b32.xlu1 %v7849_v41, %s6507_s5 }
 0x956   :  { %v1616_v39 = vpop.permute.xlu1 %1615 }
 0x957   :  { %1618 = vst.msk [vmem:[#allocation4 + $0x8] sm:$0xff] %vm1505_vm13, %v1616_v39  ;;  %5281 = vmatmul.mubr.msk.f32.vlgmr.msra.gmra.mrb[4].mxu0 %vm1402_vm12, %v1616_v39 }
 0x958   :  { %5714 = vmatpush1.bf16.msra.mxu0 %v7733_v14  ;;  %1807 = vmatprep.mubr.f32.mxu0 %v6506_v45 }
 0x959   :  { %5716 = vmatprep.subr.bf16.mxu0 %v7735_v15 }
 0x95c   :  { %5718 = vmatpush1.bf16.msra.mxu0 %v7753_v59 }
 0x95d   :  { %5720 = vmatprep.subr.bf16.mxu0 %v7756_v58 }
 0x960   :  { %5722 = vmatpush1.bf16.msra.mxu0 %v7774_v38 }
 0x961   :  { %5724 = vmatprep.subr.bf16.mxu0 %v7777_v33 }
 0x964   :  { %5726 = vmatpush1.bf16.msra.mxu0 %v7789_v48 }
 0x965   :  { %5728 = vmatprep.subr.bf16.mxu0 %v7637_v37 }
 0xa2a   :  { %v1697_v43 = vpop.f32.mrb[4].mxu0 }
 0xa2b   :  { %v5987_v34 = vadd.f32 %v1697_v43, %v7821_v44  ;;  %v1699_v53 = vpop.f32.mrb[5].mxu0 }
 0xa2c   :  { %v5988_v47 = vadd.f32 %v1699_v53, %v7827_v50 }
 0xa2d   :  { %v5282_v42 = vmul.f32 -1.442695, %v5987_v34 }
 0xa2e   :  { %v5283_v1 = vmul.f32 -1.442695, %v5988_v47 }
 0xa2f   :  { %6210 = vpow2.f32 %v5282_v42 }
 0xa30   :  { %6212 = vtanh.f32 %v5988_v47 }
 0xa39   :  { %v6211_v2 = vpop.eup %6210 }
 0xa3a   :  { %v1707_v0 = vadd.f32 1.0, %v6211_v2  ;;  %v6213_v5 = vpop.eup %6212 }
 0xa3c   :  { %6214 = vrcp.f32 %v1707_v0 }
 0xa3d   :  { %6216 = vpow2.f32 %v5283_v1 }
 0xa46   :  { %v6215_v57 = vpop.eup %6214 }
 0xa47   :  { %v1718_v51 = vmul.f32 %v6215_v57, %v6213_v5  ;;  %v6217_v54 = vpop.eup %6216  ;;  %v1717_v55 = vmul.f32 %v6215_v57, %v1611_v25 }
 0xa48   :  { %v1714_v52 = vadd.f32 1.0, %v6217_v54 }
 0xa49   :  { %1720 = vrot.lane.b32.xlu0 %v1718_v51, %s6507_s5 }
 0xa4a   :  { %6218 = vrcp.f32 %v1714_v52 }
 0xa54   :  { %v6219_v27 = vpop.eup %6218 }
 0xabb   :  { %v1721_v60 = vpop.permute.xlu0 %1720 }
 0xabc   :  { %v1723_v56 = vadd.f32 %v1721_v60, %v1717_v55 }
 0xabe   :  { %6220 = vtanh.f32 %v1723_v56 }
 0xac8   :  { %v6221_v62 = vpop.eup %6220 }
 0xac9   :  { %v7867_v61 = vmul.f32 %v6221_v62, %v6219_v27 }
 0xacb   :  { %1727 = vrot.lane.b32.xlu1 %v7867_v61, %s6507_s5 }
 0xb3d   :  { %v1728_v26 = vpop.permute.xlu1 %1727 }
 0xb3e   :  { %1730 = vst.msk [vmem:[#allocation4 + $0x10] sm:$0xff] %vm1505_vm13, %v1728_v26  ;;  %5284 = vmatmul.mubr.msk.f32.vlgmr.msra.gmra.mrb[6].mxu0 %vm1402_vm12, %v1728_v26 }
 0xb3f   :  { %5730 = vmatpush1.bf16.msra.mxu0 %v7733_v14  ;;  %1919 = vmatprep.mubr.f32.mxu0 %v6506_v45 }
 0xb40   :  { %5732 = vmatprep.subr.bf16.mxu0 %v7735_v15 }
 0xb43   :  { %5734 = vmatpush1.bf16.msra.mxu0 %v7753_v59 }
 0xb44   :  { %5736 = vmatprep.subr.bf16.mxu0 %v7756_v58 }
 0xb47   :  { %5738 = vmatpush1.bf16.msra.mxu0 %v7774_v38 }
 0xb48   :  { %5740 = vmatprep.subr.bf16.mxu0 %v7777_v33 }
 0xb4b   :  { %5742 = vmatpush1.bf16.msra.mxu0 %v7789_v48 }
 0xb4c   :  { %5744 = vmatprep.subr.bf16.mxu0 %v7637_v37 }
 0xc11   :  { %v1809_v9 = vpop.f32.mrb[6].mxu0 }
 0xc12   :  { %v5989_v8 = vadd.f32 %v1809_v9, %v7821_v44  ;;  %v1811_v3 = vpop.f32.mrb[7].mxu0 }
 0xc13   :  { %v5990_v7 = vadd.f32 %v1811_v3, %v7827_v50 }
 0xc14   :  { %v5285_v6 = vmul.f32 -1.442695, %v5989_v8 }
 0xc15   :  { %v5286_v12 = vmul.f32 -1.442695, %v5990_v7 }
 0xc16   :  { %6222 = vpow2.f32 %v5285_v6 }
 0xc17   :  { %6224 = vtanh.f32 %v5990_v7 }
 0xc20   :  { %v6223_v4 = vpop.eup %6222 }
 0xc21   :  { %v1819_v10 = vadd.f32 1.0, %v6223_v4  ;;  %v6225_v19 = vpop.eup %6224 }
 0xc23   :  { %6226 = vrcp.f32 %v1819_v10 }
 0xc24   :  { %6228 = vpow2.f32 %v5286_v12 }
 0xc2d   :  { %v6227_v11 = vpop.eup %6226 }
 0xc2e   :  { %v1830_v13 = vmul.f32 %v6227_v11, %v6225_v19  ;;  %v6229_v20 = vpop.eup %6228  ;;  %v1829_v22 = vmul.f32 %v6227_v11, %v1723_v56 }
 0xc2f   :  { %v1826_v46 = vadd.f32 1.0, %v6229_v20 }
 0xc30   :  { %1832 = vrot.lane.b32.xlu0 %v1830_v13, %s6507_s5 }
 0xc31   :  { %6230 = vrcp.f32 %v1826_v46 }
 0xc3b   :  { %v6231_v35 = vpop.eup %6230 }
 0xca2   :  { %v1833_v40 = vpop.permute.xlu0 %1832 }
 0xca3   :  { %v1835_v25 = vadd.f32 %v1833_v40, %v1829_v22 }
 0xca5   :  { %6232 = vtanh.f32 %v1835_v25 }
 0xcaf   :  { %v6233_v36 = vpop.eup %6232 }
 0xcb0   :  { %v7885_v39 = vmul.f32 %v6233_v36, %v6231_v35 }
 0xcb2   :  { %1839 = vrot.lane.b32.xlu1 %v7885_v39, %s6507_s5 }
 0xd24   :  { %v1840_v43 = vpop.permute.xlu1 %1839 }
 0xd25   :  { %1842 = vst.msk [vmem:[#allocation4 + $0x18] sm:$0xff] %vm1505_vm13, %v1840_v43  ;;  %5287 = vmatmul.mubr.msk.f32.vlgmr.msra.gmra.mrb[8].mxu0 %vm1402_vm12, %v1840_v43 }
 0xd26   :  { %5746 = vmatpush1.bf16.msra.mxu0 %v7733_v14  ;;  %2031 = vmatprep.mubr.f32.mxu0 %v6506_v45 }
 0xd27   :  { %5748 = vmatprep.subr.bf16.mxu0 %v7735_v15 }
 0xd2a   :  { %5750 = vmatpush1.bf16.msra.mxu0 %v7753_v59 }
 0xd2b   :  { %5752 = vmatprep.subr.bf16.mxu0 %v7756_v58 }
 0xd2e   :  { %5754 = vmatpush1.bf16.msra.mxu0 %v7774_v38 }
 0xd2f   :  { %5756 = vmatprep.subr.bf16.mxu0 %v7777_v33 }
 0xd32   :  { %5758 = vmatpush1.bf16.msra.mxu0 %v7789_v48 }
 0xd33   :  { %5760 = vmatprep.subr.bf16.mxu0 %v7637_v37 }
 0xdf8   :  { %v1921_v34 = vpop.f32.mrb[8].mxu0 }
 0xdf9   :  { %v5991_v53 = vadd.f32 %v1921_v34, %v7821_v44  ;;  %v1923_v42 = vpop.f32.mrb[9].mxu0 }
 0xdfa   :  { %v5992_v2 = vadd.f32 %v1923_v42, %v7827_v50 }
 0xdfb   :  { %v5288_v47 = vmul.f32 -1.442695, %v5991_v53 }
 0xdfc   :  { %v5289_v54 = vmul.f32 -1.442695, %v5992_v2 }
 0xdfd   :  { %6234 = vpow2.f32 %v5288_v47 }
 0xdfe   :  { %6236 = vtanh.f32 %v5992_v2 }
 0xe07   :  { %v6235_v0 = vpop.eup %6234 }
 0xe08   :  { %v1931_v5 = vadd.f32 1.0, %v6235_v0  ;;  %v6237_v57 = vpop.eup %6236 }
 0xe0a   :  { %6238 = vrcp.f32 %v1931_v5 }
 0xe0b   :  { %6240 = vpow2.f32 %v5289_v54 }
 0xe14   :  { %v6239_v51 = vpop.eup %6238 }
 0xe15   :  { %v1942_v1 = vmul.f32 %v6239_v51, %v6237_v57  ;;  %v6241_v52 = vpop.eup %6240  ;;  %v1941_v60 = vmul.f32 %v6239_v51, %v1835_v25 }
 0xe16   :  { %v1938_v55 = vadd.f32 1.0, %v6241_v52 }
 0xe17   :  { %1944 = vrot.lane.b32.xlu0 %v1942_v1, %s6507_s5 }
 0xe18   :  { %6242 = vrcp.f32 %v1938_v55 }
 0xe22   :  { %v6243_v62 = vpop.eup %6242 }
 0xe89   :  { %v1945_v56 = vpop.permute.xlu0 %1944 }
 0xe8a   :  { %v1947_v27 = vadd.f32 %v1945_v56, %v1941_v60 }
 0xe8c   :  { %6244 = vtanh.f32 %v1947_v27 }
 0xe96   :  { %v6245_v26 = vpop.eup %6244 }
 0xe97   :  { %v7903_v9 = vmul.f32 %v6245_v26, %v6243_v62 }
 0xe99   :  { %1951 = vrot.lane.b32.xlu1 %v7903_v9, %s6507_s5 }
 0xf0b   :  { %v1952_v8 = vpop.permute.xlu1 %1951 }
 0xf0c   :  { %1954 = vst.msk [vmem:[#allocation4 + $0x20] sm:$0xff] %vm1505_vm13, %v1952_v8  ;;  %5290 = vmatmul.mubr.msk.f32.vlgmr.msra.gmra.mrb[10].mxu0 %vm1402_vm12, %v1952_v8 }
 0xf0d   :  { %5762 = vmatpush1.bf16.msra.mxu0 %v7733_v14  ;;  %2143 = vmatprep.mubr.f32.mxu0 %v6506_v45 }
 0xf0e   :  { %5764 = vmatprep.subr.bf16.mxu0 %v7735_v15 }
 0xf11   :  { %5766 = vmatpush1.bf16.msra.mxu0 %v7753_v59 }
 0xf12   :  { %5768 = vmatprep.subr.bf16.mxu0 %v7756_v58 }
 0xf15   :  { %5770 = vmatpush1.bf16.msra.mxu0 %v7774_v38 }
 0xf16   :  { %5772 = vmatprep.subr.bf16.mxu0 %v7777_v33 }
 0xf19   :  { %5774 = vmatpush1.bf16.msra.mxu0 %v7789_v48 }
 0xf1a   :  { %5776 = vmatprep.subr.bf16.mxu0 %v7637_v37 }
 0xfdf   :  { %v2033_v3 = vpop.f32.mrb[10].mxu0 }
 0xfe0   :  { %v5993_v6 = vadd.f32 %v2033_v3, %v7821_v44  ;;  %v2035_v7 = vpop.f32.mrb[11].mxu0 }
 0xfe1   :  { %v5994_v10 = vadd.f32 %v2035_v7, %v7827_v50 }
 0xfe2   :  { %v5291_v4 = vmul.f32 -1.442695, %v5993_v6 }
 0xfe3   :  { %v5292_v46 = vmul.f32 -1.442695, %v5994_v10 }
 0xfe4   :  { %6246 = vpow2.f32 %v5291_v4 }
 0xfe5   :  { %6248 = vtanh.f32 %v5994_v10 }
 0xfee   :  { %v6247_v19 = vpop.eup %6246 }
 0xfef   :  { %v2043_v11 = vadd.f32 1.0, %v6247_v19  ;;  %v6249_v13 = vpop.eup %6248 }
 0xff1   :  { %6250 = vrcp.f32 %v2043_v11 }
 0xff2   :  { %6252 = vpow2.f32 %v5292_v46 }
 0xffb   :  { %v6251_v12 = vpop.eup %6250 }
 0xffc   :  { %v2054_v20 = vmul.f32 %v6251_v12, %v6249_v13  ;;  %v6253_v37 = vpop.eup %6252  ;;  %v2053_v40 = vmul.f32 %v6251_v12, %v1947_v27 }
 0xffd   :  { %v2050_v22 = vadd.f32 1.0, %v6253_v37  ;;  %v2321_v37 = vld [vmem:[%s8928_s8 + $0x10] sm:$0xff] }
 0xffe   :  { %2056 = vrot.lane.b32.xlu0 %v2054_v20, %s6507_s5 }
 0xfff   :  { %6254 = vrcp.f32 %v2050_v22  ;;  %v2324_v22 = vld [vmem:[%s8928_s8 + $0x28] sm:$0xff] }
0x1009   :  { %v6255_v36 = vpop.eup %6254 }
0x1070   :  { %v2057_v25 = vpop.permute.xlu0 %2056 }
0x1071   :  { %v2059_v35 = vadd.f32 %v2057_v25, %v2053_v40 }
0x1073   :  { %6256 = vtanh.f32 %v2059_v35 }
0x107d   :  { %v6257_v43 = vpop.eup %6256 }
0x107e   :  { %v7921_v34 = vmul.f32 %v6257_v43, %v6255_v36  ;;  %v2323_v43 = vld [vmem:[%s8928_s8 + $0x20] sm:$0xff] }
0x1080   :  { %2063 = vrot.lane.b32.xlu1 %v7921_v34, %s6507_s5 }
0x10f2   :  { %v2064_v53 = vpop.permute.xlu1 %2063 }
0x10f3   :  { %2066 = vst.msk [vmem:[#allocation4 + $0x28] sm:$0xff] %vm1505_vm13, %v2064_v53  ;;  %5293 = vmatmul.mubr.msk.f32.vlgmr.msra.gmra.mrb[12].mxu0 %vm1402_vm12, %v2064_v53  ;;  %v2325_v53 = vld [vmem:[%s8928_s8 + $0x30] sm:$0xff] }
0x10f4   :  { %5778 = vmatpush1.bf16.msra.mxu0 %v7733_v14  ;;  %2255 = vmatprep.mubr.f32.mxu0 %v6506_v45 }
0x10f5   :  { %5780 = vmatprep.subr.bf16.mxu0 %v7735_v15 }
0x10f8   :  { %5782 = vmatpush1.bf16.msra.mxu0 %v7753_v59 }
0x10f9   :  { %5784 = vmatprep.subr.bf16.mxu0 %v7756_v58 }
0x10fc   :  { %5786 = vmatpush1.bf16.msra.mxu0 %v7774_v38 }
0x10fd   :  { %5788 = vmatprep.subr.bf16.mxu0 %v7777_v33 }
0x1100   :  { %5790 = vmatpush1.bf16.msra.mxu0 %v7789_v48 }
0x11c6   :  { %v2145_v42 = vpop.f32.mrb[12].mxu0 }
0x11c7   :  { %v5995_v47 = vadd.f32 %v2145_v42, %v7821_v44  ;;  %v2147_v2 = vpop.f32.mrb[13].mxu0 }
0x11c8   :  { %v5996_v14 = vadd.f32 %v2147_v2, %v7827_v50  ;;  %v2312_v2 = vld [vmem:[%s8929_s7 + $0x8] sm:$0xff] }
0x11c9   :  { %v5294_v0 = vmul.f32 -1.442695, %v5995_v47  ;;  %v5797_v47 = vpack.c.bf16 %v2325_v53, %v2323_v43  ;;  %v8099_v43 = vld [vmem:[#allocation4] sm:$0xff]  ;;  %v2646_v53 = vld [vmem:[%s8932_s9 + $0x8] sm:$0xff] }
0x11ca   :  { %v5295_v38 = vmul.f32 -1.442695, %v5996_v14 }
0x11cb   :  { %6258 = vpow2.f32 %v5294_v0  ;;  %v2314_v0 = vld [vmem:[%s8929_s7 + $0x18] sm:$0xff] }
0x11cc   :  { %6260 = vtanh.f32 %v5996_v14  ;;  %v5799_v14 = vpack.c.bf16 %v2314_v0, %v2312_v2  ;;  %v8110_v0 = vld [vmem:[#allocation4 + $0x8] sm:$0xff] }
0x11d5   :  { %v6259_v5 = vpop.eup %6258 }
0x11d6   :  { %v2155_v15 = vadd.f32 1.0, %v6259_v5  ;;  %v6261_v59 = vpop.eup %6260 }
0x11d8   :  { %6262 = vrcp.f32 %v2155_v15 }
0x11d9   :  { %6264 = vpow2.f32 %v5295_v38 }
0x11e2   :  { %v6263_v58 = vpop.eup %6262 }
0x11e3   :  { %v2166_v57 = vmul.f32 %v6263_v58, %v6261_v59  ;;  %v6265_v33 = vpop.eup %6264  ;;  %v2165_v51 = vmul.f32 %v6263_v58, %v2059_v35  ;;  %v2326_v35 = vld [vmem:[%s8928_s8 + $0x38] sm:$0xff]  ;;  %v3837_v58 = vld [vmem:[%s8930_s13] sm:$0xff] }
0x11e4   :  { %v2162_v48 = vadd.f32 1.0, %v6265_v33  ;;  %v5795_v36 = vpack.c.bf16 %v2326_v35, %v2324_v22  ;;  %v2660_v22 = vld [vmem:[%s8931_s10 + $0x38] sm:$0xff]  ;;  %v2657_v35 = vld [vmem:[%s8931_s10 + $0x20] sm:$0xff] }
0x11e5   :  { %2168 = vrot.lane.b32.xlu0 %v2166_v57, %s6507_s5  ;;  %v3838_v57 = vld [vmem:[%s8930_s13 + $0x8] sm:$0xff] }
0x11e6   :  { %6266 = vrcp.f32 %v2162_v48  ;;  %v5951_v33 = vpack.c.bf16 %v3838_v57, %v3837_v58  ;;  %v3839_v48 = vld [vmem:[%s8930_s13 + $0x10] sm:$0xff] }
0x11e8   :  { %5952 = vmatprep.subr.bf16.mxu0 %v5951_v33 }
0x11f0   :  { %v6267_v52 = vpop.eup %6266 }
0x1257   :  { %v2169_v1 = vpop.permute.xlu0 %2168 }
0x1258   :  { %v2171_v54 = vadd.f32 %v2169_v1, %v2165_v51  ;;  %v3840_v51 = vld [vmem:[%s8930_s13 + $0x18] sm:$0xff] }
0x125a   :  { %6268 = vtanh.f32 %v2171_v54 }
0x1264   :  { %v6269_v55 = vpop.eup %6268 }
0x1265   :  { %v2173_v60 = vmul.f32 %v6269_v55, %v6267_v52  ;;  %v2311_v55 = vld [vmem:[%s8929_s7] sm:$0xff] }
0x1267   :  { %2175 = vrot.lane.b32.xlu1 %v2173_v60, %s6507_s5 }
0x12d9   :  { %v2176_v56 = vpop.permute.xlu1 %2175 }
0x12da   :  { %2178 = vst.msk [vmem:[#allocation4 + $0x30] sm:$0xff] %vm1505_vm13, %v2176_v56  ;;  %5296 = vmatmul.mubr.msk.f32.vlgmr.msra.gmra.mrb[14].mxu0 %vm1402_vm12, %v2176_v56 }
0x12db   :  { %5954 = vmatpush3.bf16.msra.mxu0 %v5951_v33  ;;  %v2647_v33 = vld [vmem:[%s8932_s9 + $0x10] sm:$0xff] }
0x12e1   :  { %v8135_v58 = vld [vmem:[#allocation4 + $0x30] sm:$0xff] }
0x13ad   :  { %v2257_v27 = vpop.f32.mrb[14].mxu0 }
0x13ae   :  { %v5997_v62 = vadd.f32 %v2257_v27, %v7821_v44  ;;  %v2259_v26 = vpop.f32.mrb[15].mxu0  ;;  %v2320_v44 = vld [vmem:[%s8928_s8 + $0x8] sm:$0xff] }
0x13af   :  { %v5998_v3 = vadd.f32 %v2259_v26, %v7827_v50  ;;  %v2322_v50 = vld [vmem:[%s8928_s8 + $0x18] sm:$0xff]  ;;  %v2317_v26 = vld [vmem:[%s8929_s7 + $0x30] sm:$0xff] }
0x13b0   :  { %v5297_v8 = vmul.f32 -1.442695, %v5997_v62  ;;  %v5791_v11 = vpack.c.bf16 %v2322_v50, %v2320_v44  ;;  %v2315_v62 = vld [vmem:[%s8929_s7 + $0x20] sm:$0xff] }
0x13b1   :  { %v5298_v13 = vmul.f32 -1.442695, %v5998_v3 }
0x13b2   :  { %6270 = vpow2.f32 %v5297_v8  ;;  %5792 = vmatprep.subr.bf16.mxu1 %v5791_v11 }
0x13b3   :  { %6272 = vtanh.f32 %v5998_v3 }
0x13bc   :  { %v6271_v6 = vpop.eup %6270 }
0x13bd   :  { %v2267_v7 = vadd.f32 1.0, %v6271_v6  ;;  %v6273_v4 = vpop.eup %6272  ;;  %v2654_v6 = vld [vmem:[%s8931_s10 + $0x8] sm:$0xff] }
0x13bf   :  { %6274 = vrcp.f32 %v2267_v7  ;;  %v2656_v7 = vld [vmem:[%s8931_s10 + $0x18] sm:$0xff] }
0x13c0   :  { %6276 = vpow2.f32 %v5298_v13 }
0x13c9   :  { %v6275_v10 = vpop.eup %6274 }
0x13ca   :  { %v2278_v19 = vmul.f32 %v6275_v10, %v6273_v4  ;;  %v6277_v12 = vpop.eup %6276  ;;  %v2277_v20 = vmul.f32 %v6275_v10, %v2171_v54  ;;  %v5955_v54 = vpack.c.bf16 %v3840_v51, %v3839_v48  ;;  %v5805_v4 = vpack.c.bf16 %v2317_v26, %v2315_v62  ;;  %v2650_v48 = vld [vmem:[%s8932_s9 + $0x28] sm:$0xff]  ;;  %v2652_v51 = vld [vmem:[%s8932_s9 + $0x38] sm:$0xff]  ;;  %v2905_v62 = vld [vmem:[%s8933_s12 + $0x10] sm:$0xff] }
0x13cb   :  { %v5807_v10 = vpack.c.bf16 %v2656_v7, %v2654_v6  ;;  %v2908_v26 = vld [vmem:[%s8933_s12 + $0x28] sm:$0xff]  ;;  %v2907_v7 = vld [vmem:[%s8933_s12 + $0x20] sm:$0xff] }
0x13cc   :  { %2280 = vrot.lane.b32.xlu0 %v2278_v19, %s6507_s5  ;;  %5956 = vmatprep.subr.bf16.mxu0 %v5955_v54 }
0x13cd   :  { %5958 = vmatpush3.bf16.msra.mxu0 %v5955_v54  ;;  %v5819_v54 = vpack.c.bf16 %v2652_v51, %v2650_v48 }
0x13d0   :  { %2179 = vrot.lane.b32.xlu0 %v2173_v60, %s6508_s22 }
0x13d4   :  { %1955 = vrot.lane.b32.xlu0 %v7903_v9, %s6508_s22  ;;  %v2274_v9 = vadd.f32 1.0, %v6277_v12 }
0x13d6   :  { %6278 = vrcp.f32 %v2274_v9 }
0x13d8   :  { %1731 = vrot.lane.b32.xlu0 %v7867_v61, %s6508_s22 }
0x13dc   :  { %1507 = vrot.lane.b32.xlu0 %v7831_v63, %s6508_s22  ;;  %v2319_v63 = vld [vmem:[%s8928_s8] sm:$0xff] }
0x13dd   :  { %v5793_v25 = vpack.c.bf16 %v2321_v37, %v2319_v63  ;;  %v2658_v37 = vld [vmem:[%s8931_s10 + $0x28] sm:$0xff] }
0x13df   :  { %5794 = vmatpush1.bf16.msra.mxu1 %v5793_v25  ;;  %v5811_v25 = vpack.c.bf16 %v2660_v22, %v2658_v37  ;;  %v2917_v37 = vld [vmem:[%s8933_s12 + $0x70] sm:$0xff] }
0x13e0   :  { %5796 = vmatprep.subr.bf16.mxu1 %v5795_v36  ;;  %v6279_v5 = vpop.eup %6278  ;;  %v2659_v36 = vld [vmem:[%s8931_s10 + $0x30] sm:$0xff] }
0x13e3   :  { %5798 = vmatpush1.bf16.msra.mxu1 %v5797_v47  ;;  %v5813_v47 = vpack.c.bf16 %v2659_v36, %v2657_v35 }
0x13e4   :  { %5800 = vmatprep.subr.bf16.mxu1 %v5799_v14  ;;  %v8115_v14 = vld [vmem:[#allocation4 + $0x10] sm:$0xff] }
0x143e   :  { %v2281_v46 = vpop.permute.xlu0 %2280 }
0x143f   :  { %v2283_v61 = vadd.f32 %v2281_v46, %v2277_v20  ;;  %v2653_v46 = vld [vmem:[%s8931_s10] sm:$0xff] }
0x1441   :  { %6280 = vtanh.f32 %v2283_v61  ;;  %v2655_v61 = vld [vmem:[%s8931_s10 + $0x10] sm:$0xff] }
0x1442   :  { %v2180_v40 = vpop.permute.xlu0 %2179 }
0x1443   :  { %2182 = vst.msk [vmem:[#allocation5 + $0x8] sm:$0xff] %vm1505_vm13, %v2180_v40  ;;  %v5809_v40 = vpack.c.bf16 %v2655_v61, %v2653_v46 }
0x1446   :  { %v1956_v42 = vpop.permute.xlu0 %1955 }
0x1447   :  { %1958 = vst.msk [vmem:[#allocation5 + $0x18] sm:$0xff] %vm1505_vm13, %v1956_v42  ;;  %v2648_v42 = vld [vmem:[%s8932_s9 + $0x18] sm:$0xff] }
0x1448   :  { %v5815_v2 = vpack.c.bf16 %v2648_v42, %v2646_v53 }
0x144a   :  { %v1732_v15 = vpop.permute.xlu0 %1731  ;;  %v8040_v44 = vld [vmem:[#allocation5 + $0x8] sm:$0xff] }
0x144b   :  { %v6281_v59 = vpop.eup %6280  ;;  %1734 = vst.msk [vmem:[#allocation5 + $0x28] sm:$0xff] %vm1505_vm13, %v1732_v15  ;;  %v8125_v15 = vld [vmem:[#allocation4 + $0x20] sm:$0xff] }
0x144c   :  { %v2285_v38 = vmul.f32 %v6281_v59, %v6279_v5  ;;  %v8120_v5 = vld [vmem:[#allocation4 + $0x18] sm:$0xff]  ;;  %v8130_v59 = vld [vmem:[#allocation4 + $0x28] sm:$0xff] }
0x144e   :  { %2291 = vrot.lane.b32.xlu1 %v2285_v38, %s6508_s22  ;;  %v1508_v1 = vpop.permute.xlu0 %1507  ;;  %v8056_v13 = vld [vmem:[#allocation5 + $0x18] sm:$0xff] }
0x144f   :  { %1510 = vst.msk [vmem:[#allocation5 + $0x38] sm:$0xff] %vm1505_vm13, %v1508_v1 }
0x1452   :  { %2067 = vrot.lane.b32.xlu1 %v7921_v34, %s6508_s22  ;;  %v2313_v34 = vld [vmem:[%s8929_s7 + $0x10] sm:$0xff]  ;;  %v8066_v9 = vld [vmem:[#allocation5 + $0x28] sm:$0xff] }
0x1453   :  { %v5801_v56 = vpack.c.bf16 %v2313_v34, %v2311_v55  ;;  %v2649_v55 = vld [vmem:[%s8932_s9 + $0x20] sm:$0xff]  ;;  %v2651_v34 = vld [vmem:[%s8932_s9 + $0x30] sm:$0xff] }
0x1456   :  { %1843 = vrot.lane.b32.xlu1 %v7885_v39, %s6508_s22  ;;  %v2318_v39 = vld [vmem:[%s8929_s7 + $0x38] sm:$0xff] }
0x1457   :  { %v8082_v63 = vld [vmem:[#allocation5 + $0x38] sm:$0xff] }
0x145a   :  { %1619 = vrot.lane.b32.xlu1 %v7849_v41, %s6508_s22  ;;  %v2316_v41 = vld [vmem:[%s8929_s7 + $0x28] sm:$0xff] }
0x145b   :  { %v5803_v27 = vpack.c.bf16 %v2318_v39, %v2316_v41  ;;  %v2906_v41 = vld [vmem:[%s8933_s12 + $0x18] sm:$0xff]  ;;  %v5821_v39 = vpack.c.bf16 %v2651_v34, %v2649_v55 }
0x145e   :  { %2287 = vrot.lane.b32.xlu1 %v2285_v38, %s6507_s5  ;;  %v2645_v38 = vld [vmem:[%s8932_s9] sm:$0xff] }
0x145f   :  { %v5817_v1 = vpack.c.bf16 %v2647_v33, %v2645_v38 }
0x14c0   :  { %v8005_v52 = vpop.permute.xlu1 %2291 }
0x14c1   :  { %2294 = vst.msk [vmem:[#allocation5] sm:$0xff] %vm1505_vm13, %v8005_v52 }
0x14c4   :  { %v2068_v60 = vpop.permute.xlu1 %2067 }
0x14c5   :  { %2070 = vst.msk [vmem:[#allocation5 + $0x10] sm:$0xff] %vm1505_vm13, %v2068_v60  ;;  %v2904_v60 = vld [vmem:[%s8933_s12 + $0x8] sm:$0xff] }
0x14c8   :  { %v1844_v8 = vpop.permute.xlu1 %1843  ;;  %v8028_v3 = vld [vmem:[#allocation5] sm:$0xff] }
0x14c9   :  { %1846 = vst.msk [vmem:[#allocation5 + $0x20] sm:$0xff] %vm1505_vm13, %v1844_v8  ;;  %5299 = vmatmul.mubr.msk.f32.vlgmr.msra.gmra.mrb[0].mxu1 %vm1505_vm13, %v8028_v3  ;;  %v2910_v8 = vld [vmem:[%s8933_s12 + $0x38] sm:$0xff] }
0x14ca   :  { %5802 = vmatpush1.bf16.msra.mxu1 %v5801_v56  ;;  %2421 = vmatprep.mubr.f32.mxu1 %v6506_v45  ;;  %v8172_v56 = vpack.c.bf16 %v2906_v41, %v2904_v60  ;;  %v8210_v6 = vpack.c.bf16 %v2910_v8, %v2908_v26 }
0x14cb   :  { %5804 = vmatprep.subr.bf16.mxu1 %v5803_v27  ;;  %v2903_v27 = vld [vmem:[%s8933_s12] sm:$0xff] }
0x14cc   :  { %v1620_v19 = vpop.permute.xlu1 %1619  ;;  %v8048_v11 = vld [vmem:[#allocation5 + $0x10] sm:$0xff] }
0x14cd   :  { %1622 = vst.msk [vmem:[#allocation5 + $0x30] sm:$0xff] %vm1505_vm13, %v1620_v19  ;;  %5300 = vmatmul.mubr.msk.f32.gmra.mrb[2].mxu1 %vm1505_vm13, %v8040_v44  ;;  %v2914_v19 = vld [vmem:[%s8933_s12 + $0x58] sm:$0xff] }
0x14ce   :  { %2427 = vmatprep.mubr.f32.mxu1 %v6506_v45  ;;  %5806 = vmatpush1.bf16.msra.mxu1 %v5805_v4  ;;  %v2909_v4 = vld [vmem:[%s8933_s12 + $0x30] sm:$0xff] }
0x14cf   :  { %5808 = vmatprep.subr.bf16.mxu1 %v5807_v10  ;;  %v2912_v10 = vld [vmem:[%s8933_s12 + $0x48] sm:$0xff] }
0x14d0   :  { %v8046_v50 = vpop.permute.xlu1 %2287  ;;  %v8061_v12 = vld [vmem:[#allocation5 + $0x20] sm:$0xff] }
0x14d1   :  { %2290 = vst.msk [vmem:[#allocation4 + $0x38] sm:$0xff] %vm1505_vm13, %v8046_v50  ;;  %5301 = vmatmul.mubr.msk.f32.gmra.mrb[4].mxu1 %vm1505_vm13, %v8048_v11  ;;  %5539 = vmatprep.subr.mxu0 %v8046_v50 }
0x14d2   :  { %2433 = vmatprep.mubr.f32.mxu1 %v6506_v45 }
0x14d4   :  { %v8071_v20 = vld [vmem:[#allocation5 + $0x30] sm:$0xff] }
0x14d5   :  { %5302 = vmatmul.mubr.msk.f32.gmra.mrb[6].mxu1 %vm1505_vm13, %v8056_v13 }
0x14d6   :  { %2439 = vmatprep.mubr.f32.mxu1 %v6506_v45 }
0x14d8   :  { %v8140_v57 = vld [vmem:[#allocation4 + $0x38] sm:$0xff] }
0x14d9   :  { %5303 = vmatmul.mubr.msk.f32.gmra.mrb[8].mxu1 %vm1505_vm13, %v8061_v12 }
0x14da   :  { %2445 = vmatprep.mubr.f32.mxu1 %v6506_v45 }
0x14dd   :  { %5304 = vmatmul.mubr.msk.f32.gmra.mrb[10].mxu1 %vm1505_vm13, %v8066_v9 }
0x14de   :  { %2451 = vmatprep.mubr.f32.mxu1 %v6506_v45 }
0x14e1   :  { %5305 = vmatmul.mubr.msk.f32.gmra.mrb[12].mxu1 %vm1505_vm13, %v8071_v20 }
0x14e2   :  { %2457 = vmatprep.mubr.f32.mxu1 %v6506_v45 }
0x14e5   :  { %5306 = vmatmul.mubr.msk.f32.gmra.mrb[14].mxu1 %vm1505_vm13, %v8082_v63 }
0x14e6   :  { %2552 = vmatprep.mubr.f32.mxu1 %v6506_v45 }
0x14e9   :  { %5307 = vmatmul.mubr.msk.f32.vlgmr.msra.gmra.mrb[0].mxu1 %vm1505_vm13, %v8099_v43 }
0x14ea   :  { %5810 = vmatpush1.bf16.msra.mxu1 %v5809_v40  ;;  %2558 = vmatprep.mubr.f32.mxu1 %v6506_v45  ;;  %v2601_v40 = vld [vmem:[%s8934_s11] sm:$0x3] }
0x14eb   :  { %5812 = vmatprep.subr.bf16.mxu1 %v5811_v25  ;;  %v8299_v25 = vrot.slane %v2601_v40, %v1086_v18  ;;  %v8304_v42 = vrot.slane %v2601_v40, %v1090_v49 }
0x14ed   :  { %5308 = vmatmul.mubr.msk.f32.gmra.mrb[2].mxu1 %vm1505_vm13, %v8110_v0 }
0x14ee   :  { %2564 = vmatprep.mubr.f32.mxu1 %v6506_v45  ;;  %5814 = vmatpush1.bf16.msra.mxu1 %v5813_v47 }
0x14ef   :  { %5816 = vmatprep.subr.bf16.mxu1 %v5815_v2 }
0x14f1   :  { %5309 = vmatmul.mubr.msk.f32.gmra.mrb[4].mxu1 %vm1505_vm13, %v8115_v14 }
0x14f2   :  { %2570 = vmatprep.mubr.f32.mxu1 %v6506_v45 }
0x14f5   :  { %5310 = vmatmul.mubr.msk.f32.gmra.mrb[6].mxu1 %vm1505_vm13, %v8120_v5 }
0x14f6   :  { %2576 = vmatprep.mubr.f32.mxu1 %v6506_v45 }
0x14f9   :  { %5311 = vmatmul.mubr.msk.f32.gmra.mrb[8].mxu1 %vm1505_vm13, %v8125_v15 }
0x14fa   :  { %2582 = vmatprep.mubr.f32.mxu1 %v6506_v45 }
0x14fd   :  { %5312 = vmatmul.mubr.msk.f32.gmra.mrb[10].mxu1 %vm1505_vm13, %v8130_v59 }
0x14fe   :  { %2588 = vmatprep.mubr.f32.mxu1 %v6506_v45 }
0x1501   :  { %5313 = vmatmul.mubr.msk.f32.gmra.mrb[12].mxu1 %vm1505_vm13, %v8135_v58 }
0x1502   :  { %2594 = vmatprep.mubr.f32.mxu1 %v6506_v45 }
0x1505   :  { %5314 = vmatmul.mubr.msk.f32.gmra.mrb[14].mxu1 %vm1505_vm13, %v8140_v57 }
0x1506   :  { %2725 = vmatprep.mubr.f32.mxu1 %v6506_v45 }
0x150d   :  { %5315 = vmatmul.mubr.msk.f32.vlgmr.msra.gmra.mrb[14].mxu1 %vm1505_vm13, %v8028_v3  ;;  %v8208_v3 = vpack.c.bf16 %v2905_v62, %v2903_v27 }
0x150e   :  { %5818 = vmatpush1.bf16.msra.mxu1 %v5817_v1  ;;  %2731 = vmatprep.mubr.f32.mxu1 %v6506_v45 }
0x150f   :  { %5820 = vmatprep.subr.bf16.mxu1 %v5819_v54 }
0x1511   :  { %5316 = vmatmul.mubr.msk.f32.gmra.mrb[12].mxu1 %vm1505_vm13, %v8040_v44  ;;  %v8228_v44 = vpack.c.bf16 %v2909_v4, %v2907_v7 }
0x1512   :  { %2737 = vmatprep.mubr.f32.mxu1 %v6506_v45  ;;  %5822 = vmatpush1.bf16.msra.mxu1 %v5821_v39 }
0x1513   :  { %5824 = vmatprep.subr.bf16.mxu1 %v8172_v56 }
0x1515   :  { %5317 = vmatmul.mubr.msk.f32.gmra.mrb[10].mxu1 %vm1505_vm13, %v8048_v11  ;;  %v8231_v11 = vpack.c.bf16 %v2914_v19, %v2912_v10 }
0x1516   :  { %2743 = vmatprep.mubr.f32.mxu1 %v6506_v45 }
0x1519   :  { %5318 = vmatmul.mubr.msk.f32.gmra.mrb[8].mxu1 %vm1505_vm13, %v8056_v13  ;;  %v2911_v13 = vld [vmem:[%s8933_s12 + $0x40] sm:$0xff] }
0x151a   :  { %2749 = vmatprep.mubr.f32.mxu1 %v6506_v45 }
0x151d   :  { %5319 = vmatmul.mubr.msk.f32.gmra.mrb[6].mxu1 %vm1505_vm13, %v8061_v12  ;;  %v2913_v12 = vld [vmem:[%s8933_s12 + $0x50] sm:$0xff] }
0x151e   :  { %2755 = vmatprep.mubr.f32.mxu1 %v6506_v45  ;;  %v8249_v46 = vpack.c.bf16 %v2913_v12, %v2911_v13 }
0x1521   :  { %5320 = vmatmul.mubr.msk.f32.gmra.mrb[4].mxu1 %vm1505_vm13, %v8066_v9  ;;  %v2916_v9 = vld [vmem:[%s8933_s12 + $0x68] sm:$0xff] }
0x1522   :  { %2761 = vmatprep.mubr.f32.mxu1 %v6506_v45 }
0x1525   :  { %5321 = vmatmul.mubr.msk.f32.gmra.mrb[2].mxu1 %vm1505_vm13, %v8071_v20  ;;  %v2918_v20 = vld [vmem:[%s8933_s12 + $0x78] sm:$0xff] }
0x1526   :  { %2767 = vmatprep.mubr.f32.mxu1 %v6506_v45  ;;  %v8252_v61 = vpack.c.bf16 %v2918_v20, %v2916_v9 }
0x1529   :  { %5322 = vmatmul.mubr.msk.f32.gmra.mrb[0].mxu1 %vm1505_vm13, %v8082_v63  ;;  %v2915_v63 = vld [vmem:[%s8933_s12 + $0x60] sm:$0xff] }
0x152a   :  { %2838 = vmatprep.mubr.f32.mxu1 %v6506_v45  ;;  %v8264_v22 = vpack.c.bf16 %v2917_v37, %v2915_v63 }
0x152d   :  { %5323 = vmatmul.mubr.msk.f32.vlgmr.msra.gmra.mrb[14].mxu1 %vm1505_vm13, %v8099_v43 }
0x152e   :  { %5826 = vmatpush1.bf16.msra.mxu1 %v8208_v3  ;;  %2844 = vmatprep.mubr.f32.mxu1 %v6506_v45 }
0x152f   :  { %5828 = vmatprep.subr.bf16.mxu1 %v8210_v6 }
0x1531   :  { %5324 = vmatmul.mubr.msk.f32.gmra.mrb[12].mxu1 %vm1505_vm13, %v8110_v0 }
0x1532   :  { %2850 = vmatprep.mubr.f32.mxu1 %v6506_v45  ;;  %5830 = vmatpush1.bf16.msra.mxu1 %v8228_v44 }
0x1533   :  { %5832 = vmatprep.subr.bf16.mxu1 %v8231_v11 }
0x1535   :  { %5325 = vmatmul.mubr.msk.f32.gmra.mrb[10].mxu1 %vm1505_vm13, %v8115_v14 }
0x1536   :  { %2856 = vmatprep.mubr.f32.mxu1 %v6506_v45  ;;  %5834 = vmatpush1.bf16.msra.mxu1 %v8249_v46 }
0x1537   :  { %5836 = vmatprep.subr.bf16.mxu1 %v8252_v61 }
0x1539   :  { %5326 = vmatmul.mubr.msk.f32.gmra.mrb[8].mxu1 %vm1505_vm13, %v8120_v5 }
0x153a   :  { %2862 = vmatprep.mubr.f32.mxu1 %v6506_v45  ;;  %5838 = vmatpush1.bf16.msra.mxu1 %v8264_v22 }
0x153b   :  { %5840 = vmatprep.subr.bf16.mxu1 %v8172_v56 }
0x153d   :  { %5327 = vmatmul.mubr.msk.f32.gmra.mrb[6].mxu1 %vm1505_vm13, %v8125_v15 }
0x153e   :  { %2868 = vmatprep.mubr.f32.mxu1 %v6506_v45 }
0x1541   :  { %5328 = vmatmul.mubr.msk.f32.gmra.mrb[4].mxu1 %vm1505_vm13, %v8130_v59 }
0x1542   :  { %2874 = vmatprep.mubr.f32.mxu1 %v6506_v45 }
0x1545   :  { %5329 = vmatmul.mubr.msk.f32.gmra.mrb[2].mxu1 %vm1505_vm13, %v8135_v58 }
0x1546   :  { %2880 = vmatprep.mubr.f32.mxu1 %v6506_v45 }
0x1549   :  { %5330 = vmatmul.mubr.msk.f32.gmra.mrb[0].mxu1 %vm1505_vm13, %v8140_v57 }
0x154a   :  { %2989 = vmatprep.mubr.f32.mxu1 %v6506_v45 }
0x1551   :  { %2990 = vmatmul.mubr.f32.vlgmr.msra.gmra.mrb[0].mxu1 %v6506_v45 }
0x1552   :  { %5842 = vmatpush1.bf16.msra.mxu1 %v8208_v3  ;;  %3101 = vmatprep.mubr.f32.mxu1 %v6506_v45 }
0x1553   :  { %5844 = vmatprep.subr.bf16.mxu1 %v8210_v6 }
0x1556   :  { %5846 = vmatpush1.bf16.msra.mxu1 %v8228_v44 }
0x1557   :  { %5848 = vmatprep.subr.bf16.mxu1 %v8231_v11 }
0x155a   :  { %5850 = vmatpush1.bf16.msra.mxu1 %v8249_v46 }
0x155b   :  { %5852 = vmatprep.subr.bf16.mxu1 %v8252_v61 }
0x155e   :  { %5854 = vmatpush1.bf16.msra.mxu1 %v8264_v22 }
0x155f   :  { %5856 = vmatprep.subr.bf16.mxu1 %v8172_v56 }
0x1624   :  { %v2991_v35 = vpop.f32.mrb[0].mxu1 }
0x1625   :  { %v5999_v36 = vadd.f32 %v2991_v35, %v8299_v25  ;;  %v2993_v43 = vpop.f32.mrb[1].mxu1 }
0x1626   :  { %v6000_v47 = vadd.f32 %v2993_v43, %v8304_v42 }
0x1627   :  { %v5331_v53 = vmul.f32 -1.442695, %v5999_v36 }
0x1628   :  { %v5332_v15 = vmul.f32 -1.442695, %v6000_v47 }
0x1629   :  { %6282 = vpow2.f32 %v5331_v53 }
0x162a   :  { %6284 = vtanh.f32 %v6000_v47 }
0x1633   :  { %v6283_v2 = vpop.eup %6282 }
0x1634   :  { %v3001_v0 = vadd.f32 1.0, %v6283_v2  ;;  %v6285_v14 = vpop.eup %6284 }
0x1636   :  { %6286 = vrcp.f32 %v3001_v0 }
0x1637   :  { %6288 = vpow2.f32 %v5332_v15 }
0x1640   :  { %v6287_v5 = vpop.eup %6286 }
0x1641   :  { %v3012_v18 = vmul.f32 %v6287_v5, %v6285_v14  ;;  %v6289_v59 = vpop.eup %6288  ;;  %v3011_v57 = vmul.f32 0.0, %v6287_v5 }
0x1642   :  { %v3008_v58 = vadd.f32 1.0, %v6289_v59 }
0x1643   :  { %3014 = vrot.lane.b32.xlu0 %v3012_v18, %s6507_s5 }
0x1644   :  { %6290 = vrcp.f32 %v3008_v58 }
0x164e   :  { %v6291_v49 = vpop.eup %6290 }
0x16b5   :  { %v3015_v38 = vpop.permute.xlu0 %3014 }
0x16b6   :  { %v3017_v17 = vadd.f32 %v3015_v38, %v3011_v57 }
0x16b8   :  { %6292 = vtanh.f32 %v3017_v17 }
0x16c2   :  { %v6293_v33 = vpop.eup %6292 }
0x16c3   :  { %v8308_v48 = vmul.f32 %v6293_v33, %v6291_v49 }
0x16c5   :  { %3021 = vrot.lane.b32.xlu1 %v8308_v48, %s6507_s5 }
0x1737   :  { %v3022_v51 = vpop.permute.xlu1 %3021 }
0x1738   :  { %3024 = vst.msk [vmem:[#allocation6] sm:$0xff] %vm1505_vm13, %v3022_v51  ;;  %5333 = vmatmul.mubr.msk.f32.vlgmr.msra.gmra.mrb[2].mxu1 %vm1402_vm12, %v3022_v51 }
0x1739   :  { %5858 = vmatpush1.bf16.msra.mxu1 %v8208_v3  ;;  %3213 = vmatprep.mubr.f32.mxu1 %v6506_v45 }
0x173a   :  { %5860 = vmatprep.subr.bf16.mxu1 %v8210_v6 }
0x173d   :  { %5862 = vmatpush1.bf16.msra.mxu1 %v8228_v44 }
0x173e   :  { %5864 = vmatprep.subr.bf16.mxu1 %v8231_v11 }
0x1741   :  { %5866 = vmatpush1.bf16.msra.mxu1 %v8249_v46 }
0x1742   :  { %5868 = vmatprep.subr.bf16.mxu1 %v8252_v61 }
0x1745   :  { %5870 = vmatpush1.bf16.msra.mxu1 %v8264_v22 }
0x1746   :  { %5872 = vmatprep.subr.bf16.mxu1 %v8172_v56 }
0x180b   :  { %v3103_v1 = vpop.f32.mrb[2].mxu1 }
0x180c   :  { %v6001_v54 = vadd.f32 %v3103_v1, %v8299_v25  ;;  %v3105_v55 = vpop.f32.mrb[3].mxu1 }
0x180d   :  { %v6002_v60 = vadd.f32 %v3105_v55, %v8304_v42 }
0x180e   :  { %v5334_v34 = vmul.f32 -1.442695, %v6001_v54 }
0x180f   :  { %v5335_v8 = vmul.f32 -1.442695, %v6002_v60 }
0x1810   :  { %6294 = vpow2.f32 %v5334_v34 }
0x1811   :  { %6296 = vtanh.f32 %v6002_v60 }
0x181a   :  { %v6295_v41 = vpop.eup %6294 }
0x181b   :  { %v3113_v39 = vadd.f32 1.0, %v6295_v41  ;;  %v6297_v27 = vpop.eup %6296 }
0x181d   :  { %6298 = vrcp.f32 %v3113_v39 }
0x181e   :  { %6300 = vpow2.f32 %v5335_v8 }
0x1827   :  { %v6299_v62 = vpop.eup %6298 }
0x1828   :  { %v3124_v26 = vmul.f32 %v6299_v62, %v6297_v27  ;;  %v6301_v7 = vpop.eup %6300  ;;  %v3123_v10 = vmul.f32 %v6299_v62, %v3017_v17 }
0x1829   :  { %v3120_v4 = vadd.f32 1.0, %v6301_v7 }
0x182a   :  { %3126 = vrot.lane.b32.xlu0 %v3124_v26, %s6507_s5 }
0x182b   :  { %6302 = vrcp.f32 %v3120_v4 }
0x1835   :  { %v6303_v12 = vpop.eup %6302 }
0x189c   :  { %v3127_v19 = vpop.permute.xlu0 %3126 }
0x189d   :  { %v3129_v13 = vadd.f32 %v3127_v19, %v3123_v10 }
0x189f   :  { %6304 = vtanh.f32 %v3129_v13 }
0x18a9   :  { %v6305_v9 = vpop.eup %6304 }
0x18aa   :  { %v8326_v20 = vmul.f32 %v6305_v9, %v6303_v12 }
0x18ac   :  { %3133 = vrot.lane.b32.xlu1 %v8326_v20, %s6507_s5 }
0x191e   :  { %v3134_v63 = vpop.permute.xlu1 %3133 }
0x191f   :  { %3136 = vst.msk [vmem:[#allocation6 + $0x8] sm:$0xff] %vm1505_vm13, %v3134_v63  ;;  %5336 = vmatmul.mubr.msk.f32.vlgmr.msra.gmra.mrb[4].mxu1 %vm1402_vm12, %v3134_v63 }
0x1920   :  { %5874 = vmatpush1.bf16.msra.mxu1 %v8208_v3  ;;  %3325 = vmatprep.mubr.f32.mxu1 %v6506_v45 }
0x1921   :  { %5876 = vmatprep.subr.bf16.mxu1 %v8210_v6 }
0x1924   :  { %5878 = vmatpush1.bf16.msra.mxu1 %v8228_v44 }
0x1925   :  { %5880 = vmatprep.subr.bf16.mxu1 %v8231_v11 }
0x1928   :  { %5882 = vmatpush1.bf16.msra.mxu1 %v8249_v46 }
0x1929   :  { %5884 = vmatprep.subr.bf16.mxu1 %v8252_v61 }
0x192c   :  { %5886 = vmatpush1.bf16.msra.mxu1 %v8264_v22 }
0x192d   :  { %5888 = vmatprep.subr.bf16.mxu1 %v8172_v56 }
0x19f2   :  { %v3215_v37 = vpop.f32.mrb[4].mxu1 }
0x19f3   :  { %v6003_v40 = vadd.f32 %v3215_v37, %v8299_v25  ;;  %v3217_v35 = vpop.f32.mrb[5].mxu1 }
0x19f4   :  { %v6004_v43 = vadd.f32 %v3217_v35, %v8304_v42 }
0x19f5   :  { %v5337_v36 = vmul.f32 -1.442695, %v6003_v40 }
0x19f6   :  { %v5338_v5 = vmul.f32 -1.442695, %v6004_v43 }
0x19f7   :  { %6306 = vpow2.f32 %v5337_v36 }
0x19f8   :  { %6308 = vtanh.f32 %v6004_v43 }
0x1a01   :  { %v6307_v53 = vpop.eup %6306 }
0x1a02   :  { %v3225_v47 = vadd.f32 1.0, %v6307_v53  ;;  %v6309_v2 = vpop.eup %6308 }
0x1a04   :  { %6310 = vrcp.f32 %v3225_v47 }
0x1a05   :  { %6312 = vpow2.f32 %v5338_v5 }
0x1a0e   :  { %v6311_v0 = vpop.eup %6310 }
0x1a0f   :  { %v3236_v14 = vmul.f32 %v6311_v0, %v6309_v2  ;;  %v6313_v18 = vpop.eup %6312  ;;  %v3235_v59 = vmul.f32 %v6311_v0, %v3129_v13 }
0x1a10   :  { %v3232_v15 = vadd.f32 1.0, %v6313_v18 }
0x1a11   :  { %3238 = vrot.lane.b32.xlu0 %v3236_v14, %s6507_s5 }
0x1a12   :  { %6314 = vrcp.f32 %v3232_v15 }
0x1a1c   :  { %v6315_v38 = vpop.eup %6314 }
0x1a83   :  { %v3239_v58 = vpop.permute.xlu0 %3238 }
0x1a84   :  { %v3241_v57 = vadd.f32 %v3239_v58, %v3235_v59 }
0x1a86   :  { %6316 = vtanh.f32 %v3241_v57 }
0x1a90   :  { %v6317_v17 = vpop.eup %6316 }
0x1a91   :  { %v8344_v49 = vmul.f32 %v6317_v17, %v6315_v38 }
0x1a93   :  { %3245 = vrot.lane.b32.xlu1 %v8344_v49, %s6507_s5 }
0x1b05   :  { %v3246_v33 = vpop.permute.xlu1 %3245 }
0x1b06   :  { %3248 = vst.msk [vmem:[#allocation6 + $0x10] sm:$0xff] %vm1505_vm13, %v3246_v33  ;;  %5339 = vmatmul.mubr.msk.f32.vlgmr.msra.gmra.mrb[6].mxu1 %vm1402_vm12, %v3246_v33 }
0x1b07   :  { %5890 = vmatpush1.bf16.msra.mxu1 %v8208_v3  ;;  %3437 = vmatprep.mubr.f32.mxu1 %v6506_v45 }
0x1b08   :  { %5892 = vmatprep.subr.bf16.mxu1 %v8210_v6 }
0x1b0b   :  { %5894 = vmatpush1.bf16.msra.mxu1 %v8228_v44 }
0x1b0c   :  { %5896 = vmatprep.subr.bf16.mxu1 %v8231_v11 }
0x1b0f   :  { %5898 = vmatpush1.bf16.msra.mxu1 %v8249_v46 }
0x1b10   :  { %5900 = vmatprep.subr.bf16.mxu1 %v8252_v61 }
0x1b13   :  { %5902 = vmatpush1.bf16.msra.mxu1 %v8264_v22 }
0x1b14   :  { %5904 = vmatprep.subr.bf16.mxu1 %v8172_v56 }
0x1bd9   :  { %v3327_v51 = vpop.f32.mrb[6].mxu1 }
0x1bda   :  { %v6005_v1 = vadd.f32 %v3327_v51, %v8299_v25  ;;  %v3329_v54 = vpop.f32.mrb[7].mxu1 }
0x1bdb   :  { %v6006_v34 = vadd.f32 %v3329_v54, %v8304_v42 }
0x1bdc   :  { %v5340_v55 = vmul.f32 -1.442695, %v6005_v1 }
0x1bdd   :  { %v5341_v26 = vmul.f32 -1.442695, %v6006_v34 }
0x1bde   :  { %6318 = vpow2.f32 %v5340_v55 }
0x1bdf   :  { %6320 = vtanh.f32 %v6006_v34 }
0x1be8   :  { %v6319_v60 = vpop.eup %6318 }
0x1be9   :  { %v3337_v41 = vadd.f32 1.0, %v6319_v60  ;;  %v6321_v39 = vpop.eup %6320 }
0x1beb   :  { %6322 = vrcp.f32 %v3337_v41 }
0x1bec   :  { %6324 = vpow2.f32 %v5341_v26 }
0x1bf5   :  { %v6323_v27 = vpop.eup %6322 }
0x1bf6   :  { %v3348_v62 = vmul.f32 %v6323_v27, %v6321_v39  ;;  %v6325_v8 = vpop.eup %6324  ;;  %v3347_v4 = vmul.f32 %v6323_v27, %v3241_v57 }
0x1bf7   :  { %v3344_v7 = vadd.f32 1.0, %v6325_v8 }
0x1bf8   :  { %3350 = vrot.lane.b32.xlu0 %v3348_v62, %s6507_s5 }
0x1bf9   :  { %6326 = vrcp.f32 %v3344_v7 }
0x1c03   :  { %v6327_v13 = vpop.eup %6326 }
0x1c6a   :  { %v3351_v10 = vpop.permute.xlu0 %3350 }
0x1c6b   :  { %v3353_v19 = vadd.f32 %v3351_v10, %v3347_v4 }
0x1c6d   :  { %6328 = vtanh.f32 %v3353_v19 }
0x1c77   :  { %v6329_v12 = vpop.eup %6328 }
0x1c78   :  { %v8362_v9 = vmul.f32 %v6329_v12, %v6327_v13 }
0x1c7a   :  { %3357 = vrot.lane.b32.xlu1 %v8362_v9, %s6507_s5 }
0x1cec   :  { %v3358_v63 = vpop.permute.xlu1 %3357 }
0x1ced   :  { %3360 = vst.msk [vmem:[#allocation6 + $0x18] sm:$0xff] %vm1505_vm13, %v3358_v63  ;;  %5342 = vmatmul.mubr.msk.f32.vlgmr.msra.gmra.mrb[8].mxu1 %vm1402_vm12, %v3358_v63 }
0x1cee   :  { %5906 = vmatpush1.bf16.msra.mxu1 %v8208_v3  ;;  %3549 = vmatprep.mubr.f32.mxu1 %v6506_v45 }
0x1cef   :  { %5908 = vmatprep.subr.bf16.mxu1 %v8210_v6 }
0x1cf2   :  { %5910 = vmatpush1.bf16.msra.mxu1 %v8228_v44 }
0x1cf3   :  { %5912 = vmatprep.subr.bf16.mxu1 %v8231_v11 }
0x1cf6   :  { %5914 = vmatpush1.bf16.msra.mxu1 %v8249_v46 }
0x1cf7   :  { %5916 = vmatprep.subr.bf16.mxu1 %v8252_v61 }
0x1cfa   :  { %5918 = vmatpush1.bf16.msra.mxu1 %v8264_v22 }
0x1cfb   :  { %5920 = vmatprep.subr.bf16.mxu1 %v8172_v56 }
0x1dc0   :  { %v3439_v37 = vpop.f32.mrb[8].mxu1 }
0x1dc1   :  { %v6007_v40 = vadd.f32 %v3439_v37, %v8299_v25  ;;  %v3441_v35 = vpop.f32.mrb[9].mxu1 }
0x1dc2   :  { %v6008_v43 = vadd.f32 %v3441_v35, %v8304_v42 }
0x1dc3   :  { %v5343_v36 = vmul.f32 -1.442695, %v6007_v40 }
0x1dc4   :  { %v5344_v5 = vmul.f32 -1.442695, %v6008_v43 }
0x1dc5   :  { %6330 = vpow2.f32 %v5343_v36 }
0x1dc6   :  { %6332 = vtanh.f32 %v6008_v43 }
0x1dcf   :  { %v6331_v53 = vpop.eup %6330 }
0x1dd0   :  { %v3449_v47 = vadd.f32 1.0, %v6331_v53  ;;  %v6333_v2 = vpop.eup %6332 }
0x1dd2   :  { %6334 = vrcp.f32 %v3449_v47 }
0x1dd3   :  { %6336 = vpow2.f32 %v5344_v5 }
0x1ddc   :  { %v6335_v0 = vpop.eup %6334 }
0x1ddd   :  { %v3460_v14 = vmul.f32 %v6335_v0, %v6333_v2  ;;  %v6337_v18 = vpop.eup %6336  ;;  %v3459_v59 = vmul.f32 %v6335_v0, %v3353_v19 }
0x1dde   :  { %v3456_v15 = vadd.f32 1.0, %v6337_v18 }
0x1ddf   :  { %3462 = vrot.lane.b32.xlu0 %v3460_v14, %s6507_s5 }
0x1de0   :  { %6338 = vrcp.f32 %v3456_v15 }
0x1dea   :  { %v6339_v38 = vpop.eup %6338 }
0x1e51   :  { %v3463_v58 = vpop.permute.xlu0 %3462 }
0x1e52   :  { %v3465_v57 = vadd.f32 %v3463_v58, %v3459_v59 }
0x1e54   :  { %6340 = vtanh.f32 %v3465_v57 }
0x1e5e   :  { %v6341_v17 = vpop.eup %6340 }
0x1e5f   :  { %v8380_v33 = vmul.f32 %v6341_v17, %v6339_v38 }
0x1e61   :  { %3469 = vrot.lane.b32.xlu1 %v8380_v33, %s6507_s5 }
0x1ed3   :  { %v3470_v51 = vpop.permute.xlu1 %3469 }
0x1ed4   :  { %3472 = vst.msk [vmem:[#allocation6 + $0x20] sm:$0xff] %vm1505_vm13, %v3470_v51  ;;  %5345 = vmatmul.mubr.msk.f32.vlgmr.msra.gmra.mrb[10].mxu1 %vm1402_vm12, %v3470_v51 }
0x1ed5   :  { %5922 = vmatpush1.bf16.msra.mxu1 %v8208_v3  ;;  %3661 = vmatprep.mubr.f32.mxu1 %v6506_v45 }
0x1ed6   :  { %5924 = vmatprep.subr.bf16.mxu1 %v8210_v6 }
0x1ed9   :  { %5926 = vmatpush1.bf16.msra.mxu1 %v8228_v44 }
0x1eda   :  { %5928 = vmatprep.subr.bf16.mxu1 %v8231_v11 }
0x1edd   :  { %5930 = vmatpush1.bf16.msra.mxu1 %v8249_v46 }
0x1ede   :  { %5932 = vmatprep.subr.bf16.mxu1 %v8252_v61 }
0x1ee1   :  { %5934 = vmatpush1.bf16.msra.mxu1 %v8264_v22 }
0x1ee2   :  { %5936 = vmatprep.subr.bf16.mxu1 %v8172_v56 }
0x1fa7   :  { %v3551_v1 = vpop.f32.mrb[10].mxu1 }
0x1fa8   :  { %v6009_v54 = vadd.f32 %v3551_v1, %v8299_v25  ;;  %v3553_v55 = vpop.f32.mrb[11].mxu1 }
0x1fa9   :  { %v6010_v60 = vadd.f32 %v3553_v55, %v8304_v42 }
0x1faa   :  { %v5346_v34 = vmul.f32 -1.442695, %v6009_v54 }
0x1fab   :  { %v5347_v8 = vmul.f32 -1.442695, %v6010_v60 }
0x1fac   :  { %6342 = vpow2.f32 %v5346_v34 }
0x1fad   :  { %6344 = vtanh.f32 %v6010_v60 }
0x1fb6   :  { %v6343_v41 = vpop.eup %6342 }
0x1fb7   :  { %v3561_v39 = vadd.f32 1.0, %v6343_v41  ;;  %v6345_v27 = vpop.eup %6344 }
0x1fb9   :  { %6346 = vrcp.f32 %v3561_v39 }
0x1fba   :  { %6348 = vpow2.f32 %v5347_v8 }
0x1fc3   :  { %v6347_v62 = vpop.eup %6346 }
0x1fc4   :  { %v3572_v26 = vmul.f32 %v6347_v62, %v6345_v27  ;;  %v6349_v56 = vpop.eup %6348  ;;  %v3571_v4 = vmul.f32 %v6347_v62, %v3465_v57 }
0x1fc5   :  { %v3568_v7 = vadd.f32 1.0, %v6349_v56 }
0x1fc6   :  { %3574 = vrot.lane.b32.xlu0 %v3572_v26, %s6507_s5 }
0x1fc7   :  { %6350 = vrcp.f32 %v3568_v7 }
0x1fd1   :  { %v6351_v13 = vpop.eup %6350 }
0x2038   :  { %v3575_v10 = vpop.permute.xlu0 %3574 }
0x2039   :  { %v3577_v19 = vadd.f32 %v3575_v10, %v3571_v4  ;;  %v4789_v4 = vld [vmem:[%s8935_s15] sm:$0xff]  ;;  %v4790_v10 = vld [vmem:[%s8935_s15 + $0x8] sm:$0xff] }
0x203b   :  { %6352 = vtanh.f32 %v3577_v19 }
0x2045   :  { %v6353_v12 = vpop.eup %6352 }
0x2046   :  { %v8398_v63 = vmul.f32 %v6353_v12, %v6351_v13  ;;  %v5959_v13 = vpack.c.bf16 %v4790_v10, %v4789_v4 }
0x2048   :  { %3581 = vrot.lane.b32.xlu1 %v8398_v63, %s6507_s5 }
0x20ba   :  { %v3582_v37 = vpop.permute.xlu1 %3581 }
0x20bb   :  { %3584 = vst.msk [vmem:[#allocation6 + $0x28] sm:$0xff] %vm1505_vm13, %v3582_v37  ;;  %5348 = vmatmul.mubr.msk.f32.vlgmr.msra.gmra.mrb[12].mxu1 %vm1402_vm12, %v3582_v37 }
0x20bc   :  { %5938 = vmatpush1.bf16.msra.mxu1 %v8208_v3  ;;  %3773 = vmatprep.mubr.f32.mxu1 %v6506_v45 }
0x20bd   :  { %5940 = vmatprep.subr.bf16.mxu1 %v8210_v6 }
0x20c0   :  { %5942 = vmatpush1.bf16.msra.mxu1 %v8228_v44 }
0x20c1   :  { %5944 = vmatprep.subr.bf16.mxu1 %v8231_v11 }
0x20c4   :  { %5946 = vmatpush1.bf16.msra.mxu1 %v8249_v46 }
0x20c5   :  { %5948 = vmatprep.subr.bf16.mxu1 %v8252_v61 }
0x20c8   :  { %5950 = vmatpush1.bf16.msra.mxu1 %v8264_v22 }
0x20c9   :  { %5960 = vmatprep.subr.bf16.mxu1 %v5959_v13 }
0x218e   :  { %v3663_v40 = vpop.f32.mrb[12].mxu1 }
0x218f   :  { %v6011_v35 = vadd.f32 %v3663_v40, %v8299_v25  ;;  %v3665_v36 = vpop.f32.mrb[13].mxu1 }
0x2190   :  { %v6012_v3 = vadd.f32 %v3665_v36, %v8304_v42 }
0x2191   :  { %v5349_v43 = vmul.f32 -1.442695, %v6011_v35  ;;  %v3813_v35 = vld [vmem:[#allocation6] sm:$0xff] }
0x2192   :  { %v5350_v46 = vmul.f32 -1.442695, %v6012_v3 }
0x2193   :  { %6354 = vpow2.f32 %v5349_v43 }
0x2194   :  { %6356 = vtanh.f32 %v6012_v3  ;;  %v3814_v3 = vld [vmem:[#allocation6 + $0x8] sm:$0xff] }
0x219d   :  { %v6355_v53 = vpop.eup %6354 }
0x219e   :  { %v3673_v6 = vadd.f32 1.0, %v6355_v53  ;;  %v6357_v44 = vpop.eup %6356 }
0x21a0   :  { %6358 = vrcp.f32 %v3673_v6 }
0x21a1   :  { %6360 = vpow2.f32 %v5350_v46 }
0x21aa   :  { %v6359_v11 = vpop.eup %6358 }
0x21ab   :  { %v3684_v47 = vmul.f32 %v6359_v11, %v6357_v44  ;;  %v6361_v61 = vpop.eup %6360  ;;  %v3683_v2 = vmul.f32 %v6359_v11, %v3577_v19  ;;  %v4791_v19 = vld [vmem:[%s8935_s15 + $0x10] sm:$0xff] }
0x21ac   :  { %v3680_v22 = vadd.f32 1.0, %v6361_v61  ;;  %v3815_v11 = vld [vmem:[#allocation6 + $0x10] sm:$0xff]  ;;  %v3816_v61 = vld [vmem:[#allocation6 + $0x18] sm:$0xff] }
0x21ad   :  { %3686 = vrot.lane.b32.xlu0 %v3684_v47, %s6507_s5 }
0x21ae   :  { %6362 = vrcp.f32 %v3680_v22 }
0x21b8   :  { %v6363_v5 = vpop.eup %6362 }
0x221f   :  { %v3687_v0 = vpop.permute.xlu0 %3686 }
0x2220   :  { %v3689_v14 = vadd.f32 %v3687_v0, %v3683_v2 }
0x2222   :  { %6364 = vtanh.f32 %v3689_v14 }
0x222c   :  { %v6365_v18 = vpop.eup %6364 }
0x222d   :  { %v3691_v15 = vmul.f32 %v6365_v18, %v6363_v5 }
0x222f   :  { %3693 = vrot.lane.b32.xlu1 %v3691_v15, %s6507_s5 }
0x22a1   :  { %v3694_v59 = vpop.permute.xlu1 %3693 }
0x22a2   :  { %3696 = vst.msk [vmem:[#allocation6 + $0x30] sm:$0xff] %vm1505_vm13, %v3694_v59  ;;  %5351 = vmatmul.mubr.msk.f32.vlgmr.msra.gmra.mrb[14].mxu1 %vm1402_vm12, %v3694_v59 }
0x22a3   :  { %5962 = vmatpush3.bf16.msra.mxu1 %v5959_v13 }
0x2375   :  { %v3775_v58 = vpop.f32.mrb[14].mxu1 }
0x2376   :  { %v6013_v57 = vadd.f32 %v3775_v58, %v8299_v25  ;;  %v3777_v38 = vpop.f32.mrb[15].mxu1  ;;  %v3819_v58 = vld [vmem:[#allocation6 + $0x30] sm:$0xff] }
0x2377   :  { %v6014_v51 = vadd.f32 %v3777_v38, %v8304_v42 }
0x2378   :  { %v5352_v17 = vmul.f32 -1.442695, %v6013_v57 }
0x2379   :  { %v5353_v25 = vmul.f32 -1.442695, %v6014_v51 }
0x237a   :  { %6366 = vpow2.f32 %v5352_v17 }
0x237b   :  { %6368 = vtanh.f32 %v6014_v51 }
0x2384   :  { %v6367_v1 = vpop.eup %6366 }
0x2385   :  { %v3785_v54 = vadd.f32 1.0, %v6367_v1  ;;  %v6369_v55 = vpop.eup %6368 }
0x2387   :  { %6370 = vrcp.f32 %v3785_v54 }
0x2388   :  { %6372 = vpow2.f32 %v5353_v25 }
0x2391   :  { %v6371_v34 = vpop.eup %6370 }
0x2392   :  { %v3796_v60 = vmul.f32 %v6371_v34, %v6369_v55  ;;  %v6373_v42 = vpop.eup %6372  ;;  %v3795_v39 = vmul.f32 %v6371_v34, %v3689_v14  ;;  %v3817_v14 = vld [vmem:[#allocation6 + $0x20] sm:$0xff] }
0x2393   :  { %v3792_v41 = vadd.f32 1.0, %v6373_v42 }
0x2394   :  { %3798 = vrot.lane.b32.xlu0 %v3796_v60, %s6507_s5 }
0x2395   :  { %6374 = vrcp.f32 %v3792_v41 }
0x2398   :  { %3697 = vrot.lane.b32.xlu0 %v3691_v15, %s6508_s22  ;;  %v3818_v15 = vld [vmem:[#allocation6 + $0x28] sm:$0xff] }
0x239c   :  { %3473 = vrot.lane.b32.xlu0 %v8380_v33, %s6508_s22 }
0x239f   :  { %v6375_v33 = vpop.eup %6374 }
0x23a0   :  { %3249 = vrot.lane.b32.xlu0 %v8344_v49, %s6508_s22 }
0x23a4   :  { %3025 = vrot.lane.b32.xlu0 %v8308_v48, %s6508_s22 }
0x2406   :  { %v3799_v27 = vpop.permute.xlu0 %3798 }
0x2407   :  { %v3801_v62 = vadd.f32 %v3799_v27, %v3795_v39 }
0x2409   :  { %6376 = vtanh.f32 %v3801_v62 }
0x240a   :  { %v3698_v26 = vpop.permute.xlu0 %3697 }
0x240b   :  { %3700 = vst.msk [vmem:[#allocation7 + $0x8] sm:$0xff] %vm1505_vm13, %v3698_v26 }
0x240e   :  { %v3474_v8 = vpop.permute.xlu0 %3473 }
0x240f   :  { %3476 = vst.msk [vmem:[#allocation7 + $0x18] sm:$0xff] %vm1505_vm13, %v3474_v8 }
0x2412   :  { %v3250_v49 = vpop.permute.xlu0 %3249  ;;  %v3822_v37 = vld [vmem:[#allocation7 + $0x8] sm:$0xff] }
0x2413   :  { %v6377_v56 = vpop.eup %6376  ;;  %3252 = vst.msk [vmem:[#allocation7 + $0x28] sm:$0xff] %vm1505_vm13, %v3250_v49  ;;  %v3830_v53 = vadd.f32 %v3822_v37, %v3814_v3 }
0x2414   :  { %v3803_v48 = vmul.f32 %v6377_v56, %v6375_v33 }
0x2416   :  { %3809 = vrot.lane.b32.xlu1 %v3803_v48, %s6508_s22  ;;  %v3026_v7 = vpop.permute.xlu0 %3025  ;;  %v3824_v6 = vld [vmem:[#allocation7 + $0x18] sm:$0xff] }
0x2417   :  { %3028 = vst.msk [vmem:[#allocation7 + $0x38] sm:$0xff] %vm1505_vm13, %v3026_v7  ;;  %v3832_v22 = vadd.f32 %v3824_v6, %v3816_v61 }
0x241a   :  { %3585 = vrot.lane.b32.xlu1 %v8398_v63, %s6508_s22  ;;  %v3826_v2 = vld [vmem:[#allocation7 + $0x28] sm:$0xff] }
0x241b   :  { %v3834_v59 = vadd.f32 %v3826_v2, %v3818_v15 }
0x241e   :  { %3361 = vrot.lane.b32.xlu1 %v8362_v9, %s6508_s22  ;;  %v4792_v9 = vld [vmem:[%s8935_s15 + $0x18] sm:$0xff] }
0x241f   :  { %v3828_v51 = vld [vmem:[#allocation7 + $0x38] sm:$0xff] }
0x2422   :  { %3137 = vrot.lane.b32.xlu1 %v8326_v20, %s6508_s22  ;;  %v5963_v20 = vpack.c.bf16 %v4792_v9, %v4791_v19 }
0x2424   :  { %5964 = vmatprep.subr.bf16.mxu1 %v5963_v20 }
0x2425   :  { %5966 = vmatpush3.bf16.msra.mxu1 %v5963_v20 }
0x2426   :  { %3805 = vrot.lane.b32.xlu1 %v3803_v48, %s6507_s5 }
0x2488   :  { %v8452_v12 = vpop.permute.xlu1 %3809 }
0x2489   :  { %3812 = vst.msk [vmem:[#allocation7] sm:$0xff] %vm1505_vm13, %v8452_v12 }
0x248c   :  { %v3586_v63 = vpop.permute.xlu1 %3585 }
0x248d   :  { %3588 = vst.msk [vmem:[#allocation7 + $0x10] sm:$0xff] %vm1505_vm13, %v3586_v63 }
0x2490   :  { %v3362_v40 = vpop.permute.xlu1 %3361  ;;  %v3821_v36 = vld [vmem:[#allocation7] sm:$0xff] }
0x2491   :  { %3364 = vst.msk [vmem:[#allocation7 + $0x20] sm:$0xff] %vm1505_vm13, %v3362_v40  ;;  %v3829_v43 = vadd.f32 %v3821_v36, %v3813_v35 }
0x2493   :  { %5527 = vmatprep.mubr.msk.f32.mxu0 %vm1505_vm13, %v3829_v43 }
0x2494   :  { %v3138_v44 = vpop.permute.xlu1 %3137  ;;  %5528 = vmatmul.mubr.msk.f32.vlgmr.msra.gmra.mrb[16].mxu0 %vm1505_vm13, %v3830_v53  ;;  %v3823_v47 = vld [vmem:[#allocation7 + $0x10] sm:$0xff] }
0x2495   :  { %3140 = vst.msk [vmem:[#allocation7 + $0x30] sm:$0xff] %vm1505_vm13, %v3138_v44  ;;  %5540 = vmatpush3.msra.mxu0 %v8046_v50  ;;  %v3831_v46 = vadd.f32 %v3823_v47, %v3815_v11  ;;  %v3971_v50 = vand.u32 127, %v67_v16 }
0x2496   :  { %5553 = vmatprep.subr.mxu0 %v8005_v52 }
0x2497   :  { %5530 = vmatprep.mubr.msk.f32.mxu0 %vm1505_vm13, %v3831_v46  ;;  %vm3972_vm15 = vcmp.eq.s32.totalorder %v6667_v21, %v3971_v50  ;;  %vm3973_vm10 = vcmp.eq.s32.totalorder %v6670_v23, %v3971_v50  ;;  %vm3974_vm8 = vcmp.eq.s32.totalorder %v6672_v24, %v3971_v50  ;;  %vm3975_vm9 = vcmp.eq.s32.totalorder %v6677_v28, %v3971_v50 }
0x2498   :  { %v3806_v0 = vpop.permute.xlu1 %3805  ;;  %5531 = vmatmul.mubr.msk.f32.gmra.mrb[18].mxu0 %vm1505_vm13, %v3832_v22  ;;  %v3825_v5 = vld [vmem:[#allocation7 + $0x20] sm:$0xff]  ;;  %v5362_v54 = vsel %vm3972_vm15, 1.0, %v6506_v45  ;;  %v5363_v16 = vsel %vm3973_vm10, 1.0, %v6506_v45  ;;  %v5364_v21 = vsel %vm3974_vm8, 1.0, %v6506_v45  ;;  %vm3976_vm1 = vcmp.eq.s32.totalorder %v6680_v29, %v3971_v50 }
0x2499   :  { %3808 = vst.msk [vmem:[#allocation6 + $0x38] sm:$0xff] %vm1505_vm13, %v3806_v0  ;;  %v3833_v18 = vadd.f32 %v3825_v5, %v3817_v14  ;;  %v5365_v23 = vsel %vm3975_vm9, 1.0, %v6506_v45  ;;  %v5366_v24 = vsel %vm3976_vm1, 1.0, %v6506_v45  ;;  %vm3977_vm7 = vcmp.eq.s32.totalorder %v6688_v30, %v3971_v50 }
0x249a   :  { %vm3978_vm3 = vcmp.eq.s32.totalorder %v6690_v31, %v3971_v50  ;;  %v5367_v28 = vsel %vm3977_vm7, 1.0, %v6506_v45  ;;  %vm3979_vm14 = vcmp.eq.s32.totalorder %v6694_v32, %v3971_v50 }
0x249b   :  { %5533 = vmatprep.mubr.msk.f32.mxu0 %vm1505_vm13, %v3833_v18  ;;  %v5368_v29 = vsel %vm3978_vm3, 1.0, %v6506_v45 }
0x249c   :  { %5534 = vmatmul.mubr.msk.f32.gmra.mrb[20].mxu0 %vm1505_vm13, %v3834_v59  ;;  %v3827_v57 = vld [vmem:[#allocation7 + $0x30] sm:$0xff] }
0x249d   :  { %v3835_v38 = vadd.f32 %v3827_v57, %v3819_v58 }
0x249f   :  { %5536 = vmatprep.mubr.msk.f32.mxu0 %vm1505_vm13, %v3835_v38 }
0x24a0   :  { %v3820_v17 = vld [vmem:[#allocation6 + $0x38] sm:$0xff] }
0x24a1   :  { %v3836_v1 = vadd.f32 %v3828_v51, %v3820_v17 }
0x24a3   :  { %5537 = vmatmul.mubr.msk.f32.gmra.mrb[22].mxu0 %vm1505_vm13, %v3836_v1 }
0x24a4   :  { %5541 = vmatprep.mubr.msk.f32.mxu0 %vm3996_vm2, %v5362_v54 }
0x24a7   :  { %5542 = vmatmul.mubr.msk.f32.vlgmr.msra.gmra.mrb[24].mxu0 %vm3996_vm2, %v5363_v16 }
0x24a8   :  { %5554 = vmatpush3.msra.mxu0 %v8005_v52  ;;  %5544 = vmatprep.mubr.msk.f32.mxu0 %vm3996_vm2, %v5364_v21  ;;  %v5369_v52 = vsel %vm3979_vm14, 1.0, %v6506_v45 }
0x24a9   :  { %5567 = vmatprep.subr.mxu0 %v3806_v0 }
0x24ab   :  { %5545 = vmatmul.mubr.msk.f32.gmra.mrb[26].mxu0 %vm3996_vm2, %v5365_v23 }
0x24ac   :  { %5547 = vmatprep.mubr.msk.f32.mxu0 %vm3996_vm2, %v5366_v24 }
0x24af   :  { %5548 = vmatmul.mubr.msk.f32.gmra.mrb[28].mxu0 %vm3996_vm2, %v5367_v28 }
0x24b0   :  { %5550 = vmatprep.mubr.msk.f32.mxu0 %vm3996_vm2, %v5368_v29 }
0x24b3   :  { %5551 = vmatmul.mubr.msk.f32.gmra.mrb[30].mxu0 %vm3996_vm2, %v5369_v52 }
0x24b4   :  { %5555 = vmatprep.mubr.msk.f32.mxu0 %vm3996_vm2, %v5362_v54 }
0x24b7   :  { %5556 = vmatmul.mubr.msk.f32.vlgmr.msra.gmra.mrb[32].mxu0 %vm3996_vm2, %v5363_v16 }
0x24b8   :  { %5568 = vmatpush3.msra.mxu0 %v3806_v0  ;;  %5558 = vmatprep.mubr.msk.f32.mxu0 %vm3996_vm2, %v5364_v21 }
0x24b9   :  { %5581 = vmatprep.subr.mxu0 %v8452_v12 }
0x24bb   :  { %5559 = vmatmul.mubr.msk.f32.gmra.mrb[34].mxu0 %vm3996_vm2, %v5365_v23 }
0x24bc   :  { %5561 = vmatprep.mubr.msk.f32.mxu0 %vm3996_vm2, %v5366_v24 }
0x24bf   :  { %5562 = vmatmul.mubr.msk.f32.gmra.mrb[36].mxu0 %vm3996_vm2, %v5367_v28 }
0x24c0   :  { %5564 = vmatprep.mubr.msk.f32.mxu0 %vm3996_vm2, %v5368_v29 }
0x24c3   :  { %5565 = vmatmul.mubr.msk.f32.gmra.mrb[38].mxu0 %vm3996_vm2, %v5369_v52 }
0x24c4   :  { %5569 = vmatprep.mubr.msk.f32.mxu0 %vm3996_vm2, %v5362_v54 }
0x24c7   :  { %5570 = vmatmul.mubr.msk.f32.vlgmr.msra.gmra.mrb[40].mxu0 %vm3996_vm2, %v5363_v16 }
0x24c8   :  { %5582 = vmatpush3.msra.mxu0 %v8452_v12  ;;  %5572 = vmatprep.mubr.msk.f32.mxu0 %vm3996_vm2, %v5364_v21 }
0x24cb   :  { %5573 = vmatmul.mubr.msk.f32.gmra.mrb[42].mxu0 %vm3996_vm2, %v5365_v23 }
0x24cc   :  { %5575 = vmatprep.mubr.msk.f32.mxu0 %vm3996_vm2, %v5366_v24 }
0x24cf   :  { %5576 = vmatmul.mubr.msk.f32.gmra.mrb[44].mxu0 %vm3996_vm2, %v5367_v28 }
0x24d0   :  { %5578 = vmatprep.mubr.msk.f32.mxu0 %vm3996_vm2, %v5368_v29 }
0x24d3   :  { %5579 = vmatmul.mubr.msk.f32.gmra.mrb[46].mxu0 %vm3996_vm2, %v5369_v52 }
0x24d4   :  { %5583 = vmatprep.mubr.msk.f32.mxu0 %vm3996_vm2, %v5362_v54 }
0x24d7   :  { %5584 = vmatmul.mubr.msk.f32.vlgmr.msra.gmra.mrb[48].mxu0 %vm3996_vm2, %v5363_v16 }
0x24d8   :  { %5586 = vmatprep.mubr.msk.f32.mxu0 %vm3996_vm2, %v5364_v21 }
0x24db   :  { %5587 = vmatmul.mubr.msk.f32.gmra.mrb[50].mxu0 %vm3996_vm2, %v5365_v23 }
0x24dc   :  { %5589 = vmatprep.mubr.msk.f32.mxu0 %vm3996_vm2, %v5366_v24 }
0x24df   :  { %5590 = vmatmul.mubr.msk.f32.gmra.mrb[52].mxu0 %vm3996_vm2, %v5367_v28 }
0x24e0   :  { %5592 = vmatprep.mubr.msk.f32.mxu0 %vm3996_vm2, %v5368_v29 }
0x24e3   :  { %5593 = vmatmul.mubr.msk.f32.gmra.mrb[54].mxu0 %vm3996_vm2, %v5369_v52 }
0x2567   :  { %v8522_v30 = vpop.f32.mrb[16].mxu0 }
0x2568   :  { %v8524_v31 = vpop.f32.mrb[17].mxu0 }
0x2569   :  { %5603 = vmatprep.mubr.msk.f32.mxu1 %vm1505_vm13, %v8524_v31 }
0x256a   :  { %5604 = vmatmul.mubr.msk.f32.vlgmr.msra.gmra.mrb[16].mxu1 %vm1505_vm13, %v8522_v30 }
0x256b   :  { %v8530_v32 = vpop.f32.mrb[18].mxu0 }
0x256c   :  { %v8532_v45 = vpop.f32.mrb[19].mxu0 }
0x256d   :  { %5606 = vmatprep.mubr.msk.f32.mxu1 %vm1505_vm13, %v8532_v45 }
0x256e   :  { %5607 = vmatmul.mubr.msk.f32.gmra.mrb[18].mxu1 %vm1505_vm13, %v8530_v32 }
0x256f   :  { %v8538_v55 = vpop.f32.mrb[20].mxu0 }
0x2570   :  { %v8540_v34 = vpop.f32.mrb[21].mxu0 }
0x2571   :  { %5609 = vmatprep.mubr.msk.f32.mxu1 %vm1505_vm13, %v8540_v34 }
0x2572   :  { %5610 = vmatmul.mubr.msk.f32.gmra.mrb[20].mxu1 %vm1505_vm13, %v8538_v55 }
0x2576   :  { %v8546_v60 = vpop.f32.mrb[22].mxu0 }
0x2577   :  { %v8548_v25 = vpop.f32.mrb[23].mxu0 }
0x2578   :  { %5612 = vmatprep.mubr.msk.f32.mxu1 %vm1505_vm13, %v8548_v25 }
0x2579   :  { %5613 = vmatmul.mubr.msk.f32.gmra.mrb[22].mxu1 %vm1505_vm13, %v8546_v60 }
0x257a   :  { %v8554_v42 = vpop.f32.mrb[24].mxu0 }
0x257b   :  { %v4442_v41 = vmul.f32 %v8554_v42, %v8522_v30  ;;  %v8558_v39 = vpop.f32.mrb[25].mxu0 }
0x257c   :  { %v4441_v27 = vmul.f32 %v8558_v39, %v8524_v31 }
0x257d   :  { %v4452_v62 = vsel %vm1505_vm13, %v4442_v41, 0.0 }
0x257e   :  { %4453 = vadd.xlane.f32.xlu0 %v4452_v62  ;;  %v8563_v26 = vpop.f32.mrb[26].mxu0  ;;  %v4449_v56 = vsel %vm1505_vm13, %v4441_v27, 0.0 }
0x257f   :  { %v4444_v8 = vmul.f32 %v8563_v26, %v8530_v32  ;;  %v8567_v33 = vpop.f32.mrb[27].mxu0 }
0x2580   :  { %v4443_v49 = vmul.f32 %v8567_v33, %v8532_v45 }
0x2581   :  { %v4458_v19 = vsel %vm1505_vm13, %v4444_v8, 0.0 }
0x2582   :  { %4450 = vadd.xlane.f32.xlu0 %v4449_v56  ;;  %v8572_v48 = vpop.f32.mrb[28].mxu0  ;;  %v4455_v63 = vsel %vm1505_vm13, %v4443_v49, 0.0 }
0x2583   :  { %v4446_v7 = vmul.f32 %v8572_v48, %v8538_v55  ;;  %v8576_v4 = vpop.f32.mrb[29].mxu0 }
0x2584   :  { %v4445_v10 = vmul.f32 %v8576_v4, %v8540_v34 }
0x2585   :  { %v4464_v43 = vsel %vm1505_vm13, %v4446_v7, 0.0 }
0x2586   :  { %4459 = vadd.xlane.f32.xlu0 %v4458_v19  ;;  %v8581_v13 = vpop.f32.mrb[30].mxu0  ;;  %v4461_v47 = vsel %vm1505_vm13, %v4445_v10, 0.0 }
0x2587   :  { %9262 = vst [vmem:[#allocation8_spill] sm:$0xff] %v8581_v13  ;;  %v8585_v9 = vmul.f32 %v8581_v13, %v8546_v60  ;;  %v8587_v20 = vpop.f32.mrb[31].mxu0 }
0x2588   :  { %v8591_v12 = vmul.f32 %v8587_v20, %v8548_v25 }
0x258a   :  { %4456 = vadd.xlane.f32.xlu0 %v4455_v63  ;;  %v8594_v37 = vpop.f32.mrb[32].mxu0 }
0x258b   :  { %v4474_v40 = vmul.f32 %v8594_v37, %v8522_v30  ;;  %v8598_v35 = vpop.f32.mrb[33].mxu0 }
0x258c   :  { %v4473_v36 = vmul.f32 %v8598_v35, %v8524_v31 }
0x258d   :  { %v4484_v3 = vsel %vm1505_vm13, %v4474_v40, 0.0 }
0x258e   :  { %4465 = vadd.xlane.f32.xlu0 %v4464_v43  ;;  %4485 = vadd.xlane.f32.xlu1 %v4484_v3  ;;  %v8604_v53 = vpop.f32.mrb[34].mxu0  ;;  %v4481_v46 = vsel %vm1505_vm13, %v4473_v36, 0.0 }
0x258f   :  { %v4476_v6 = vmul.f32 %v8604_v53, %v8530_v32  ;;  %v8608_v44 = vpop.f32.mrb[35].mxu0 }
0x2590   :  { %v4475_v11 = vmul.f32 %v8608_v44, %v8532_v45 }
0x2591   :  { %v4490_v14 = vsel %vm1505_vm13, %v4476_v6, 0.0 }
0x2592   :  { %4462 = vadd.xlane.f32.xlu0 %v4461_v47  ;;  %4482 = vadd.xlane.f32.xlu1 %v4481_v46  ;;  %v8614_v61 = vpop.f32.mrb[36].mxu0  ;;  %v4487_v50 = vsel %vm1505_vm13, %v4475_v11, 0.0 }
0x2593   :  { %v4478_v22 = vmul.f32 %v8614_v61, %v8538_v55  ;;  %v8618_v2 = vpop.f32.mrb[37].mxu0 }
0x2594   :  { %v4477_v0 = vmul.f32 %v8618_v2, %v8540_v34 }
0x2595   :  { %v4496_v51 = vsel %vm1505_vm13, %v4478_v22, 0.0 }
0x2596   :  { %4491 = vadd.xlane.f32.xlu1 %v4490_v14  ;;  %v8623_v5 = vpop.f32.mrb[38].mxu0  ;;  %v4493_v24 = vsel %vm1505_vm13, %v4477_v0, 0.0 }
0x2597   :  { %9263 = vst [vmem:[#allocation9_spill] sm:$0xff] %v8623_v5  ;;  %v4480_v18 = vmul.f32 %v8623_v5, %v8546_v60  ;;  %v8627_v15 = vpop.f32.mrb[39].mxu0 }
0x2598   :  { %9264 = vst [vmem:[#allocation10_spill] sm:$0xff] %v8627_v15  ;;  %v4479_v59 = vmul.f32 %v8627_v15, %v8548_v25 }
0x259a   :  { %4488 = vadd.xlane.f32.xlu1 %v4487_v50  ;;  %v8632_v58 = vpop.f32.mrb[40].mxu0  ;;  %v4502_v50 = vsel %vm1505_vm13, %v4480_v18, 0.0 }
0x259b   :  { %v4506_v57 = vmul.f32 %v8632_v58, %v8522_v30  ;;  %v8636_v38 = vpop.f32.mrb[41].mxu0 }
0x259c   :  { %v4505_v17 = vmul.f32 %v8636_v38, %v8524_v31 }
0x259d   :  { %v4516_v1 = vsel %vm1505_vm13, %v4506_v57, 0.0 }
0x259e   :  { %4497 = vadd.xlane.f32.xlu1 %v4496_v51  ;;  %4517 = vadd.xlane.f32.xlu0 %v4516_v1  ;;  %v8642_v54 = vpop.f32.mrb[42].mxu0  ;;  %v4513_v28 = vsel %vm1505_vm13, %v4505_v17, 0.0  ;;  %v4467_v51 = vsel %vm1505_vm13, %v8591_v12, 0.0 }
0x259f   :  { %v4508_v16 = vmul.f32 %v8642_v54, %v8530_v32  ;;  %v8646_v21 = vpop.f32.mrb[43].mxu0 }
0x25a0   :  { %v4507_v23 = vmul.f32 %v8646_v21, %v8532_v45 }
0x25a1   :  { %v4522_v62 = vsel %vm1505_vm13, %v4508_v16, 0.0 }
0x25a2   :  { %4494 = vadd.xlane.f32.xlu1 %v4493_v24  ;;  %4514 = vadd.xlane.f32.xlu0 %v4513_v28  ;;  %v8652_v29 = vpop.f32.mrb[44].mxu0  ;;  %v4519_v10 = vsel %vm1505_vm13, %v4507_v23, 0.0  ;;  %v4786_v28 = vld [vmem:[%s8936_s14 + $0x8] sm:$0xff] }
0x25a3   :  { %v4510_v52 = vmul.f32 %v8652_v29, %v8538_v55  ;;  %v8656_v41 = vpop.f32.mrb[45].mxu0 }
0x25a4   :  { %v4509_v27 = vmul.f32 %v8656_v41, %v8540_v34 }
0x25a5   :  { %v4528_v43 = vsel %vm1505_vm13, %v4510_v52, 0.0  ;;  %v4787_v52 = vld [vmem:[%s8936_s14 + $0x10] sm:$0xff] }
0x25a6   :  { %4523 = vadd.xlane.f32.xlu0 %v4522_v62  ;;  %v8661_v8 = vpop.f32.mrb[46].mxu0  ;;  %v4525_v46 = vsel %vm1505_vm13, %v4509_v27, 0.0  ;;  %v4788_v62 = vld [vmem:[%s8936_s14 + $0x18] sm:$0xff] }
0x25a7   :  { %9265 = vst [vmem:[#allocation11_spill] sm:$0xff] %v8661_v8  ;;  %v4512_v49 = vmul.f32 %v8661_v8, %v8546_v60  ;;  %v8665_v56 = vpop.f32.mrb[47].mxu0 }
0x25a8   :  { %9266 = vst [vmem:[#allocation12_spill] sm:$0xff] %v8665_v56  ;;  %v4511_v7 = vmul.f32 %v8665_v56, %v8548_v25 }
0x25aa   :  { %4520 = vadd.xlane.f32.xlu0 %v4519_v10  ;;  %v8670_v19 = vpop.f32.mrb[48].mxu0  ;;  %v4531_v18 = vsel %vm1505_vm13, %v4511_v7, 0.0 }
0x25ab   :  { %v4538_v63 = vmul.f32 %v8670_v19, %v8522_v30  ;;  %v8674_v40 = vpop.f32.mrb[49].mxu0 }
0x25ac   :  { %v4537_v36 = vmul.f32 %v8674_v40, %v8524_v31  ;;  %v4499_v31 = vsel %vm1505_vm13, %v4479_v59, 0.0 }
0x25ad   :  { %v4548_v3 = vsel %vm1505_vm13, %v4538_v63, 0.0 }
0x25ae   :  { %4529 = vadd.xlane.f32.xlu0 %v4528_v43  ;;  %4549 = vadd.xlane.f32.xlu1 %v4548_v3  ;;  %v8680_v6 = vpop.f32.mrb[50].mxu0 }
0x25af   :  { %v4540_v11 = vmul.f32 %v8680_v6, %v8530_v32  ;;  %v8684_v47 = vpop.f32.mrb[51].mxu0 }
0x25b0   :  { %v4539_v30 = vmul.f32 %v8684_v47, %v8532_v45  ;;  %v4545_v45 = vsel %vm1505_vm13, %v4537_v36, 0.0 }
0x25b2   :  { %4526 = vadd.xlane.f32.xlu0 %v4525_v46  ;;  %4500 = vadd.xlane.f32.xlu1 %v4499_v31  ;;  %v8690_v22 = vpop.f32.mrb[52].mxu0  ;;  %v4551_v1 = vsel %vm1505_vm13, %v4539_v30, 0.0 }
0x25b3   :  { %v4542_v0 = vmul.f32 %v8690_v22, %v8538_v55  ;;  %v8694_v14 = vpop.f32.mrb[53].mxu0 }
0x25b4   :  { %v4541_v32 = vmul.f32 %v8694_v14, %v8540_v34  ;;  %v4554_v34 = vsel %vm1505_vm13, %v4540_v11, 0.0 }
0x25b5   :  { %v4560_v16 = vsel %vm1505_vm13, %v4542_v0, 0.0 }
0x25b6   :  { %4503 = vadd.xlane.f32.xlu1 %v4502_v50  ;;  %4546 = vadd.xlane.f32.xlu0 %v4545_v45  ;;  %v8700_v57 = vpop.f32.mrb[54].mxu0  ;;  %v4557_v12 = vsel %vm1505_vm13, %v4541_v32, 0.0 }
0x25b7   :  { %9267 = vst [vmem:[#allocation13_spill] sm:$0xff] %v8700_v57  ;;  %v4544_v59 = vmul.f32 %v8700_v57, %v8546_v60  ;;  %v8704_v17 = vpop.f32.mrb[55].mxu0  ;;  %v4470_v60 = vsel %vm1505_vm13, %v8585_v9, 0.0  ;;  %v4785_v9 = vld [vmem:[%s8936_s14] sm:$0xff] }
0x25b8   :  { %9268 = vst [vmem:[#allocation14_spill] sm:$0xff] %v8704_v17  ;;  %v4543_v55 = vmul.f32 %v8704_v17, %v8548_v25  ;;  %v4534_v25 = vsel %vm1505_vm13, %v4512_v49, 0.0  ;;  %v5967_v27 = vpack.c.bf16 %v4786_v28, %v4785_v9  ;;  %v5971_v49 = vpack.c.bf16 %v4788_v62, %v4787_v52 }
0x25b9   :  { %v4566_v24 = vsel %vm1505_vm13, %v4544_v59, 0.0 }
0x25ba   :  { %4468 = vadd.xlane.f32.xlu0 %v4467_v51  ;;  %4555 = vadd.xlane.f32.xlu1 %v4554_v34  ;;  %v4563_v23 = vsel %vm1505_vm13, %v4543_v55, 0.0 }
0x25bb   :  { %5968 = vmatprep.subr.bf16.mxu1 %v5967_v27 }
0x25bc   :  { %5970 = vmatpush3.bf16.msra.mxu1 %v5967_v27 }
0x25bd   :  { %5972 = vmatprep.subr.bf16.mxu1 %v5971_v49 }
0x25be   :  { %4532 = vadd.xlane.f32.xlu0 %v4531_v18  ;;  %4552 = vadd.xlane.f32.xlu1 %v4551_v1 }
0x25c0   :  { %5974 = vmatpush3.bf16.msra.mxu1 %v5971_v49 }
0x25c2   :  { %4471 = vadd.xlane.f32.xlu0 %v4470_v60  ;;  %4561 = vadd.xlane.f32.xlu1 %v4560_v16 }
0x25c6   :  { %4535 = vadd.xlane.f32.xlu0 %v4534_v25  ;;  %4558 = vadd.xlane.f32.xlu1 %v4557_v12 }
0x25ca   :  { %4564 = vadd.xlane.f32.xlu1 %v4563_v23 }
0x25ce   :  { %4567 = vadd.xlane.f32.xlu1 %v4566_v24 }
0x260b   :  { %v4454_v7 = vpop.xlane.xlu0 %4453 }
0x260f   :  { %v4451_v10 = vpop.xlane.xlu0 %4450 }
0x2613   :  { %v8732_v63 = vpop.xlane.xlu0 %4459 }
0x2617   :  { %v8734_v36 = vpop.xlane.xlu0 %4456 }
0x261b   :  { %v4486_v43 = vpop.xlane.xlu1 %4485  ;;  %v8736_v11 = vpop.xlane.xlu0 %4465 }
0x261c   :  { %v4570_v18 = vmax.f32 %v4454_v7, %v4486_v43 }
0x261f   :  { %v4483_v3 = vpop.xlane.xlu1 %4482  ;;  %v8740_v46 = vpop.xlane.xlu0 %4462 }
0x2620   :  { %v4569_v8 = vmax.f32 %v4451_v10, %v4483_v3 }
0x2623   :  { %v8738_v30 = vpop.xlane.xlu1 %4491 }
0x2627   :  { %v8742_v31 = vpop.xlane.xlu1 %4488 }
0x262b   :  { %v4518_v0 = vpop.xlane.xlu0 %4517  ;;  %v8744_v50 = vpop.xlane.xlu1 %4497 }
0x262f   :  { %v4515_v32 = vpop.xlane.xlu0 %4514  ;;  %v8748_v59 = vpop.xlane.xlu1 %4494 }
0x2633   :  { %v8746_v45 = vpop.xlane.xlu0 %4523 }
0x2637   :  { %v8750_v55 = vpop.xlane.xlu0 %4520 }
0x263b   :  { %v8752_v51 = vpop.xlane.xlu0 %4529  ;;  %v4550_v34 = vpop.xlane.xlu1 %4549 }
0x263c   :  { %v4578_v1 = vmax.f32 %v4518_v0, %v4550_v34 }
0x263e   :  { %v4586_v60 = vmax.f32 %v4570_v18, %v4578_v1 }
0x263f   :  { %v8754_v16 = vpop.xlane.xlu0 %4526  ;;  %v8756_v25 = vpop.xlane.xlu1 %4500 }
0x2640   :  { %v4594_v12 = vsub.f32 %v4454_v7, %v4586_v60  ;;  %v4618_v23 = vsub.f32 %v4486_v43, %v4586_v60  ;;  %v4642_v24 = vsub.f32 %v4518_v0, %v4586_v60  ;;  %v4666_v9 = vsub.f32 %v4550_v34, %v4586_v60 }
0x2641   :  { %v4572_v60 = vmax.f32 %v8732_v63, %v8738_v30 }
0x2642   :  { %v4603_v28 = vmul.f32 1.442695, %v4594_v12  ;;  %v4627_v52 = vmul.f32 1.442695, %v4618_v23  ;;  %v4651_v27 = vmul.f32 1.442695, %v4642_v24 }
0x2643   :  { %v4675_v62 = vmul.f32 1.442695, %v4666_v9  ;;  %v8758_v49 = vpop.xlane.xlu1 %4503  ;;  %v4547_v57 = vpop.xlane.xlu0 %4546 }
0x2644   :  { %6378 = vpow2.f32 %v4603_v28  ;;  %v4577_v5 = vmax.f32 %v4515_v32, %v4547_v57 }
0x2645   :  { %6380 = vpow2.f32 %v4627_v52 }
0x2646   :  { %6382 = vpow2.f32 %v4651_v27  ;;  %v4585_v18 = vmax.f32 %v4569_v8, %v4577_v5  ;;  %v4571_v5 = vmax.f32 %v8734_v36, %v8742_v31  ;;  %v4574_v8 = vmax.f32 %v8736_v11, %v8744_v50 }
0x2647   :  { %6384 = vpow2.f32 %v4675_v62  ;;  %v4556_v1 = vpop.xlane.xlu1 %4555  ;;  %v8760_v34 = vpop.xlane.xlu0 %4468  ;;  %v4573_v62 = vmax.f32 %v8740_v46, %v8748_v59 }
0x2648   :  { %v4593_v13 = vsub.f32 %v4451_v10, %v4585_v18  ;;  %v4617_v7 = vsub.f32 %v4483_v3, %v4585_v18  ;;  %v4641_v43 = vsub.f32 %v4515_v32, %v4585_v18  ;;  %v4665_v0 = vsub.f32 %v4547_v57, %v4585_v18 }
0x2649   :  { %v4580_v12 = vmax.f32 %v8746_v45, %v4556_v1 }
0x264a   :  { %v4601_v23 = vmul.f32 1.442695, %v4593_v13  ;;  %v4625_v24 = vmul.f32 1.442695, %v4617_v7  ;;  %v4649_v9 = vmul.f32 1.442695, %v4641_v43 }
0x264b   :  { %v4673_v28 = vmul.f32 1.442695, %v4665_v0  ;;  %v4588_v52 = vmax.f32 %v4572_v60, %v4580_v12  ;;  %v4553_v27 = vpop.xlane.xlu1 %4552  ;;  %v8775_v7 = vpop.xlane.xlu0 %4532 }
0x264c   :  { %6386 = vpow2.f32 %v4601_v23  ;;  %v4579_v57 = vmax.f32 %v8750_v55, %v4553_v27 }
0x264d   :  { %6388 = vpow2.f32 %v4625_v24  ;;  %v4596_v10 = vsub.f32 %v8732_v63, %v4588_v52  ;;  %v4620_v3 = vsub.f32 %v8738_v30, %v4588_v52  ;;  %v4644_v13 = vsub.f32 %v8746_v45, %v4588_v52 }
0x264e   :  { %v6379_v32 = vpop.eup %6378  ;;  %6390 = vpow2.f32 %v4649_v9  ;;  %v4668_v18 = vsub.f32 %v4556_v1, %v4588_v52  ;;  %v4587_v43 = vmax.f32 %v4571_v5, %v4579_v57 }
0x264f   :  { %v6381_v0 = vpop.eup %6380  ;;  %v4722_v60 = vmul.f32 %v6379_v32, %v8554_v42  ;;  %6392 = vpow2.f32 %v4673_v28  ;;  %v4607_v12 = vmul.f32 1.442695, %v4596_v10  ;;  %v4631_v23 = vmul.f32 1.442695, %v4620_v3  ;;  %v4562_v63 = vpop.xlane.xlu1 %4561 }
0x2650   :  { %v6383_v24 = vpop.eup %6382  ;;  %v4690_v30 = vadd.f32 %v6381_v0, %v6379_v32  ;;  %v4730_v45 = vmul.f32 %v6381_v0, %v8594_v37  ;;  %v4655_v17 = vmul.f32 1.442695, %v4644_v13  ;;  %v4679_v56 = vmul.f32 1.442695, %v4668_v18  ;;  %v8784_v18 = vpop.xlane.xlu0 %4471 }
0x2651   :  { %v6385_v15 = vpop.eup %6384  ;;  %v4746_v9 = vmul.f32 %v6383_v24, %v8632_v58  ;;  %6394 = vpow2.f32 %v4607_v12  ;;  %v4595_v1 = vsub.f32 %v8734_v36, %v4587_v43  ;;  %v4619_v52 = vsub.f32 %v8742_v31, %v4587_v43 }
0x2652   :  { %v4698_v5 = vadd.f32 %v6383_v24, %v4690_v30  ;;  %v4738_v42 = vadd.f32 %v4730_v45, %v4722_v60  ;;  %v4762_v28 = vmul.f32 %v6385_v15, %v8670_v19  ;;  %6396 = vpow2.f32 %v4631_v23 }
0x2653   :  { %6398 = vpow2.f32 %v4655_v17  ;;  %v4605_v57 = vmul.f32 1.442695, %v4595_v1  ;;  %v4629_v10 = vmul.f32 1.442695, %v4619_v52  ;;  %v4643_v37 = vsub.f32 %v8750_v55, %v4587_v43  ;;  %v4559_v3 = vpop.xlane.xlu1 %4558 }
0x2654   :  { %v4706_v13 = vadd.f32 %v6385_v15, %v4698_v5  ;;  %v4754_v32 = vadd.f32 %v4746_v9, %v4738_v42  ;;  %6400 = vpow2.f32 %v4679_v56  ;;  %v4667_v58 = vsub.f32 %v4553_v27, %v4587_v43 }
0x2655   :  { %v4575_v36 = vmax.f32 %v8760_v34, %v8756_v25  ;;  %6402 = vpow2.f32 %v4605_v57  ;;  %v4653_v31 = vmul.f32 1.442695, %v4643_v37  ;;  %v4582_v19 = vmax.f32 %v8752_v51, %v4562_v63 }
0x2656   :  { %v6387_v0 = vpop.eup %6386  ;;  %6404 = vrcp.f32 %v4706_v13  ;;  %v8789_v17 = vadd.f32 %v4762_v28, %v4754_v32  ;;  %v4677_v60 = vmul.f32 1.442695, %v4667_v58  ;;  %v4581_v55 = vmax.f32 %v8754_v16, %v4559_v3 }
0x2657   :  { %v6389_v15 = vpop.eup %6388  ;;  %6406 = vpow2.f32 %v4629_v10  ;;  %v4576_v56 = vmax.f32 %v8784_v18, %v8758_v49  ;;  %v4590_v27 = vmax.f32 %v4574_v8, %v4582_v19  ;;  %v4565_v43 = vpop.xlane.xlu1 %4564  ;;  %v8795_v12 = vmul.f32 %v6387_v0, %v8558_v39 }
0x2658   :  { %v6391_v23 = vpop.eup %6390  ;;  %v4689_v24 = vadd.f32 %v6389_v15, %v6387_v0  ;;  %6408 = vpow2.f32 %v4653_v31  ;;  %v4589_v30 = vmax.f32 %v4573_v62, %v4581_v55  ;;  %v4583_v45 = vmax.f32 %v8775_v7, %v4565_v43 }
0x2659   :  { %v8798_v9 = vpop.eup %6392  ;;  %6410 = vpow2.f32 %v4677_v60  ;;  %v4598_v1 = vsub.f32 %v8736_v11, %v4590_v27  ;;  %v4622_v52 = vsub.f32 %v8744_v50, %v4590_v27  ;;  %v4646_v5 = vsub.f32 %v8752_v51, %v4590_v27 }
0x265a   :  { %v4697_v8 = vadd.f32 %v6391_v23, %v4689_v24  ;;  %v4670_v42 = vsub.f32 %v4562_v63, %v4590_v27  ;;  %v4597_v39 = vsub.f32 %v8740_v46, %v4589_v30  ;;  %v4621_v28 = vsub.f32 %v8748_v59, %v4589_v30  ;;  %v4536_v59 = vpop.xlane.xlu0 %4535 }
0x265b   :  { %v8805_v57 = vpop.eup %6394  ;;  %v4611_v62 = vmul.f32 1.442695, %v4598_v1  ;;  %v4635_v10 = vmul.f32 1.442695, %v4622_v52  ;;  %v4659_v37 = vmul.f32 1.442695, %v4646_v5  ;;  %v4645_v13 = vsub.f32 %v8754_v16, %v4589_v30  ;;  %v4568_v32 = vpop.xlane.xlu1 %4567 }
0x265c   :  { %v8808_v58 = vpop.eup %6396  ;;  %v4705_v11 = vadd.f32 %v8798_v9, %v4697_v8  ;;  %v4683_v50 = vmul.f32 1.442695, %v4670_v42  ;;  %v4609_v51 = vmul.f32 1.442695, %v4597_v39  ;;  %v4633_v31 = vmul.f32 1.442695, %v4621_v28 }
0x265d   :  { %v8811_v63 = vpop.eup %6398  ;;  %v4692_v46 = vadd.f32 %v8808_v58, %v8805_v57  ;;  %6412 = vpow2.f32 %v4611_v62  ;;  %v4657_v19 = vmul.f32 1.442695, %v4645_v13  ;;  %v4669_v0 = vsub.f32 %v4559_v3, %v4589_v30 }
0x265e   :  { %v8815_v60 = vpop.eup %6400  ;;  %6414 = vrcp.f32 %v4705_v11  ;;  %v4591_v16 = vmax.f32 %v4575_v36, %v4583_v45  ;;  %v4584_v55 = vmax.f32 %v4536_v59, %v4568_v32  ;;  %v4729_v27 = vmul.f32 %v6389_v15, %v8598_v35 }
0x265f   :  { %v6403_v24 = vpop.eup %6402  ;;  %v4700_v1 = vadd.f32 %v8811_v63, %v4692_v46  ;;  %6416 = vpow2.f32 %v4635_v10  ;;  %v4681_v52 = vmul.f32 1.442695, %v4669_v0  ;;  %v4745_v5 = vmul.f32 %v6391_v23, %v8636_v38 }
0x2660   :  { %v6405_v8 = vpop.eup %6404  ;;  %6418 = vpow2.f32 %v4659_v37  ;;  %v4599_v42 = vsub.f32 %v8760_v34, %v4591_v16  ;;  %v4623_v3 = vsub.f32 %v8756_v25, %v4591_v16  ;;  %v4647_v30 = vsub.f32 %v8775_v7, %v4591_v16 }
0x2661   :  { %v6407_v39 = vpop.eup %6406  ;;  %v4708_v36 = vadd.f32 %v8815_v60, %v4700_v1  ;;  %6420 = vpow2.f32 %v4683_v50  ;;  %v4671_v35 = vsub.f32 %v4565_v43, %v4591_v16  ;;  %v4592_v15 = vmax.f32 %v4576_v56, %v4584_v55 }
0x2662   :  { %v6409_v45 = vpop.eup %6408  ;;  %v4691_v28 = vadd.f32 %v6407_v39, %v6403_v24  ;;  %6422 = vpow2.f32 %v4609_v51  ;;  %v4613_v62 = vmul.f32 1.442695, %v4599_v42  ;;  %v4637_v10 = vmul.f32 1.442695, %v4623_v3 }
0x2663   :  { %v6411_v38 = vpop.eup %6410  ;;  %6424 = vrcp.f32 %v4708_v36  ;;  %v4661_v23 = vmul.f32 1.442695, %v4647_v30  ;;  %v4685_v37 = vmul.f32 1.442695, %v4671_v35  ;;  %v4600_v34 = vsub.f32 %v8784_v18, %v4592_v15 }
0x2664   :  { %v4699_v25 = vadd.f32 %v6409_v45, %v4691_v28  ;;  %6426 = vpow2.f32 %v4633_v31  ;;  %v4624_v7 = vsub.f32 %v8758_v49, %v4592_v15  ;;  %v4648_v13 = vsub.f32 %v4536_v59, %v4592_v15 }
0x2665   :  { %6428 = vpow2.f32 %v4657_v19  ;;  %v4615_v11 = vmul.f32 1.442695, %v4600_v34  ;;  %v4672_v43 = vsub.f32 %v4568_v32, %v4592_v15  ;;  %v4737_v56 = vadd.f32 %v4729_v27, %v8795_v12 }
0x2666   :  { %v4707_v50 = vadd.f32 %v6411_v38, %v4699_v25  ;;  %6430 = vpow2.f32 %v4681_v52  ;;  %v4639_v51 = vmul.f32 1.442695, %v4624_v7  ;;  %v4663_v46 = vmul.f32 1.442695, %v4648_v13 }
0x2667   :  { %v6413_v0 = vpop.eup %6412  ;;  %6432 = vpow2.f32 %v4613_v62  ;;  %v4687_v16 = vmul.f32 1.442695, %v4672_v43  ;;  %v4753_v55 = vadd.f32 %v4745_v5, %v4737_v56  ;;  %v4761_v18 = vmul.f32 %v8798_v9, %v8674_v40 }
0x2668   :  { %v6415_v31 = vpop.eup %6414  ;;  %6434 = vrcp.f32 %v4707_v50  ;;  %v4778_v49 = vmul.f32 %v6405_v8, %v8789_v17  ;;  %v4723_v59 = vmul.f32 %v6403_v24, %v8567_v33  ;;  %v4731_v32 = vmul.f32 %v6407_v39, %v8608_v44  ;;  %v9269_v50 = vld [vmem:[#allocation10_spill] sm:$0xff] }
0x2669   :  { %v6417_v12 = vpop.eup %6416  ;;  %6436 = vpow2.f32 %v4637_v10  ;;  %v4769_v19 = vadd.f32 %v4761_v18, %v4753_v55  ;;  %v4747_v27 = vmul.f32 %v6409_v45, %v8646_v21  ;;  %v4763_v1 = vmul.f32 %v6411_v38, %v8684_v47 }
0x266a   :  { %v6419_v52 = vpop.eup %6418  ;;  %v4694_v5 = vadd.f32 %v6417_v12, %v6413_v0  ;;  %6438 = vpow2.f32 %v4661_v23  ;;  %v4739_v42 = vadd.f32 %v4731_v32, %v4723_v59  ;;  %v4724_v40 = vmul.f32 %v8805_v57, %v8563_v26 }
0x266b   :  { %v6421_v9 = vpop.eup %6420  ;;  %6440 = vpow2.f32 %v4685_v37  ;;  %v4777_v17 = vmul.f32 %v6415_v31, %v4769_v19  ;;  %v4732_v33 = vmul.f32 %v8808_v58, %v8604_v53  ;;  %v4748_v44 = vmul.f32 %v8811_v63, %v8642_v54 }
0x266c   :  { %v6423_v24 = vpop.eup %6422  ;;  %v4702_v21 = vadd.f32 %v6419_v52, %v4694_v5  ;;  %6442 = vpow2.f32 %v4615_v11  ;;  %v4755_v47 = vadd.f32 %v4747_v27, %v4739_v42  ;;  %v4764_v8 = vmul.f32 %v8815_v60, %v8680_v6  ;;  %v9274_v42 = vld [vmem:[#allocation11_spill] sm:$0xff] }
0x266d   :  { %v6425_v3 = vpop.eup %6424  ;;  %6444 = vpow2.f32 %v4639_v51  ;;  %5623 = vmatprep.mubr.msk.f32.mxu1 %vm1505_vm13, %v4777_v17  ;;  %v4740_v26 = vadd.f32 %v4732_v33, %v4724_v40  ;;  %v4725_v57 = vmul.f32 %v6423_v24, %v8576_v4  ;;  %v4726_v30 = vmul.f32 %v6413_v0, %v8572_v48 }
0x266e   :  { %v6427_v53 = vpop.eup %6426  ;;  %v4710_v58 = vadd.f32 %v6421_v9, %v4702_v21  ;;  %6446 = vpow2.f32 %v4663_v46  ;;  %5624 = vmatmul.mubr.msk.f32.vlgmr.msra.gmra.mrb[16].mxu1 %vm1505_vm13, %v4778_v49  ;;  %v4771_v54 = vadd.f32 %v4763_v1, %v4755_v47  ;;  %v4734_v63 = vmul.f32 %v6417_v12, %v8614_v61  ;;  %v9272_v49 = vld [vmem:[#allocation8_spill] sm:$0xff]  ;;  %v9273_v1 = vld [vmem:[#allocation9_spill] sm:$0xff] }
0x266f   :  { %v6429_v39 = vpop.eup %6428  ;;  %v4693_v36 = vadd.f32 %v6427_v53, %v6423_v24  ;;  %6448 = vpow2.f32 %v4687_v16  ;;  %v4756_v6 = vadd.f32 %v4748_v44, %v4740_v26  ;;  %v4733_v60 = vmul.f32 %v6427_v53, %v8618_v2  ;;  %v9270_v16 = vld [vmem:[#allocation12_spill] sm:$0xff]  ;;  %v9275_v47 = vld [vmem:[#allocation13_spill] sm:$0xff] }
0x2670   :  { %v6431_v35 = vpop.eup %6430  ;;  %v4742_v15 = vadd.f32 %v4734_v63, %v4726_v30  ;;  %v4750_v4 = vmul.f32 %v6419_v52, %v8652_v29  ;;  %v4749_v10 = vmul.f32 %v6429_v39, %v8656_v41  ;;  %6450 = vrcp.f32 %v4710_v58 }
0x2671   :  { %v6433_v45 = vpop.eup %6432  ;;  %v4701_v48 = vadd.f32 %v6429_v39, %v4693_v36  ;;  %v4772_v28 = vadd.f32 %v4764_v8, %v4756_v6  ;;  %v4741_v62 = vadd.f32 %v4733_v60, %v4725_v57  ;;  %v4766_v61 = vmul.f32 %v6421_v9, %v8690_v22  ;;  %v5059_v39 = vld [vmem:[%s8937_s16] sm:$0xff]  ;;  %v5060_v36 = vld [vmem:[%s8937_s16 + $0x8] sm:$0xff]  ;;  %v5061_v60 = vld [vmem:[%s8937_s16 + $0x10] sm:$0xff] }
0x2672   :  { %v6435_v38 = vpop.eup %6434  ;;  %v4758_v23 = vadd.f32 %v4750_v4, %v4742_v15  ;;  %v4727_v37 = vmul.f32 %v6433_v45, %v8587_v20  ;;  %v4765_v13 = vmul.f32 %v6431_v35, %v8694_v14  ;;  %v9271_v14 = vld [vmem:[#allocation14_spill] sm:$0xff]  ;;  %v5975_v6 = vpack.c.bf16 %v5060_v36, %v5059_v39 }
0x2673   :  { %v6437_v34 = vpop.eup %6436  ;;  %v4709_v25 = vadd.f32 %v6431_v35, %v4701_v48  ;;  %v4779_v2 = vmul.f32 %v6435_v38, %v4771_v54  ;;  %v4757_v7 = vadd.f32 %v4749_v10, %v4741_v62  ;;  %v4780_v43 = vmul.f32 %v6425_v3, %v4772_v28  ;;  %v5062_v35 = vld [vmem:[%s8937_s16 + $0x18] sm:$0xff] }
0x2674   :  { %v6439_v29 = vpop.eup %6438  ;;  %v4695_v11 = vadd.f32 %v6437_v34, %v6433_v45  ;;  %v4774_v56 = vadd.f32 %v4766_v61, %v4758_v23  ;;  %v4735_v51 = vmul.f32 %v6437_v34, %v9269_v50  ;;  %5976 = vmatprep.subr.bf16.mxu0 %v5975_v6  ;;  %v5979_v15 = vpack.c.bf16 %v5062_v35, %v5061_v60 }
0x2675   :  { %v6441_v41 = vpop.eup %6440  ;;  %6452 = vrcp.f32 %v4709_v25  ;;  %5626 = vmatprep.mubr.msk.f32.mxu1 %vm1505_vm13, %v4779_v2  ;;  %v4773_v46 = vadd.f32 %v4765_v13, %v4757_v7  ;;  %v4751_v55 = vmul.f32 %v6439_v29, %v9270_v16  ;;  %5978 = vmatpush3.bf16.msra.mxu0 %v5975_v6 }
0x2676   :  { %v6443_v22 = vpop.eup %6442  ;;  %v4703_v0 = vadd.f32 %v6439_v29, %v4695_v11  ;;  %5627 = vmatmul.mubr.msk.f32.gmra.mrb[18].mxu1 %vm1505_vm13, %v4780_v43  ;;  %v4743_v20 = vadd.f32 %v4735_v51, %v4727_v37  ;;  %v4767_v31 = vmul.f32 %v6441_v41, %v9271_v14  ;;  %5980 = vmatprep.subr.bf16.mxu0 %v5979_v15  ;;  %v5418_v11 = vld [vmem:[%s8938_s17] ss:$0 sm:$0xff] }
0x2677   :  { %v6445_v18 = vpop.eup %6444  ;;  %v4728_v59 = vmul.f32 %v6443_v22, %v9272_v49 }
0x2678   :  { %v6447_v32 = vpop.eup %6446  ;;  %v4711_v12 = vadd.f32 %v6441_v41, %v4703_v0  ;;  %v4696_v19 = vadd.f32 %v6445_v18, %v6443_v22  ;;  %v4759_v27 = vadd.f32 %v4751_v55, %v4743_v20  ;;  %v4736_v52 = vmul.f32 %v6445_v18, %v9273_v1 }
0x2679   :  { %v6449_v5 = vpop.eup %6448  ;;  %v4752_v40 = vmul.f32 %v6447_v32, %v9274_v42  ;;  %5982 = vmatpush3.bf16.msra.mxu0 %v5979_v15 }
0x267a   :  { %6454 = vrcp.f32 %v4711_v12  ;;  %v4704_v9 = vadd.f32 %v6447_v32, %v4696_v19  ;;  %v4775_v17 = vadd.f32 %v4767_v31, %v4759_v27  ;;  %v4744_v33 = vadd.f32 %v4736_v52, %v4728_v59  ;;  %v6451_v44 = vpop.eup %6450 }
0x267b   :  { %v4768_v8 = vmul.f32 %v6449_v5, %v9275_v47  ;;  %v4782_v30 = vmul.f32 %v6451_v44, %v4774_v56 }
0x267c   :  { %v4712_v24 = vadd.f32 %v6449_v5, %v4704_v9  ;;  %v4760_v21 = vadd.f32 %v4752_v40, %v4744_v33 }
0x267e   :  { %6456 = vrcp.f32 %v4712_v24  ;;  %v4776_v3 = vadd.f32 %v4768_v8, %v4760_v21 }
0x267f   :  { %v6453_v26 = vpop.eup %6452 }
0x2680   :  { %v4781_v57 = vmul.f32 %v6453_v26, %v4773_v46 }
0x2682   :  { %5629 = vmatprep.mubr.msk.f32.mxu1 %vm1505_vm13, %v4781_v57 }
0x2683   :  { %5630 = vmatmul.mubr.msk.f32.gmra.mrb[20].mxu1 %vm1505_vm13, %v4782_v30 }
0x2684   :  { %v6455_v53 = vpop.eup %6454 }
0x2685   :  { %v4783_v58 = vmul.f32 %v6455_v53, %v4775_v17 }
0x2687   :  { %5632 = vmatprep.mubr.msk.f32.mxu1 %vm1505_vm13, %v4783_v58 }
0x2688   :  { %v6457_v54 = vpop.eup %6456 }
0x2689   :  { %v4784_v63 = vmul.f32 %v6457_v54, %v4776_v3 }
0x268b   :  { %5633 = vmatmul.mubr.msk.f32.gmra.mrb[22].mxu1 %vm1505_vm13, %v4784_v63 }
0x2741   :  { %v5625_v4 = vpop.f32.mrb[16].mxu1 }
0x2742   :  { %v5012_v45 = vpop.f32.mrb[17].mxu1 }
0x2743   :  { %6458 = vtanh.f32 %v5012_v45 }
0x2744   :  { %6460 = vtanh.f32 %v5625_v4 }
0x2749   :  { %v5628_v48 = vpop.f32.mrb[18].mxu1 }
0x274a   :  { %v5022_v28 = vpop.f32.mrb[19].mxu1 }
0x274b   :  { %6462 = vtanh.f32 %v5022_v28 }
0x274c   :  { %6464 = vtanh.f32 %v5628_v48 }
0x274d   :  { %v6459_v62 = vpop.eup %6458 }
0x274e   :  { %v6461_v10 = vpop.eup %6460  ;;  %5643 = vmatprep.mubr.msk.f32.mxu0 %vm1505_vm13, %v6459_v62 }
0x274f   :  { %5644 = vmatmul.mubr.msk.f32.vlgmr.msra.gmra.mrb[56].mxu0 %vm1505_vm13, %v6461_v10 }
0x2755   :  { %v6463_v38 = vpop.eup %6462 }
0x2756   :  { %v6465_v23 = vpop.eup %6464  ;;  %v5631_v61 = vpop.f32.mrb[20].mxu1  ;;  %5646 = vmatprep.mubr.msk.f32.mxu0 %vm1505_vm13, %v6463_v38 }
0x2757   :  { %v5032_v37 = vpop.f32.mrb[21].mxu1  ;;  %5647 = vmatmul.mubr.msk.f32.gmra.mrb[58].mxu0 %vm1505_vm13, %v6465_v23 }
0x2758   :  { %6466 = vtanh.f32 %v5032_v37 }
0x2759   :  { %6468 = vtanh.f32 %v5631_v61 }
0x275e   :  { %v5634_v34 = vpop.f32.mrb[22].mxu1 }
0x275f   :  { %v5042_v25 = vpop.f32.mrb[23].mxu1 }
0x2760   :  { %6470 = vtanh.f32 %v5042_v25 }
0x2761   :  { %6472 = vtanh.f32 %v5634_v34 }
0x2762   :  { %v6467_v2 = vpop.eup %6466 }
0x2763   :  { %v6469_v7 = vpop.eup %6468  ;;  %5649 = vmatprep.mubr.msk.f32.mxu0 %vm1505_vm13, %v6467_v2 }
0x2764   :  { %5650 = vmatmul.mubr.msk.f32.gmra.mrb[60].mxu0 %vm1505_vm13, %v6469_v7 }
0x276a   :  { %v6471_v13 = vpop.eup %6470 }
0x276b   :  { %v6473_v29 = vpop.eup %6472  ;;  %5652 = vmatprep.mubr.msk.f32.mxu0 %vm1505_vm13, %v6471_v13 }
0x276c   :  { %5653 = vmatmul.mubr.msk.f32.gmra.mrb[62].mxu0 %vm1505_vm13, %v6473_v29 }
0x2822   :  { %v5645_v43 = vpop.f32.mrb[56].mxu0 }
0x2823   :  { %v5166_v56 = vadd.f32 %v5645_v43, %v5418_v11  ;;  %v5160_v50 = vpop.f32.mrb[57].mxu0 }
0x2824   :  { %v5161_v51 = vadd.f32 %v5418_v11, %v5160_v50 }
0x2825   :  { %v5428_v41 = vmul.f32 -1.442695, %v5166_v56 }
0x2826   :  { %v5427_v46 = vmul.f32 -1.442695, %v5161_v51 }
0x2827   :  { %6474 = vpow2.f32 %v5428_v41 }
0x2828   :  { %6476 = vpow2.f32 %v5427_v46 }
0x282a   :  { %v5648_v22 = vpop.f32.mrb[58].mxu0 }
0x282b   :  { %v5176_v0 = vadd.f32 %v5648_v22, %v5418_v11  ;;  %v5170_v20 = vpop.f32.mrb[59].mxu0 }
0x282c   :  { %v5171_v16 = vadd.f32 %v5418_v11, %v5170_v20 }
0x282d   :  { %v5430_v55 = vmul.f32 -1.442695, %v5176_v0 }
0x282e   :  { %v5429_v18 = vmul.f32 -1.442695, %v5171_v16 }
0x282f   :  { %6478 = vpow2.f32 %v5430_v55 }
0x2830   :  { %6480 = vpow2.f32 %v5429_v18 }
0x2831   :  { %v6475_v14 = vpop.eup %6474 }
0x2832   :  { %v6477_v31 = vpop.eup %6476  ;;  %v5224_v49 = vadd.f32 1.0, %v6475_v14 }
0x2833   :  { %v5223_v59 = vadd.f32 1.0, %v6477_v31 }
0x2834   :  { %6482 = vrcp.f32 %v5224_v49 }
0x2835   :  { %6484 = vrcp.f32 %v5223_v59 }
0x2837   :  { %v5651_v32 = vpop.f32.mrb[60].mxu0 }
0x2838   :  { %v5186_v12 = vadd.f32 %v5651_v32, %v5418_v11  ;;  %v5180_v19 = vpop.f32.mrb[61].mxu0 }
0x2839   :  { %v6479_v27 = vpop.eup %6478  ;;  %v5181_v1 = vadd.f32 %v5418_v11, %v5180_v19 }
0x283a   :  { %v6481_v52 = vpop.eup %6480  ;;  %v5226_v5 = vadd.f32 1.0, %v6479_v27  ;;  %v5432_v42 = vmul.f32 -1.442695, %v5186_v12 }
0x283b   :  { %v5225_v40 = vadd.f32 1.0, %v6481_v52  ;;  %v5431_v9 = vmul.f32 -1.442695, %v5181_v1 }
0x283c   :  { %6486 = vrcp.f32 %v5226_v5 }
0x283d   :  { %6488 = vrcp.f32 %v5225_v40 }
0x283e   :  { %v6483_v17 = vpop.eup %6482  ;;  %6490 = vpow2.f32 %v5432_v42 }
0x283f   :  { %v6485_v33 = vpop.eup %6484  ;;  %5249 = vst.msk [vmem:[%s8939_s18 + $0x8] sm:$0xff] %vm5247_vm0, %v6483_v17  ;;  %6492 = vpow2.f32 %v5431_v9  ;;  %v5654_v44 = vpop.f32.mrb[62].mxu0 }
0x2840   :  { %5248 = vst.msk [vmem:[%s8939_s18] sm:$0xff] %vm5247_vm0, %v6485_v33  ;;  %v5196_v24 = vadd.f32 %v5654_v44, %v5418_v11  ;;  %v5190_v21 = vpop.f32.mrb[63].mxu0 }
0x2841   :  { %v5191_v47 = vadd.f32 %v5418_v11, %v5190_v21 }
0x2842   :  { %v5434_v8 = vmul.f32 -1.442695, %v5196_v24 }
0x2843   :  { %v5433_v3 = vmul.f32 -1.442695, %v5191_v47 }
0x2844   :  { %6494 = vpow2.f32 %v5434_v8 }
0x2845   :  { %6496 = vpow2.f32 %v5433_v3 }
0x2846   :  { %v6487_v26 = vpop.eup %6486 }
0x2847   :  { %v6489_v57 = vpop.eup %6488  ;;  %5251 = vst.msk [vmem:[%s8939_s18 + $0x18] sm:$0xff] %vm5247_vm0, %v6487_v26 }
0x2848   :  { %v6491_v30 = vpop.eup %6490  ;;  %5250 = vst.msk [vmem:[%s8939_s18 + $0x10] sm:$0xff] %vm5247_vm0, %v6489_v57 }
0x2849   :  { %v6493_v53 = vpop.eup %6492  ;;  %v5228_v58 = vadd.f32 1.0, %v6491_v30 }
0x284a   :  { %v5227_v54 = vadd.f32 1.0, %v6493_v53 }
0x284b   :  { %6498 = vrcp.f32 %v5228_v58 }
0x284c   :  { %6500 = vrcp.f32 %v5227_v54 }
0x284e   :  { %v6495_v63 = vpop.eup %6494 }
0x284f   :  { %v6497_v39 = vpop.eup %6496  ;;  %v5230_v36 = vadd.f32 1.0, %v6495_v63 }
0x2850   :  { %v5229_v6 = vadd.f32 1.0, %v6497_v39 }
0x2851   :  { %6502 = vrcp.f32 %v5230_v36 }
0x2852   :  { %6504 = vrcp.f32 %v5229_v6 }
0x2855   :  { %v6499_v60 = vpop.eup %6498 }
0x2856   :  { %v6501_v35 = vpop.eup %6500  ;;  %5253 = vst.msk [vmem:[%s8939_s18 + $0x28] sm:$0xff] %vm5247_vm0, %v6499_v60 }
0x2857   :  { %5252 = vst.msk [vmem:[%s8939_s18 + $0x20] sm:$0xff] %vm5247_vm0, %v6501_v35 }
0x285b   :  { %v6503_v15 = vpop.eup %6502 }
0x285c   :  { %v6505_v4 = vpop.eup %6504  ;;  %5255 = vst.msk [vmem:[%s8939_s18 + $0x38] sm:$0xff] %vm5247_vm0, %v6503_v15 }
0x285d   :  { %5254 = vst.msk [vmem:[%s8939_s18 + $0x30] sm:$0xff] %vm5247_vm0, %v6505_v4 }

</bundles_post_ra>
